<compile_context>
chip_gen: v6e
topology: v6e:2x2x1
jax: 0.10.0
libtpu: 0.0.40
codegen_flags: <defaults>
</compile_context>

<pallas_src>
import numpy as np
import jax
import jax.numpy as jnp
from jax import lax
from jax.experimental import pallas as pl
from jax.experimental.pallas import tpu as pltpu


# ----------------------------------------------------------------------------
# Natural cubic spline glue (controldiffeq.NaturalCubicSpline semantics).
# coeffs = (a, b, two_c, three_d), each of shape (B, len(times)-1, IC).
# ----------------------------------------------------------------------------
def _interpret_t(times, coeffs, t):
    b = coeffs[1]
    maxlen = b.shape[-2] - 1
    index = jnp.sum(t > times) - 1
    index = jnp.clip(index, 0, maxlen)
    frac = t - times[index]
    return frac, index


def spline_evaluate(times, coeffs, t):
    a, b, two_c, three_d = coeffs
    frac, i = _interpret_t(times, coeffs, t)
    inner = 0.5 * two_c[:, i, :] + three_d[:, i, :] * frac / 3.0
    inner = b[:, i, :] + inner * frac
    return a[:, i, :] + inner * frac


def spline_derivative(times, coeffs, t):
    a, b, two_c, three_d = coeffs
    frac, i = _interpret_t(times, coeffs, t)
    inner = two_c[:, i, :] + three_d[:, i, :] * frac
    return b[:, i, :] + inner * frac


# ----------------------------------------------------------------------------
# Kernel factory (closes over static batch / head geometry only; no arrays).
# ----------------------------------------------------------------------------
def _make_kernel(bsz, num_heads, head_dim):
    nh, hd = num_heads, head_dim
    hidden = nh * hd

    def layernorm(x, g, b):
        mu = jnp.mean(x, axis=-1, keepdims=True)
        var = jnp.mean(jnp.square(x - mu), axis=-1, keepdims=True)
        return (x - mu) * lax.rsqrt(var + 1e-5) * g + b

    def head_softmax(x, mask):
        # Single-pass per-head softmax:
        #   per-head max via nh cheap masked max-reduces (mask rows give the
        #   per-head column selectors, so no in-kernel iota), ONE exp over the
        #   whole tile, per-head sums via one mask matmul on the MXU, and one
        #   approximate EUP reciprocal.
        mfull = jnp.zeros_like(x)
        for g in range(nh):
            sel = mask[g * hd:g * hd + 1, :] > 0.5          # (1, H) head-g cols
            mg = jnp.max(jnp.where(sel, x, -1e30), axis=-1, keepdims=True)
            mfull = jnp.where(sel, mg, mfull)
        p = jnp.exp(x - mfull)
        s = jnp.dot(p, mask, preferred_element_type=jnp.float32)
        return p * pl.reciprocal(s, approx=True)

    def kernel(xdx_ref, wstage_ref, mask_ref, dxl_ref,
               w_cat_ref, b_cat_ref, ln_g_ref, ln_b_ref,
               w_k_ref, b_k_ref, w_v_ref, b_v_ref,
               w_ip_ref, b_ip_ref, w_q_ref, b_q_ref,
               w_op_ref, b_op_ref,
               ffln_g_ref, ffln_b_ref,
               w_f1_ref, b_f1_ref, w_f2_ref, b_f2_ref,
               w_lin_ref, b_lin_ref,
               out_ref, z_acc):
        c = pl.program_id(0)
        nc = pl.num_programs(0)

        @pl.when(c == 0)
        def _():
            z_acc[...] = jnp.zeros_like(z_acc)

        mask = mask_ref[...]
        ln_g = ln_g_ref[...]
        ln_b = ln_b_ref[...]

        # --- batched Hebb vector-field evaluations for this chunk -----------
        # TODO(synk): exact CDEHebbUpdateVectorFieldv2 source was not provided;
        # this keeps the stand-in field built from the members forward() uses:
        #   h = LN(input_proj(dX) + x_proj(X)), k = softmax_head(key(h)),
        #   v = tanh(value(h)), dz[b,h,:,:] = outer(v_h, k_h).
        # All row-wise work runs batch-flattened; only the trans-A MXU
        # z-accumulation is per batch element.
        _, chunk, two_ic = xdx_ref.shape
        rows = xdx_ref[...].reshape(bsz * chunk, two_ic)     # leading-dim merge
        h = layernorm(
            jnp.dot(rows, w_cat_ref[...], preferred_element_type=jnp.float32)
            + b_cat_ref[...], ln_g, ln_b)
        k = head_softmax(
            jnp.dot(h, w_k_ref[...], preferred_element_type=jnp.float32)
            + b_k_ref[...], mask)
        v = jnp.tanh(
            jnp.dot(h, w_v_ref[...], preferred_element_type=jnp.float32)
            + b_v_ref[...])
        # Fold the RK4 quadrature weights (shared across batch; broadcast here
        # instead of streaming a (B, M, 1) HBM broadcast).
        v = v.reshape(bsz, chunk, hidden) * wstage_ref[...][None, :, :]
        k = k.reshape(bsz, chunk, hidden)
        # z[b, p, q] += sum_c v[b, c, p] * k[b, c, q]
        for b in range(bsz):
            z_acc[b] += lax.dot_general(
                v[b], k[b], (((0,), (0,)), ((), ())),
                preferred_element_type=jnp.float32)

        # --- read-out (everything after the ODE solve), on the last step ----
        @pl.when(c == nc - 1)
        def _():
            qs = jnp.dot(dxl_ref[...], w_ip_ref[...],
                         preferred_element_type=jnp.float32) + b_ip_ref[...]
            qs = layernorm(qs, ln_g, ln_b)                   # input_layer_norm
            qs = head_softmax(
                jnp.dot(qs, w_q_ref[...],
                        preferred_element_type=jnp.float32) + b_q_ref[...],
                mask)
            # Per-head mat-vec, batched (replaces B single-row matmuls + concat):
            # out[b, p] = sum_q (z[b, p, q] * mask[p, q]) * qs[b, q]
            zm = z_acc[...] * mask[None, :, :]
            out = jnp.sum(zm * qs[:, None, :], axis=-1)      # (B, H)
            out = jnp.dot(out, w_op_ref[...],
                          preferred_element_type=jnp.float32) + b_op_ref[...]
            # TransformerFFlayers: out = out + W2 relu(W1 LN(out) + b1) + b2
            y = layernorm(out, ffln_g_ref[...], ffln_b_ref[...])
            y = jnp.maximum(
                jnp.dot(y, w_f1_ref[...],
                        preferred_element_type=jnp.float32) + b_f1_ref[...],
                0.0)
            y = jnp.dot(y, w_f2_ref[...],
                        preferred_element_type=jnp.float32) + b_f2_ref[...]
            out = out + y
            pred = jnp.dot(out, w_lin_ref[...],
                           preferred_element_type=jnp.float32) + b_lin_ref[...]
            out_ref[...] = pred.astype(out_ref.dtype)

    return kernel


# ----------------------------------------------------------------------------
# Parameter init (deterministic; mimics nn.Linear / nn.LayerNorm defaults).
# ----------------------------------------------------------------------------
def init_params(key, ic, h, oc, ff):
    def linear(k, fan_in, fan_out):
        k1, k2 = jax.random.split(k)
        bound = 1.0 / np.sqrt(fan_in)
        w = jax.random.uniform(k1, (fan_in, fan_out), jnp.float32, -bound, bound)
        b = jax.random.uniform(k2, (1, fan_out), jnp.float32, -bound, bound)
        return w, b

    keys = jax.random.split(key, 9)
    p = {}
    p["w_ip"], p["b_ip"] = linear(keys[0], ic, h)          # update_net.input_proj
    p["ln_g"], p["ln_b"] = (jnp.ones((1, h), jnp.float32),
                            jnp.zeros((1, h), jnp.float32))
    p["w_xp"], p["b_xp"] = linear(keys[1], ic, h)          # update_net x-projection (stand-in)
    p["w_k"], p["b_k"] = linear(keys[2], h, h)             # update_net.key_net (stand-in)
    p["w_v"], p["b_v"] = linear(keys[3], h, h)             # update_net.value_net (stand-in)
    p["w_q"], p["b_q"] = linear(keys[4], h, h)             # query_net
    p["w_op"], p["b_op"] = linear(keys[5], h, h)           # out_proj
    p["ffln_g"], p["ffln_b"] = (jnp.ones((1, h), jnp.float32),
                                jnp.zeros((1, h), jnp.float32))
    p["w_f1"], p["b_f1"] = linear(keys[6], h, ff)          # ff_block linear 1
    p["w_f2"], p["b_f2"] = linear(keys[7], ff, h)          # ff_block linear 2
    p["w_lin"], p["b_lin"] = linear(keys[8], h, oc)        # self.linear
    return p


# ----------------------------------------------------------------------------
# Wrapper: spline stage evaluations + RK4 quadrature packing + pallas_call.
# ----------------------------------------------------------------------------
def fast_weight_cde_v2_forward(times, coeffs, final_index, params, *,
                               num_heads, output_channels, chunk_rows=256):
    a = coeffs[0]
    bsz, _, ic = a.shape
    hidden = params["w_ip"].shape[1]
    nh = num_heads
    hd = hidden // nh
    oc = output_channels

    times_np = np.asarray(jax.device_get(times), dtype=np.float64)
    t_len = times_np.shape[0]
    fi = np.asarray(jax.device_get(final_index))
    assert np.all(fi == t_len - 1), "kernel implements the final_index == len(times)-1 case"
    # TODO(synk): general final_index gather and stream=True output paths not implemented.

    # torchdiffeq fixed-grid construction for method='rk4', step_size=min(diff(times)).
    step = float(np.min(np.diff(times_np)))
    t0, t1 = float(times_np[0]), float(times_np[-1])
    niters = int(np.ceil((t1 - t0) / step + 1.0))
    grid_t = np.arange(niters, dtype=np.float64) * step + t0
    grid_t[-1] = t1

    g0, g1 = grid_t[:-1], grid_t[1:]
    dts = g1 - g0
    # RK4 (3/8-rule) stage times and quadrature weights; z0 = field(t0) with
    # weight 1 is folded into the same weighted sum (field is z-independent).
    stage_t = np.stack([g0, g0 + dts / 3.0, g0 + 2.0 * dts / 3.0, g1], axis=1)
    stage_w = (dts[:, None] / 8.0) * np.array([1.0, 3.0, 3.0, 1.0])[None, :]
    eval_t = np.concatenate([[t0], stage_t.reshape(-1)])
    eval_w = np.concatenate([[1.0], stage_w.reshape(-1)])
    m_eval = eval_t.shape[0]

    # Chunk the evaluation points (up to chunk_rows stage rows per batch
    # element per grid step); pad the tail with zero-weight rows.
    chunk = chunk_rows
    if m_eval <= chunk:
        chunk = ((m_eval + 7) // 8) * 8
    m_pad = ((m_eval + chunk - 1) // chunk) * chunk
    n_chunks = m_pad // chunk

    ts = jnp.asarray(eval_t, jnp.float32)
    xs = jax.vmap(lambda t: spline_evaluate(times, coeffs, t))(ts)      # (M, B, IC)
    dxs = jax.vmap(lambda t: spline_derivative(times, coeffs, t))(ts)   # (M, B, IC)
    xdx = jnp.concatenate([dxs, xs], axis=-1)                           # (M, B, 2IC)
    xdx = jnp.transpose(xdx, (1, 0, 2)).astype(jnp.float32)             # (B, M, 2IC)
    xdx = jnp.pad(xdx, ((0, 0), (0, m_pad - m_eval), (0, 0)))

    # Stage weights: a single (m_pad, 1) column, shared across batch.
    w_stage_np = np.zeros((m_pad, 1), np.float32)
    w_stage_np[:m_eval, 0] = eval_w
    w_stage = jnp.asarray(w_stage_np)

    # Block-diagonal per-head mask, precomputed on the host and reused by both
    # the single-pass head softmax and the read-out.
    ri, ci = np.indices((hidden, hidden))
    head_mask = jnp.asarray(((ri // hd) == (ci // hd)).astype(np.float32))

    dx_last = spline_derivative(times, coeffs,
                                jnp.asarray(t1, jnp.float32)).astype(jnp.float32)

    # Fuse the two input projections into one matmul: [dX, X] @ [w_ip; w_xp].
    w_cat = jnp.concatenate([params["w_ip"], params["w_xp"]], axis=0)
    b_cat = params["b_ip"] + params["b_xp"]

    weight_ops = [
        head_mask, dx_last, w_cat, b_cat, params["ln_g"], params["ln_b"],
        params["w_k"], params["b_k"], params["w_v"], params["b_v"],
        params["w_ip"], params["b_ip"], params["w_q"], params["b_q"],
        params["w_op"], params["b_op"],
        params["ffln_g"], params["ffln_b"],
        params["w_f1"], params["b_f1"], params["w_f2"], params["b_f2"],
        params["w_lin"], params["b_lin"],
    ]

    def rep_spec(x):
        nd = x.ndim
        return pl.BlockSpec(x.shape, lambda c, _n=nd: (0,) * _n)

    in_specs = ([pl.BlockSpec((bsz, chunk, 2 * ic), lambda c: (0, c, 0)),
                 pl.BlockSpec((chunk, 1), lambda c: (c, 0))]
                + [rep_spec(x) for x in weight_ops])

    grid_spec = pltpu.PrefetchScalarGridSpec(
        num_scalar_prefetch=0,
        grid=(n_chunks,),
        in_specs=in_specs,
        out_specs=pl.BlockSpec((bsz, oc), lambda c: (0, 0)),
        scratch_shapes=[pltpu.VMEM((bsz, hidden, hidden), jnp.float32)],
    )

    kernel = _make_kernel(bsz, nh, hd)
    fn = pl.pallas_call(
        kernel,
        out_shape=jax.ShapeDtypeStruct((bsz, oc), jnp.float32),
        grid_spec=grid_spec,
        compiler_params=pltpu.CompilerParams(
            dimension_semantics=("arbitrary",)),
    )
    return fn(xdx, w_stage, *weight_ops)


if __name__ == "__main__":
    key = jax.random.PRNGKey(0)
    B, IC, H, OC, NH, T = 2, 4, 32, 8, 8, 8       # head_dim = 4
    FF = 4 * H                                    # trafo_ff_dim default

    k_par, k_c0, k_c1, k_c2, k_c3 = jax.random.split(key, 5)
    params = init_params(k_par, IC, H, OC, FF)

    times = jnp.linspace(0.0, 1.0, T, dtype=jnp.float32)
    coeffs = (
        0.5 * jax.random.normal(k_c0, (B, T - 1, IC), jnp.float32),
        0.5 * jax.random.normal(k_c1, (B, T - 1, IC), jnp.float32),
        0.2 * jax.random.normal(k_c2, (B, T - 1, IC), jnp.float32),
        0.1 * jax.random.normal(k_c3, (B, T - 1, IC), jnp.float32),
    )
    final_index = jnp.full((B,), T - 1, dtype=jnp.int32)

    pred_y = fast_weight_cde_v2_forward(
        times, coeffs, final_index, params, num_heads=NH, output_channels=OC)
    jax.block_until_ready(pred_y)
    assert pred_y.shape == (B, OC) and pred_y.dtype == jnp.float32
    assert bool(jnp.all(jnp.isfinite(pred_y)))
    print("KERNEL_OK")
</pallas_src>

<mosaic_0001>
module attributes {stable_mosaic.version = 11 : i64} {
  func.func @kernel(%arg0: i32, %arg1: memref<2x40x8xf32, #tpu.memory_space<vmem>>, %arg2: memref<40x1xf32, #tpu.memory_space<vmem>>, %arg3: memref<32x32xf32, #tpu.memory_space<vmem>>, %arg4: memref<2x4xf32, #tpu.memory_space<vmem>>, %arg5: memref<8x32xf32, #tpu.memory_space<vmem>>, %arg6: memref<1x32xf32, #tpu.memory_space<vmem>>, %arg7: memref<1x32xf32, #tpu.memory_space<vmem>>, %arg8: memref<1x32xf32, #tpu.memory_space<vmem>>, %arg9: memref<32x32xf32, #tpu.memory_space<vmem>>, %arg10: memref<1x32xf32, #tpu.memory_space<vmem>>, %arg11: memref<32x32xf32, #tpu.memory_space<vmem>>, %arg12: memref<1x32xf32, #tpu.memory_space<vmem>>, %arg13: memref<4x32xf32, #tpu.memory_space<vmem>>, %arg14: memref<1x32xf32, #tpu.memory_space<vmem>>, %arg15: memref<32x32xf32, #tpu.memory_space<vmem>>, %arg16: memref<1x32xf32, #tpu.memory_space<vmem>>, %arg17: memref<32x32xf32, #tpu.memory_space<vmem>>, %arg18: memref<1x32xf32, #tpu.memory_space<vmem>>, %arg19: memref<1x32xf32, #tpu.memory_space<vmem>>, %arg20: memref<1x32xf32, #tpu.memory_space<vmem>>, %arg21: memref<32x128xf32, #tpu.memory_space<vmem>>, %arg22: memref<1x128xf32, #tpu.memory_space<vmem>>, %arg23: memref<128x32xf32, #tpu.memory_space<vmem>>, %arg24: memref<1x32xf32, #tpu.memory_space<vmem>>, %arg25: memref<32x8xf32, #tpu.memory_space<vmem>>, %arg26: memref<1x8xf32, #tpu.memory_space<vmem>>, %arg27: memref<2x8xf32, #tpu.memory_space<vmem>>, %arg28: memref<2x32x32xf32, #tpu.memory_space<vmem>>) attributes {dimension_semantics = [#tpu.dimension_semantics<arbitrary>], iteration_bounds = array<i64: 1>, scalar_prefetch = 0 : i64, scratch_operands = 1 : i64, tpu.core_type = #tpu.core_type<tc>, window_params = [{transform_indices = @transform_0, window_bounds = array<i64: 2, 40, 8>}, {transform_indices = @transform_1, window_bounds = array<i64: 40, 1>}, {pipeline_mode = #tpu.pipeline_mode<synchronous>, transform_indices = @transform_2, window_bounds = array<i64: 32, 32>}, {pipeline_mode = #tpu.pipeline_mode<synchronous>, transform_indices = @transform_3, window_bounds = array<i64: 2, 4>}, {pipeline_mode = #tpu.pipeline_mode<synchronous>, transform_indices = @transform_4, window_bounds = array<i64: 8, 32>}, {pipeline_mode = #tpu.pipeline_mode<synchronous>, transform_indices = @transform_5, window_bounds = array<i64: 1, 32>}, {pipeline_mode = #tpu.pipeline_mode<synchronous>, transform_indices = @transform_6, window_bounds = array<i64: 1, 32>}, {pipeline_mode = #tpu.pipeline_mode<synchronous>, transform_indices = @transform_7, window_bounds = array<i64: 1, 32>}, {pipeline_mode = #tpu.pipeline_mode<synchronous>, transform_indices = @transform_8, window_bounds = array<i64: 32, 32>}, {pipeline_mode = #tpu.pipeline_mode<synchronous>, transform_indices = @transform_9, window_bounds = array<i64: 1, 32>}, {pipeline_mode = #tpu.pipeline_mode<synchronous>, transform_indices = @transform_10, window_bounds = array<i64: 32, 32>}, {pipeline_mode = #tpu.pipeline_mode<synchronous>, transform_indices = @transform_11, window_bounds = array<i64: 1, 32>}, {pipeline_mode = #tpu.pipeline_mode<synchronous>, transform_indices = @transform_12, window_bounds = array<i64: 4, 32>}, {pipeline_mode = #tpu.pipeline_mode<synchronous>, transform_indices = @transform_13, window_bounds = array<i64: 1, 32>}, {pipeline_mode = #tpu.pipeline_mode<synchronous>, transform_indices = @transform_14, window_bounds = array<i64: 32, 32>}, {pipeline_mode = #tpu.pipeline_mode<synchronous>, transform_indices = @transform_15, window_bounds = array<i64: 1, 32>}, {pipeline_mode = #tpu.pipeline_mode<synchronous>, transform_indices = @transform_16, window_bounds = array<i64: 32, 32>}, {pipeline_mode = #tpu.pipeline_mode<synchronous>, transform_indices = @transform_17, window_bounds = array<i64: 1, 32>}, {pipeline_mode = #tpu.pipeline_mode<synchronous>, transform_indices = @transform_18, window_bounds = array<i64: 1, 32>}, {pipeline_mode = #tpu.pipeline_mode<synchronous>, transform_indices = @transform_19, window_bounds = array<i64: 1, 32>}, {pipeline_mode = #tpu.pipeline_mode<synchronous>, transform_indices = @transform_20, window_bounds = array<i64: 32, 128>}, {pipeline_mode = #tpu.pipeline_mode<synchronous>, transform_indices = @transform_21, window_bounds = array<i64: 1, 128>}, {pipeline_mode = #tpu.pipeline_mode<synchronous>, transform_indices = @transform_22, window_bounds = array<i64: 128, 32>}, {pipeline_mode = #tpu.pipeline_mode<synchronous>, transform_indices = @transform_23, window_bounds = array<i64: 1, 32>}, {pipeline_mode = #tpu.pipeline_mode<synchronous>, transform_indices = @transform_24, window_bounds = array<i64: 32, 8>}, {pipeline_mode = #tpu.pipeline_mode<synchronous>, transform_indices = @transform_25, window_bounds = array<i64: 1, 8>}, {pipeline_mode = #tpu.pipeline_mode<synchronous>, transform_indices = @transform_26, window_bounds = array<i64: 2, 8>}]} {
    %c0_i32 = arith.constant 0 : i32
    %0 = arith.cmpi eq, %arg0, %c0_i32 : i32
    %1 = arith.extui %0 : i1 to i32
    %c0_i32_0 = arith.constant 0 : i32
    %2 = arith.cmpi ne, %1, %c0_i32_0 : i32
    scf.if %2 {
      %cst_71 = arith.constant 0.000000e+00 : f32
      %195 = vector.broadcast %cst_71 : f32 to vector<2x32x32xf32>
      %c0_72 = arith.constant 0 : index
      %c0_73 = arith.constant 0 : index
      %c0_74 = arith.constant 0 : index
      %196 = vector.load %arg28[%c0_72, %c0_73, %c0_74] : memref<2x32x32xf32, #tpu.memory_space<vmem>>, vector<2x32x32xf32>
      tpu.vector_store %arg28[%c0_72, %c0_73, %c0_74], %195 {strides = array<i32>} : memref<2x32x32xf32, #tpu.memory_space<vmem>>, vector<2x32x32xf32>,
    } else {
    }
    %c0 = arith.constant 0 : index
    %c0_1 = arith.constant 0 : index
    %3 = vector.load %arg3[%c0, %c0_1] : memref<32x32xf32, #tpu.memory_space<vmem>>, vector<32x32xf32>
    %c0_2 = arith.constant 0 : index
    %c0_3 = arith.constant 0 : index
    %4 = vector.load %arg7[%c0_2, %c0_3] : memref<1x32xf32, #tpu.memory_space<vmem>>, vector<1x32xf32>
    %c0_4 = arith.constant 0 : index
    %c0_5 = arith.constant 0 : index
    %5 = vector.load %arg8[%c0_4, %c0_5] : memref<1x32xf32, #tpu.memory_space<vmem>>, vector<1x32xf32>
    %c0_6 = arith.constant 0 : index
    %c0_7 = arith.constant 0 : index
    %c0_8 = arith.constant 0 : index
    %6 = vector.load %arg1[%c0_6, %c0_7, %c0_8] : memref<2x40x8xf32, #tpu.memory_space<vmem>>, vector<2x40x8xf32>
    %7 = vector.shape_cast %6 : vector<2x40x8xf32> to vector<80x8xf32>
    %c0_9 = arith.constant 0 : index
    %c0_10 = arith.constant 0 : index
    %8 = vector.load %arg5[%c0_9, %c0_10] : memref<8x32xf32, #tpu.memory_space<vmem>>, vector<8x32xf32>
    %cst = arith.constant dense<0.000000e+00> : vector<80x32xf32>
    %9 = tpu.matmul %7, %8, %cst {dimension_numbers = #tpu.dot_dimension_numbers<[1], [0], [0], [1], [0, 0, 1, 1], [], []>} : vector<80x8xf32>, vector<8x32xf32>, vector<80x32xf32> -> vector<80x32xf32>
    %c0_11 = arith.constant 0 : index
    %c0_12 = arith.constant 0 : index
    %10 = vector.load %arg6[%c0_11, %c0_12] : memref<1x32xf32, #tpu.memory_space<vmem>>, vector<1x32xf32>
    %11 = vector.broadcast %10 : vector<1x32xf32> to vector<80x32xf32>
    %12 = arith.addf %9, %11 : vector<80x32xf32>
    %cst_13 = arith.constant dense<0.000000e+00> : vector<80xf32>
    %13 = vector.multi_reduction <add>, %12, %cst_13 [1] : vector<80x32xf32> to vector<80xf32>
    %14 = vector.shape_cast %13 : vector<80xf32> to vector<80x1xf32>
    %cst_14 = arith.constant 3.200000e+01 : f32
    %15 = vector.broadcast %cst_14 : f32 to vector<80x1xf32>
    %16 = arith.divf %14, %15 : vector<80x1xf32>
    %17 = vector.broadcast %16 : vector<80x1xf32> to vector<80x32xf32>
    %18 = arith.subf %12, %17 : vector<80x32xf32>
    %19 = arith.mulf %18, %18 : vector<80x32xf32>
    %cst_15 = arith.constant dense<0.000000e+00> : vector<80xf32>
    %20 = vector.multi_reduction <add>, %19, %cst_15 [1] : vector<80x32xf32> to vector<80xf32>
    %21 = vector.shape_cast %20 : vector<80xf32> to vector<80x1xf32>
    %cst_16 = arith.constant 3.200000e+01 : f32
    %22 = vector.broadcast %cst_16 : f32 to vector<80x1xf32>
    %23 = arith.divf %21, %22 : vector<80x1xf32>
    %24 = vector.broadcast %16 : vector<80x1xf32> to vector<80x32xf32>
    %25 = arith.subf %12, %24 : vector<80x32xf32>
    %cst_17 = arith.constant 9.99999974E-6 : f32
    %26 = vector.broadcast %cst_17 : f32 to vector<80x1xf32>
    %27 = arith.addf %23, %26 : vector<80x1xf32>
    %28 = math.rsqrt %27 : vector<80x1xf32>
    %29 = vector.broadcast %28 : vector<80x1xf32> to vector<80x32xf32>
    %30 = arith.mulf %25, %29 : vector<80x32xf32>
    %31 = vector.broadcast %4 : vector<1x32xf32> to vector<80x32xf32>
    %32 = arith.mulf %30, %31 : vector<80x32xf32>
    %33 = vector.broadcast %5 : vector<1x32xf32> to vector<80x32xf32>
    %34 = arith.addf %32, %33 : vector<80x32xf32>
    %c0_18 = arith.constant 0 : index
    %c0_19 = arith.constant 0 : index
    %35 = vector.load %arg9[%c0_18, %c0_19] : memref<32x32xf32, #tpu.memory_space<vmem>>, vector<32x32xf32>
    %cst_20 = arith.constant dense<0.000000e+00> : vector<80x32xf32>
    %36 = tpu.matmul %34, %35, %cst_20 {dimension_numbers = #tpu.dot_dimension_numbers<[1], [0], [0], [1], [0, 0, 1, 1], [], []>} : vector<80x32xf32>, vector<32x32xf32>, vector<80x32xf32> -> vector<80x32xf32>
    %c0_21 = arith.constant 0 : index
    %c0_22 = arith.constant 0 : index
    %37 = vector.load %arg10[%c0_21, %c0_22] : memref<1x32xf32, #tpu.memory_space<vmem>>, vector<1x32xf32>
    %38 = vector.broadcast %37 : vector<1x32xf32> to vector<80x32xf32>
    %39 = arith.addf %36, %38 : vector<80x32xf32>
    %cst_23 = arith.constant 0.000000e+00 : f32
    %40 = vector.broadcast %cst_23 : f32 to vector<80x32xf32>
    %41 = vector.extract_strided_slice %3 {offsets = [0, 0], sizes = [1, 32], strides = [1, 1]} : vector<32x32xf32> to vector<1x32xf32>
    %cst_24 = arith.constant 5.000000e-01 : f32
    %42 = vector.broadcast %cst_24 : f32 to vector<1x32xf32>
    %43 = arith.cmpf ogt, %41, %42 : vector<1x32xf32>
    %cst_25 = arith.constant -1.000000e+30 : f32
    %44 = vector.shape_cast %43 : vector<1x32xi1> to vector<1x32xi1>
    %45 = vector.broadcast %44 : vector<1x32xi1> to vector<80x32xi1>
    %46 = vector.broadcast %cst_25 : f32 to vector<80x32xf32>
    %47 = arith.select %45, %39, %46 : vector<80x32xi1>, vector<80x32xf32>
    %cst_26 = arith.constant dense<0xFF800000> : vector<80xf32>
    %48 = vector.multi_reduction <maximumf>, %47, %cst_26 [1] : vector<80x32xf32> to vector<80xf32>
    %49 = vector.shape_cast %48 : vector<80xf32> to vector<80x1xf32>
    %50 = vector.shape_cast %43 : vector<1x32xi1> to vector<1x32xi1>
    %51 = vector.broadcast %50 : vector<1x32xi1> to vector<80x32xi1>
    %52 = vector.shape_cast %49 : vector<80x1xf32> to vector<80x1xf32>
    %53 = vector.broadcast %52 : vector<80x1xf32> to vector<80x32xf32>
    %54 = arith.select %51, %53, %40 : vector<80x32xi1>, vector<80x32xf32>
    %55 = vector.extract_strided_slice %3 {offsets = [4, 0], sizes = [1, 32], strides = [1, 1]} : vector<32x32xf32> to vector<1x32xf32>
    %cst_27 = arith.constant 5.000000e-01 : f32
    %56 = vector.broadcast %cst_27 : f32 to vector<1x32xf32>
    %57 = arith.cmpf ogt, %55, %56 : vector<1x32xf32>
    %cst_28 = arith.constant -1.000000e+30 : f32
    %58 = vector.shape_cast %57 : vector<1x32xi1> to vector<1x32xi1>
    %59 = vector.broadcast %58 : vector<1x32xi1> to vector<80x32xi1>
    %60 = vector.broadcast %cst_28 : f32 to vector<80x32xf32>
    %61 = arith.select %59, %39, %60 : vector<80x32xi1>, vector<80x32xf32>
    %cst_29 = arith.constant dense<0xFF800000> : vector<80xf32>
    %62 = vector.multi_reduction <maximumf>, %61, %cst_29 [1] : vector<80x32xf32> to vector<80xf32>
    %63 = vector.shape_cast %62 : vector<80xf32> to vector<80x1xf32>
    %64 = vector.shape_cast %57 : vector<1x32xi1> to vector<1x32xi1>
    %65 = vector.broadcast %64 : vector<1x32xi1> to vector<80x32xi1>
    %66 = vector.shape_cast %63 : vector<80x1xf32> to vector<80x1xf32>
    %67 = vector.broadcast %66 : vector<80x1xf32> to vector<80x32xf32>
    %68 = arith.select %65, %67, %54 : vector<80x32xi1>, vector<80x32xf32>
    %69 = vector.extract_strided_slice %3 {offsets = [8, 0], sizes = [1, 32], strides = [1, 1]} : vector<32x32xf32> to vector<1x32xf32>
    %cst_30 = arith.constant 5.000000e-01 : f32
    %70 = vector.broadcast %cst_30 : f32 to vector<1x32xf32>
    %71 = arith.cmpf ogt, %69, %70 : vector<1x32xf32>
    %cst_31 = arith.constant -1.000000e+30 : f32
    %72 = vector.shape_cast %71 : vector<1x32xi1> to vector<1x32xi1>
    %73 = vector.broadcast %72 : vector<1x32xi1> to vector<80x32xi1>
    %74 = vector.broadcast %cst_31 : f32 to vector<80x32xf32>
    %75 = arith.select %73, %39, %74 : vector<80x32xi1>, vector<80x32xf32>
    %cst_32 = arith.constant dense<0xFF800000> : vector<80xf32>
    %76 = vector.multi_reduction <maximumf>, %75, %cst_32 [1] : vector<80x32xf32> to vector<80xf32>
    %77 = vector.shape_cast %76 : vector<80xf32> to vector<80x1xf32>
    %78 = vector.shape_cast %71 : vector<1x32xi1> to vector<1x32xi1>
    %79 = vector.broadcast %78 : vector<1x32xi1> to vector<80x32xi1>
    %80 = vector.shape_cast %77 : vector<80x1xf32> to vector<80x1xf32>
    %81 = vector.broadcast %80 : vector<80x1xf32> to vector<80x32xf32>
    %82 = arith.select %79, %81, %68 : vector<80x32xi1>, vector<80x32xf32>
    %83 = vector.extract_strided_slice %3 {offsets = [12, 0], sizes = [1, 32], strides = [1, 1]} : vector<32x32xf32> to vector<1x32xf32>
    %cst_33 = arith.constant 5.000000e-01 : f32
    %84 = vector.broadcast %cst_33 : f32 to vector<1x32xf32>
    %85 = arith.cmpf ogt, %83, %84 : vector<1x32xf32>
    %cst_34 = arith.constant -1.000000e+30 : f32
    %86 = vector.shape_cast %85 : vector<1x32xi1> to vector<1x32xi1>
    %87 = vector.broadcast %86 : vector<1x32xi1> to vector<80x32xi1>
    %88 = vector.broadcast %cst_34 : f32 to vector<80x32xf32>
    %89 = arith.select %87, %39, %88 : vector<80x32xi1>, vector<80x32xf32>
    %cst_35 = arith.constant dense<0xFF800000> : vector<80xf32>
    %90 = vector.multi_reduction <maximumf>, %89, %cst_35 [1] : vector<80x32xf32> to vector<80xf32>
    %91 = vector.shape_cast %90 : vector<80xf32> to vector<80x1xf32>
    %92 = vector.shape_cast %85 : vector<1x32xi1> to vector<1x32xi1>
    %93 = vector.broadcast %92 : vector<1x32xi1> to vector<80x32xi1>
    %94 = vector.shape_cast %91 : vector<80x1xf32> to vector<80x1xf32>
    %95 = vector.broadcast %94 : vector<80x1xf32> to vector<80x32xf32>
    %96 = arith.select %93, %95, %82 : vector<80x32xi1>, vector<80x32xf32>
    %97 = vector.extract_strided_slice %3 {offsets = [16, 0], sizes = [1, 32], strides = [1, 1]} : vector<32x32xf32> to vector<1x32xf32>
    %cst_36 = arith.constant 5.000000e-01 : f32
    %98 = vector.broadcast %cst_36 : f32 to vector<1x32xf32>
    %99 = arith.cmpf ogt, %97, %98 : vector<1x32xf32>
    %cst_37 = arith.constant -1.000000e+30 : f32
    %100 = vector.shape_cast %99 : vector<1x32xi1> to vector<1x32xi1>
    %101 = vector.broadcast %100 : vector<1x32xi1> to vector<80x32xi1>
    %102 = vector.broadcast %cst_37 : f32 to vector<80x32xf32>
    %103 = arith.select %101, %39, %102 : vector<80x32xi1>, vector<80x32xf32>
    %cst_38 = arith.constant dense<0xFF800000> : vector<80xf32>
    %104 = vector.multi_reduction <maximumf>, %103, %cst_38 [1] : vector<80x32xf32> to vector<80xf32>
    %105 = vector.shape_cast %104 : vector<80xf32> to vector<80x1xf32>
    %106 = vector.shape_cast %99 : vector<1x32xi1> to vector<1x32xi1>
    %107 = vector.broadcast %106 : vector<1x32xi1> to vector<80x32xi1>
    %108 = vector.shape_cast %105 : vector<80x1xf32> to vector<80x1xf32>
    %109 = vector.broadcast %108 : vector<80x1xf32> to vector<80x32xf32>
    %110 = arith.select %107, %109, %96 : vector<80x32xi1>, vector<80x32xf32>
    %111 = vector.extract_strided_slice %3 {offsets = [20, 0], sizes = [1, 32], strides = [1, 1]} : vector<32x32xf32> to vector<1x32xf32>
    %cst_39 = arith.constant 5.000000e-01 : f32
    %112 = vector.broadcast %cst_39 : f32 to vector<1x32xf32>
    %113 = arith.cmpf ogt, %111, %112 : vector<1x32xf32>
    %cst_40 = arith.constant -1.000000e+30 : f32
    %114 = vector.shape_cast %113 : vector<1x32xi1> to vector<1x32xi1>
    %115 = vector.broadcast %114 : vector<1x32xi1> to vector<80x32xi1>
    %116 = vector.broadcast %cst_40 : f32 to vector<80x32xf32>
    %117 = arith.select %115, %39, %116 : vector<80x32xi1>, vector<80x32xf32>
    %cst_41 = arith.constant dense<0xFF800000> : vector<80xf32>
    %118 = vector.multi_reduction <maximumf>, %117, %cst_41 [1] : vector<80x32xf32> to vector<80xf32>
    %119 = vector.shape_cast %118 : vector<80xf32> to vector<80x1xf32>
    %120 = vector.shape_cast %113 : vector<1x32xi1> to vector<1x32xi1>
    %121 = vector.broadcast %120 : vector<1x32xi1> to vector<80x32xi1>
    %122 = vector.shape_cast %119 : vector<80x1xf32> to vector<80x1xf32>
    %123 = vector.broadcast %122 : vector<80x1xf32> to vector<80x32xf32>
    %124 = arith.select %121, %123, %110 : vector<80x32xi1>, vector<80x32xf32>
    %125 = vector.extract_strided_slice %3 {offsets = [24, 0], sizes = [1, 32], strides = [1, 1]} : vector<32x32xf32> to vector<1x32xf32>
    %cst_42 = arith.constant 5.000000e-01 : f32
    %126 = vector.broadcast %cst_42 : f32 to vector<1x32xf32>
    %127 = arith.cmpf ogt, %125, %126 : vector<1x32xf32>
    %cst_43 = arith.constant -1.000000e+30 : f32
    %128 = vector.shape_cast %127 : vector<1x32xi1> to vector<1x32xi1>
    %129 = vector.broadcast %128 : vector<1x32xi1> to vector<80x32xi1>
    %130 = vector.broadcast %cst_43 : f32 to vector<80x32xf32>
    %131 = arith.select %129, %39, %130 : vector<80x32xi1>, vector<80x32xf32>
    %cst_44 = arith.constant dense<0xFF800000> : vector<80xf32>
    %132 = vector.multi_reduction <maximumf>, %131, %cst_44 [1] : vector<80x32xf32> to vector<80xf32>
    %133 = vector.shape_cast %132 : vector<80xf32> to vector<80x1xf32>
    %134 = vector.shape_cast %127 : vector<1x32xi1> to vector<1x32xi1>
    %135 = vector.broadcast %134 : vector<1x32xi1> to vector<80x32xi1>
    %136 = vector.shape_cast %133 : vector<80x1xf32> to vector<80x1xf32>
    %137 = vector.broadcast %136 : vector<80x1xf32> to vector<80x32xf32>
    %138 = arith.select %135, %137, %124 : vector<80x32xi1>, vector<80x32xf32>
    %139 = vector.extract_strided_slice %3 {offsets = [28, 0], sizes = [1, 32], strides = [1, 1]} : vector<32x32xf32> to vector<1x32xf32>
    %cst_45 = arith.constant 5.000000e-01 : f32
    %140 = vector.broadcast %cst_45 : f32 to vector<1x32xf32>
    %141 = arith.cmpf ogt, %139, %140 : vector<1x32xf32>
    %cst_46 = arith.constant -1.000000e+30 : f32
    %142 = vector.shape_cast %141 : vector<1x32xi1> to vector<1x32xi1>
    %143 = vector.broadcast %142 : vector<1x32xi1> to vector<80x32xi1>
    %144 = vector.broadcast %cst_46 : f32 to vector<80x32xf32>
    %145 = arith.select %143, %39, %144 : vector<80x32xi1>, vector<80x32xf32>
    %cst_47 = arith.constant dense<0xFF800000> : vector<80xf32>
    %146 = vector.multi_reduction <maximumf>, %145, %cst_47 [1] : vector<80x32xf32> to vector<80xf32>
    %147 = vector.shape_cast %146 : vector<80xf32> to vector<80x1xf32>
    %148 = vector.shape_cast %141 : vector<1x32xi1> to vector<1x32xi1>
    %149 = vector.broadcast %148 : vector<1x32xi1> to vector<80x32xi1>
    %150 = vector.shape_cast %147 : vector<80x1xf32> to vector<80x1xf32>
    %151 = vector.broadcast %150 : vector<80x1xf32> to vector<80x32xf32>
    %152 = arith.select %149, %151, %138 : vector<80x32xi1>, vector<80x32xf32>
    %153 = arith.subf %39, %152 : vector<80x32xf32>
    %154 = math.exp %153 : vector<80x32xf32>
    %cst_48 = arith.constant dense<0.000000e+00> : vector<80x32xf32>
    %155 = tpu.matmul %154, %3, %cst_48 {dimension_numbers = #tpu.dot_dimension_numbers<[1], [0], [0], [1], [0, 0, 1, 1], [], []>} : vector<80x32xf32>, vector<32x32xf32>, vector<80x32xf32> -> vector<80x32xf32>
    %156 = tpu.reciprocal %155 {approx = true} : vector<80x32xf32> -> vector<80x32xf32>
    %157 = arith.mulf %154, %156 : vector<80x32xf32>
    %c0_49 = arith.constant 0 : index
    %c0_50 = arith.constant 0 : index
    %158 = vector.load %arg11[%c0_49, %c0_50] : memref<32x32xf32, #tpu.memory_space<vmem>>, vector<32x32xf32>
    %cst_51 = arith.constant dense<0.000000e+00> : vector<80x32xf32>
    %159 = tpu.matmul %34, %158, %cst_51 {dimension_numbers = #tpu.dot_dimension_numbers<[1], [0], [0], [1], [0, 0, 1, 1], [], []>} : vector<80x32xf32>, vector<32x32xf32>, vector<80x32xf32> -> vector<80x32xf32>
    %c0_52 = arith.constant 0 : index
    %c0_53 = arith.constant 0 : index
    %160 = vector.load %arg12[%c0_52, %c0_53] : memref<1x32xf32, #tpu.memory_space<vmem>>, vector<1x32xf32>
    %161 = vector.broadcast %160 : vector<1x32xf32> to vector<80x32xf32>
    %162 = arith.addf %159, %161 : vector<80x32xf32>
    %163 = math.tanh %162 : vector<80x32xf32>
    %164 = vector.shape_cast %163 : vector<80x32xf32> to vector<2x40x32xf32>
    %c0_54 = arith.constant 0 : index
    %c0_55 = arith.constant 0 : index
    %165 = vector.load %arg2[%c0_54, %c0_55] : memref<40x1xf32, #tpu.memory_space<vmem>>, vector<40x1xf32>
    %166 = vector.shape_cast %165 : vector<40x1xf32> to vector<1x40x1xf32>
    %167 = vector.broadcast %166 : vector<1x40x1xf32> to vector<2x40x32xf32>
    %168 = arith.mulf %164, %167 : vector<2x40x32xf32>
    %169 = vector.shape_cast %157 : vector<80x32xf32> to vector<2x40x32xf32>
    %c0_56 = arith.constant 0 : index
    %c0_57 = arith.constant 0 : index
    %c0_58 = arith.constant 0 : index
    %170 = vector.load %arg28[%c0_56, %c0_57, %c0_58] : memref<2x32x32xf32, #tpu.memory_space<vmem>>, vector<1x32x32xf32>
    %171 = vector.shape_cast %170 : vector<1x32x32xf32> to vector<32x32xf32>
    %172 = vector.extract_strided_slice %168 {offsets = [0, 0, 0], sizes = [1, 40, 32], strides = [1, 1, 1]} : vector<2x40x32xf32> to vector<1x40x32xf32>
    %173 = vector.shape_cast %172 : vector<1x40x32xf32> to vector<40x32xf32>
    %174 = vector.extract_strided_slice %169 {offsets = [0, 0, 0], sizes = [1, 40, 32], strides = [1, 1, 1]} : vector<2x40x32xf32> to vector<1x40x32xf32>
    %175 = vector.shape_cast %174 : vector<1x40x32xf32> to vector<40x32xf32>
    %cst_59 = arith.constant dense<0.000000e+00> : vector<32x32xf32>
    %176 = tpu.matmul %173, %175, %cst_59 {dimension_numbers = #tpu.dot_dimension_numbers<[0], [0], [1], [1], [0, 1, 1, 1], [], []>} : vector<40x32xf32>, vector<40x32xf32>, vector<32x32xf32> -> vector<32x32xf32>
    %177 = arith.addf %171, %176 : vector<32x32xf32>
    %c0_60 = arith.constant 0 : index
    %c0_61 = arith.constant 0 : index
    %c0_62 = arith.constant 0 : index
    %178 = vector.load %arg28[%c0_60, %c0_61, %c0_62] : memref<2x32x32xf32, #tpu.memory_space<vmem>>, vector<1x32x32xf32>
    %179 = vector.shape_cast %178 : vector<1x32x32xf32> to vector<32x32xf32>
    %180 = vector.shape_cast %177 : vector<32x32xf32> to vector<1x32x32xf32>
    tpu.vector_store %arg28[%c0_60, %c0_61, %c0_62], %180 {strides = array<i32>} : memref<2x32x32xf32, #tpu.memory_space<vmem>>, vector<1x32x32xf32>,
    %c1 = arith.constant 1 : index
    %c0_63 = arith.constant 0 : index
    %c0_64 = arith.constant 0 : index
    %181 = vector.load %arg28[%c1, %c0_63, %c0_64] : memref<2x32x32xf32, #tpu.memory_space<vmem>>, vector<1x32x32xf32>
    %182 = vector.shape_cast %181 : vector<1x32x32xf32> to vector<32x32xf32>
    %183 = vector.extract_strided_slice %168 {offsets = [1, 0, 0], sizes = [1, 40, 32], strides = [1, 1, 1]} : vector<2x40x32xf32> to vector<1x40x32xf32>
    %184 = vector.shape_cast %183 : vector<1x40x32xf32> to vector<40x32xf32>
    %185 = vector.extract_strided_slice %169 {offsets = [1, 0, 0], sizes = [1, 40, 32], strides = [1, 1, 1]} : vector<2x40x32xf32> to vector<1x40x32xf32>
    %186 = vector.shape_cast %185 : vector<1x40x32xf32> to vector<40x32xf32>
    %cst_65 = arith.constant dense<0.000000e+00> : vector<32x32xf32>
    %187 = tpu.matmul %184, %186, %cst_65 {dimension_numbers = #tpu.dot_dimension_numbers<[0], [0], [1], [1], [0, 1, 1, 1], [], []>} : vector<40x32xf32>, vector<40x32xf32>, vector<32x32xf32> -> vector<32x32xf32>
    %188 = arith.addf %182, %187 : vector<32x32xf32>
    %c1_66 = arith.constant 1 : index
    %c0_67 = arith.constant 0 : index
    %c0_68 = arith.constant 0 : index
    %189 = vector.load %arg28[%c1_66, %c0_67, %c0_68] : memref<2x32x32xf32, #tpu.memory_space<vmem>>, vector<1x32x32xf32>
    %190 = vector.shape_cast %189 : vector<1x32x32xf32> to vector<32x32xf32>
    %191 = vector.shape_cast %188 : vector<32x32xf32> to vector<1x32x32xf32>
    tpu.vector_store %arg28[%c1_66, %c0_67, %c0_68], %191 {strides = array<i32>} : memref<2x32x32xf32, #tpu.memory_space<vmem>>, vector<1x32x32xf32>,
    %c0_i32_69 = arith.constant 0 : i32
    %192 = arith.cmpi eq, %arg0, %c0_i32_69 : i32
    %193 = arith.extui %192 : i1 to i32
    %c0_i32_70 = arith.constant 0 : i32
    %194 = arith.cmpi ne, %193, %c0_i32_70 : i32
    scf.if %194 {
      %c0_71 = arith.constant 0 : index
      %c0_72 = arith.constant 0 : index
      %195 = vector.load %arg4[%c0_71, %c0_72] : memref<2x4xf32, #tpu.memory_space<vmem>>, vector<2x4xf32>
      %c0_73 = arith.constant 0 : index
      %c0_74 = arith.constant 0 : index
      %196 = vector.load %arg13[%c0_73, %c0_74] : memref<4x32xf32, #tpu.memory_space<vmem>>, vector<4x32xf32>
      %cst_75 = arith.constant dense<0.000000e+00> : vector<2x32xf32>
      %197 = tpu.matmul %195, %196, %cst_75 {dimension_numbers = #tpu.dot_dimension_numbers<[1], [0], [0], [1], [0, 0, 1, 1], [], []>} : vector<2x4xf32>, vector<4x32xf32>, vector<2x32xf32> -> vector<2x32xf32>
      %c0_76 = arith.constant 0 : index
      %c0_77 = arith.constant 0 : index
      %198 = vector.load %arg14[%c0_76, %c0_77] : memref<1x32xf32, #tpu.memory_space<vmem>>, vector<1x32xf32>
      %199 = vector.broadcast %198 : vector<1x32xf32> to vector<2x32xf32>
      %200 = arith.addf %197, %199 : vector<2x32xf32>
      %cst_78 = arith.constant dense<0.000000e+00> : vector<2xf32>
      %201 = vector.multi_reduction <add>, %200, %cst_78 [1] : vector<2x32xf32> to vector<2xf32>
      %202 = vector.shape_cast %201 : vector<2xf32> to vector<2x1xf32>
      %cst_79 = arith.constant 3.200000e+01 : f32
      %203 = vector.broadcast %cst_79 : f32 to vector<2x1xf32>
      %204 = arith.divf %202, %203 : vector<2x1xf32>
      %205 = vector.broadcast %204 : vector<2x1xf32> to vector<2x32xf32>
      %206 = arith.subf %200, %205 : vector<2x32xf32>
      %207 = arith.mulf %206, %206 : vector<2x32xf32>
      %cst_80 = arith.constant dense<0.000000e+00> : vector<2xf32>
      %208 = vector.multi_reduction <add>, %207, %cst_80 [1] : vector<2x32xf32> to vector<2xf32>
      %209 = vector.shape_cast %208 : vector<2xf32> to vector<2x1xf32>
      %cst_81 = arith.constant 3.200000e+01 : f32
      %210 = vector.broadcast %cst_81 : f32 to vector<2x1xf32>
      %211 = arith.divf %209, %210 : vector<2x1xf32>
      %212 = vector.broadcast %204 : vector<2x1xf32> to vector<2x32xf32>
      %213 = arith.subf %200, %212 : vector<2x32xf32>
      %cst_82 = arith.constant 9.99999974E-6 : f32
      %214 = vector.broadcast %cst_82 : f32 to vector<2x1xf32>
      %215 = arith.addf %211, %214 : vector<2x1xf32>
      %216 = math.rsqrt %215 : vector<2x1xf32>
      %217 = vector.broadcast %216 : vector<2x1xf32> to vector<2x32xf32>
      %218 = arith.mulf %213, %217 : vector<2x32xf32>
      %219 = vector.broadcast %4 : vector<1x32xf32> to vector<2x32xf32>
      %220 = arith.mulf %218, %219 : vector<2x32xf32>
      %221 = vector.broadcast %5 : vector<1x32xf32> to vector<2x32xf32>
      %222 = arith.addf %220, %221 : vector<2x32xf32>
      %c0_83 = arith.constant 0 : index
      %c0_84 = arith.constant 0 : index
      %223 = vector.load %arg15[%c0_83, %c0_84] : memref<32x32xf32, #tpu.memory_space<vmem>>, vector<32x32xf32>
      %cst_85 = arith.constant dense<0.000000e+00> : vector<2x32xf32>
      %224 = tpu.matmul %222, %223, %cst_85 {dimension_numbers = #tpu.dot_dimension_numbers<[1], [0], [0], [1], [0, 0, 1, 1], [], []>} : vector<2x32xf32>, vector<32x32xf32>, vector<2x32xf32> -> vector<2x32xf32>
      %c0_86 = arith.constant 0 : index
      %c0_87 = arith.constant 0 : index
      %225 = vector.load %arg16[%c0_86, %c0_87] : memref<1x32xf32, #tpu.memory_space<vmem>>, vector<1x32xf32>
      %226 = vector.broadcast %225 : vector<1x32xf32> to vector<2x32xf32>
      %227 = arith.addf %224, %226 : vector<2x32xf32>
      %cst_88 = arith.constant 0.000000e+00 : f32
      %228 = vector.broadcast %cst_88 : f32 to vector<2x32xf32>
      %229 = vector.extract_strided_slice %3 {offsets = [0, 0], sizes = [1, 32], strides = [1, 1]} : vector<32x32xf32> to vector<1x32xf32>
      %cst_89 = arith.constant 5.000000e-01 : f32
      %230 = vector.broadcast %cst_89 : f32 to vector<1x32xf32>
      %231 = arith.cmpf ogt, %229, %230 : vector<1x32xf32>
      %cst_90 = arith.constant -1.000000e+30 : f32
      %232 = vector.shape_cast %231 : vector<1x32xi1> to vector<1x32xi1>
      %233 = vector.broadcast %232 : vector<1x32xi1> to vector<2x32xi1>
      %234 = vector.broadcast %cst_90 : f32 to vector<2x32xf32>
      %235 = arith.select %233, %227, %234 : vector<2x32xi1>, vector<2x32xf32>
      %cst_91 = arith.constant dense<0xFF800000> : vector<2xf32>
      %236 = vector.multi_reduction <maximumf>, %235, %cst_91 [1] : vector<2x32xf32> to vector<2xf32>
      %237 = vector.shape_cast %236 : vector<2xf32> to vector<2x1xf32>
      %238 = vector.shape_cast %231 : vector<1x32xi1> to vector<1x32xi1>
      %239 = vector.broadcast %238 : vector<1x32xi1> to vector<2x32xi1>
      %240 = vector.shape_cast %237 : vector<2x1xf32> to vector<2x1xf32>
      %241 = vector.broadcast %240 : vector<2x1xf32> to vector<2x32xf32>
      %242 = arith.select %239, %241, %228 : vector<2x32xi1>, vector<2x32xf32>
      %243 = vector.extract_strided_slice %3 {offsets = [4, 0], sizes = [1, 32], strides = [1, 1]} : vector<32x32xf32> to vector<1x32xf32>
      %cst_92 = arith.constant 5.000000e-01 : f32
      %244 = vector.broadcast %cst_92 : f32 to vector<1x32xf32>
      %245 = arith.cmpf ogt, %243, %244 : vector<1x32xf32>
      %cst_93 = arith.constant -1.000000e+30 : f32
      %246 = vector.shape_cast %245 : vector<1x32xi1> to vector<1x32xi1>
      %247 = vector.broadcast %246 : vector<1x32xi1> to vector<2x32xi1>
      %248 = vector.broadcast %cst_93 : f32 to vector<2x32xf32>
      %249 = arith.select %247, %227, %248 : vector<2x32xi1>, vector<2x32xf32>
      %cst_94 = arith.constant dense<0xFF800000> : vector<2xf32>
      %250 = vector.multi_reduction <maximumf>, %249, %cst_94 [1] : vector<2x32xf32> to vector<2xf32>
      %251 = vector.shape_cast %250 : vector<2xf32> to vector<2x1xf32>
      %252 = vector.shape_cast %245 : vector<1x32xi1> to vector<1x32xi1>
      %253 = vector.broadcast %252 : vector<1x32xi1> to vector<2x32xi1>
      %254 = vector.shape_cast %251 : vector<2x1xf32> to vector<2x1xf32>
      %255 = vector.broadcast %254 : vector<2x1xf32> to vector<2x32xf32>
      %256 = arith.select %253, %255, %242 : vector<2x32xi1>, vector<2x32xf32>
      %257 = vector.extract_strided_slice %3 {offsets = [8, 0], sizes = [1, 32], strides = [1, 1]} : vector<32x32xf32> to vector<1x32xf32>
      %cst_95 = arith.constant 5.000000e-01 : f32
      %258 = vector.broadcast %cst_95 : f32 to vector<1x32xf32>
      %259 = arith.cmpf ogt, %257, %258 : vector<1x32xf32>
      %cst_96 = arith.constant -1.000000e+30 : f32
      %260 = vector.shape_cast %259 : vector<1x32xi1> to vector<1x32xi1>
      %261 = vector.broadcast %260 : vector<1x32xi1> to vector<2x32xi1>
      %262 = vector.broadcast %cst_96 : f32 to vector<2x32xf32>
      %263 = arith.select %261, %227, %262 : vector<2x32xi1>, vector<2x32xf32>
      %cst_97 = arith.constant dense<0xFF800000> : vector<2xf32>
      %264 = vector.multi_reduction <maximumf>, %263, %cst_97 [1] : vector<2x32xf32> to vector<2xf32>
      %265 = vector.shape_cast %264 : vector<2xf32> to vector<2x1xf32>
      %266 = vector.shape_cast %259 : vector<1x32xi1> to vector<1x32xi1>
      %267 = vector.broadcast %266 : vector<1x32xi1> to vector<2x32xi1>
      %268 = vector.shape_cast %265 : vector<2x1xf32> to vector<2x1xf32>
      %269 = vector.broadcast %268 : vector<2x1xf32> to vector<2x32xf32>
      %270 = arith.select %267, %269, %256 : vector<2x32xi1>, vector<2x32xf32>
      %271 = vector.extract_strided_slice %3 {offsets = [12, 0], sizes = [1, 32], strides = [1, 1]} : vector<32x32xf32> to vector<1x32xf32>
      %cst_98 = arith.constant 5.000000e-01 : f32
      %272 = vector.broadcast %cst_98 : f32 to vector<1x32xf32>
      %273 = arith.cmpf ogt, %271, %272 : vector<1x32xf32>
      %cst_99 = arith.constant -1.000000e+30 : f32
      %274 = vector.shape_cast %273 : vector<1x32xi1> to vector<1x32xi1>
      %275 = vector.broadcast %274 : vector<1x32xi1> to vector<2x32xi1>
      %276 = vector.broadcast %cst_99 : f32 to vector<2x32xf32>
      %277 = arith.select %275, %227, %276 : vector<2x32xi1>, vector<2x32xf32>
      %cst_100 = arith.constant dense<0xFF800000> : vector<2xf32>
      %278 = vector.multi_reduction <maximumf>, %277, %cst_100 [1] : vector<2x32xf32> to vector<2xf32>
      %279 = vector.shape_cast %278 : vector<2xf32> to vector<2x1xf32>
      %280 = vector.shape_cast %273 : vector<1x32xi1> to vector<1x32xi1>
      %281 = vector.broadcast %280 : vector<1x32xi1> to vector<2x32xi1>
      %282 = vector.shape_cast %279 : vector<2x1xf32> to vector<2x1xf32>
      %283 = vector.broadcast %282 : vector<2x1xf32> to vector<2x32xf32>
      %284 = arith.select %281, %283, %270 : vector<2x32xi1>, vector<2x32xf32>
      %285 = vector.extract_strided_slice %3 {offsets = [16, 0], sizes = [1, 32], strides = [1, 1]} : vector<32x32xf32> to vector<1x32xf32>
      %cst_101 = arith.constant 5.000000e-01 : f32
      %286 = vector.broadcast %cst_101 : f32 to vector<1x32xf32>
      %287 = arith.cmpf ogt, %285, %286 : vector<1x32xf32>
      %cst_102 = arith.constant -1.000000e+30 : f32
      %288 = vector.shape_cast %287 : vector<1x32xi1> to vector<1x32xi1>
      %289 = vector.broadcast %288 : vector<1x32xi1> to vector<2x32xi1>
      %290 = vector.broadcast %cst_102 : f32 to vector<2x32xf32>
      %291 = arith.select %289, %227, %290 : vector<2x32xi1>, vector<2x32xf32>
      %cst_103 = arith.constant dense<0xFF800000> : vector<2xf32>
      %292 = vector.multi_reduction <maximumf>, %291, %cst_103 [1] : vector<2x32xf32> to vector<2xf32>
      %293 = vector.shape_cast %292 : vector<2xf32> to vector<2x1xf32>
      %294 = vector.shape_cast %287 : vector<1x32xi1> to vector<1x32xi1>
      %295 = vector.broadcast %294 : vector<1x32xi1> to vector<2x32xi1>
      %296 = vector.shape_cast %293 : vector<2x1xf32> to vector<2x1xf32>
      %297 = vector.broadcast %296 : vector<2x1xf32> to vector<2x32xf32>
      %298 = arith.select %295, %297, %284 : vector<2x32xi1>, vector<2x32xf32>
      %299 = vector.extract_strided_slice %3 {offsets = [20, 0], sizes = [1, 32], strides = [1, 1]} : vector<32x32xf32> to vector<1x32xf32>
      %cst_104 = arith.constant 5.000000e-01 : f32
      %300 = vector.broadcast %cst_104 : f32 to vector<1x32xf32>
      %301 = arith.cmpf ogt, %299, %300 : vector<1x32xf32>
      %cst_105 = arith.constant -1.000000e+30 : f32
      %302 = vector.shape_cast %301 : vector<1x32xi1> to vector<1x32xi1>
      %303 = vector.broadcast %302 : vector<1x32xi1> to vector<2x32xi1>
      %304 = vector.broadcast %cst_105 : f32 to vector<2x32xf32>
      %305 = arith.select %303, %227, %304 : vector<2x32xi1>, vector<2x32xf32>
      %cst_106 = arith.constant dense<0xFF800000> : vector<2xf32>
      %306 = vector.multi_reduction <maximumf>, %305, %cst_106 [1] : vector<2x32xf32> to vector<2xf32>
      %307 = vector.shape_cast %306 : vector<2xf32> to vector<2x1xf32>
      %308 = vector.shape_cast %301 : vector<1x32xi1> to vector<1x32xi1>
      %309 = vector.broadcast %308 : vector<1x32xi1> to vector<2x32xi1>
      %310 = vector.shape_cast %307 : vector<2x1xf32> to vector<2x1xf32>
      %311 = vector.broadcast %310 : vector<2x1xf32> to vector<2x32xf32>
      %312 = arith.select %309, %311, %298 : vector<2x32xi1>, vector<2x32xf32>
      %313 = vector.extract_strided_slice %3 {offsets = [24, 0], sizes = [1, 32], strides = [1, 1]} : vector<32x32xf32> to vector<1x32xf32>
      %cst_107 = arith.constant 5.000000e-01 : f32
      %314 = vector.broadcast %cst_107 : f32 to vector<1x32xf32>
      %315 = arith.cmpf ogt, %313, %314 : vector<1x32xf32>
      %cst_108 = arith.constant -1.000000e+30 : f32
      %316 = vector.shape_cast %315 : vector<1x32xi1> to vector<1x32xi1>
      %317 = vector.broadcast %316 : vector<1x32xi1> to vector<2x32xi1>
      %318 = vector.broadcast %cst_108 : f32 to vector<2x32xf32>
      %319 = arith.select %317, %227, %318 : vector<2x32xi1>, vector<2x32xf32>
      %cst_109 = arith.constant dense<0xFF800000> : vector<2xf32>
      %320 = vector.multi_reduction <maximumf>, %319, %cst_109 [1] : vector<2x32xf32> to vector<2xf32>
      %321 = vector.shape_cast %320 : vector<2xf32> to vector<2x1xf32>
      %322 = vector.shape_cast %315 : vector<1x32xi1> to vector<1x32xi1>
      %323 = vector.broadcast %322 : vector<1x32xi1> to vector<2x32xi1>
      %324 = vector.shape_cast %321 : vector<2x1xf32> to vector<2x1xf32>
      %325 = vector.broadcast %324 : vector<2x1xf32> to vector<2x32xf32>
      %326 = arith.select %323, %325, %312 : vector<2x32xi1>, vector<2x32xf32>
      %327 = vector.extract_strided_slice %3 {offsets = [28, 0], sizes = [1, 32], strides = [1, 1]} : vector<32x32xf32> to vector<1x32xf32>
      %cst_110 = arith.constant 5.000000e-01 : f32
      %328 = vector.broadcast %cst_110 : f32 to vector<1x32xf32>
      %329 = arith.cmpf ogt, %327, %328 : vector<1x32xf32>
      %cst_111 = arith.constant -1.000000e+30 : f32
      %330 = vector.shape_cast %329 : vector<1x32xi1> to vector<1x32xi1>
      %331 = vector.broadcast %330 : vector<1x32xi1> to vector<2x32xi1>
      %332 = vector.broadcast %cst_111 : f32 to vector<2x32xf32>
      %333 = arith.select %331, %227, %332 : vector<2x32xi1>, vector<2x32xf32>
      %cst_112 = arith.constant dense<0xFF800000> : vector<2xf32>
      %334 = vector.multi_reduction <maximumf>, %333, %cst_112 [1] : vector<2x32xf32> to vector<2xf32>
      %335 = vector.shape_cast %334 : vector<2xf32> to vector<2x1xf32>
      %336 = vector.shape_cast %329 : vector<1x32xi1> to vector<1x32xi1>
      %337 = vector.broadcast %336 : vector<1x32xi1> to vector<2x32xi1>
      %338 = vector.shape_cast %335 : vector<2x1xf32> to vector<2x1xf32>
      %339 = vector.broadcast %338 : vector<2x1xf32> to vector<2x32xf32>
      %340 = arith.select %337, %339, %326 : vector<2x32xi1>, vector<2x32xf32>
      %341 = arith.subf %227, %340 : vector<2x32xf32>
      %342 = math.exp %341 : vector<2x32xf32>
      %cst_113 = arith.constant dense<0.000000e+00> : vector<2x32xf32>
      %343 = tpu.matmul %342, %3, %cst_113 {dimension_numbers = #tpu.dot_dimension_numbers<[1], [0], [0], [1], [0, 0, 1, 1], [], []>} : vector<2x32xf32>, vector<32x32xf32>, vector<2x32xf32> -> vector<2x32xf32>
      %344 = tpu.reciprocal %343 {approx = true} : vector<2x32xf32> -> vector<2x32xf32>
      %345 = arith.mulf %342, %344 : vector<2x32xf32>
      %c0_114 = arith.constant 0 : index
      %c0_115 = arith.constant 0 : index
      %c0_116 = arith.constant 0 : index
      %346 = vector.load %arg28[%c0_114, %c0_115, %c0_116] : memref<2x32x32xf32, #tpu.memory_space<vmem>>, vector<2x32x32xf32>
      %347 = vector.shape_cast %3 : vector<32x32xf32> to vector<1x32x32xf32>
      %348 = vector.broadcast %347 : vector<1x32x32xf32> to vector<2x32x32xf32>
      %349 = arith.mulf %346, %348 : vector<2x32x32xf32>
      %350 = vector.shape_cast %345 : vector<2x32xf32> to vector<2x1x32xf32>
      %351 = vector.broadcast %350 : vector<2x1x32xf32> to vector<2x32x32xf32>
      %352 = arith.mulf %349, %351 : vector<2x32x32xf32>
      %cst_117 = arith.constant dense<0.000000e+00> : vector<2x32xf32>
      %353 = vector.multi_reduction <add>, %352, %cst_117 [2] : vector<2x32x32xf32> to vector<2x32xf32>
      %c0_118 = arith.constant 0 : index
      %c0_119 = arith.constant 0 : index
      %354 = vector.load %arg17[%c0_118, %c0_119] : memref<32x32xf32, #tpu.memory_space<vmem>>, vector<32x32xf32>
      %cst_120 = arith.constant dense<0.000000e+00> : vector<2x32xf32>
      %355 = tpu.matmul %353, %354, %cst_120 {dimension_numbers = #tpu.dot_dimension_numbers<[1], [0], [0], [1], [0, 0, 1, 1], [], []>} : vector<2x32xf32>, vector<32x32xf32>, vector<2x32xf32> -> vector<2x32xf32>
      %c0_121 = arith.constant 0 : index
      %c0_122 = arith.constant 0 : index
      %356 = vector.load %arg18[%c0_121, %c0_122] : memref<1x32xf32, #tpu.memory_space<vmem>>, vector<1x32xf32>
      %357 = vector.broadcast %356 : vector<1x32xf32> to vector<2x32xf32>
      %358 = arith.addf %355, %357 : vector<2x32xf32>
      %c0_123 = arith.constant 0 : index
      %c0_124 = arith.constant 0 : index
      %359 = vector.load %arg19[%c0_123, %c0_124] : memref<1x32xf32, #tpu.memory_space<vmem>>, vector<1x32xf32>
      %c0_125 = arith.constant 0 : index
      %c0_126 = arith.constant 0 : index
      %360 = vector.load %arg20[%c0_125, %c0_126] : memref<1x32xf32, #tpu.memory_space<vmem>>, vector<1x32xf32>
      %cst_127 = arith.constant dense<0.000000e+00> : vector<2xf32>
      %361 = vector.multi_reduction <add>, %358, %cst_127 [1] : vector<2x32xf32> to vector<2xf32>
      %362 = vector.shape_cast %361 : vector<2xf32> to vector<2x1xf32>
      %cst_128 = arith.constant 3.200000e+01 : f32
      %363 = vector.broadcast %cst_128 : f32 to vector<2x1xf32>
      %364 = arith.divf %362, %363 : vector<2x1xf32>
      %365 = vector.broadcast %364 : vector<2x1xf32> to vector<2x32xf32>
      %366 = arith.subf %358, %365 : vector<2x32xf32>
      %367 = arith.mulf %366, %366 : vector<2x32xf32>
      %cst_129 = arith.constant dense<0.000000e+00> : vector<2xf32>
      %368 = vector.multi_reduction <add>, %367, %cst_129 [1] : vector<2x32xf32> to vector<2xf32>
      %369 = vector.shape_cast %368 : vector<2xf32> to vector<2x1xf32>
      %cst_130 = arith.constant 3.200000e+01 : f32
      %370 = vector.broadcast %cst_130 : f32 to vector<2x1xf32>
      %371 = arith.divf %369, %370 : vector<2x1xf32>
      %372 = vector.broadcast %364 : vector<2x1xf32> to vector<2x32xf32>
      %373 = arith.subf %358, %372 : vector<2x32xf32>
      %cst_131 = arith.constant 9.99999974E-6 : f32
      %374 = vector.broadcast %cst_131 : f32 to vector<2x1xf32>
      %375 = arith.addf %371, %374 : vector<2x1xf32>
      %376 = math.rsqrt %375 : vector<2x1xf32>
      %377 = vector.broadcast %376 : vector<2x1xf32> to vector<2x32xf32>
      %378 = arith.mulf %373, %377 : vector<2x32xf32>
      %379 = vector.broadcast %359 : vector<1x32xf32> to vector<2x32xf32>
      %380 = arith.mulf %378, %379 : vector<2x32xf32>
      %381 = vector.broadcast %360 : vector<1x32xf32> to vector<2x32xf32>
      %382 = arith.addf %380, %381 : vector<2x32xf32>
      %c0_132 = arith.constant 0 : index
      %c0_133 = arith.constant 0 : index
      %383 = vector.load %arg21[%c0_132, %c0_133] : memref<32x128xf32, #tpu.memory_space<vmem>>, vector<32x128xf32>
      %cst_134 = arith.constant dense<0.000000e+00> : vector<2x128xf32>
      %384 = tpu.matmul %382, %383, %cst_134 {dimension_numbers = #tpu.dot_dimension_numbers<[1], [0], [0], [1], [0, 0, 1, 1], [], []>} : vector<2x32xf32>, vector<32x128xf32>, vector<2x128xf32> -> vector<2x128xf32>
      %c0_135 = arith.constant 0 : index
      %c0_136 = arith.constant 0 : index
      %385 = vector.load %arg22[%c0_135, %c0_136] : memref<1x128xf32, #tpu.memory_space<vmem>>, vector<1x128xf32>
      %386 = vector.broadcast %385 : vector<1x128xf32> to vector<2x128xf32>
      %387 = arith.addf %384, %386 : vector<2x128xf32>
      %cst_137 = arith.constant 0.000000e+00 : f32
      %388 = vector.broadcast %cst_137 : f32 to vector<2x128xf32>
      %389 = arith.maximumf %387, %388 : vector<2x128xf32>
      %c0_138 = arith.constant 0 : index
      %c0_139 = arith.constant 0 : index
      %390 = vector.load %arg23[%c0_138, %c0_139] : memref<128x32xf32, #tpu.memory_space<vmem>>, vector<128x32xf32>
      %cst_140 = arith.constant dense<0.000000e+00> : vector<2x32xf32>
      %391 = tpu.matmul %389, %390, %cst_140 {dimension_numbers = #tpu.dot_dimension_numbers<[1], [0], [0], [1], [0, 0, 1, 1], [], []>} : vector<2x128xf32>, vector<128x32xf32>, vector<2x32xf32> -> vector<2x32xf32>
      %c0_141 = arith.constant 0 : index
      %c0_142 = arith.constant 0 : index
      %392 = vector.load %arg24[%c0_141, %c0_142] : memref<1x32xf32, #tpu.memory_space<vmem>>, vector<1x32xf32>
      %393 = vector.broadcast %392 : vector<1x32xf32> to vector<2x32xf32>
      %394 = arith.addf %391, %393 : vector<2x32xf32>
      %395 = arith.addf %358, %394 : vector<2x32xf32>
      %c0_143 = arith.constant 0 : index
      %c0_144 = arith.constant 0 : index
      %396 = vector.load %arg25[%c0_143, %c0_144] : memref<32x8xf32, #tpu.memory_space<vmem>>, vector<32x8xf32>
      %cst_145 = arith.constant dense<0.000000e+00> : vector<2x8xf32>
      %397 = tpu.matmul %395, %396, %cst_145 {dimension_numbers = #tpu.dot_dimension_numbers<[1], [0], [0], [1], [0, 0, 1, 1], [], []>} : vector<2x32xf32>, vector<32x8xf32>, vector<2x8xf32> -> vector<2x8xf32>
      %c0_146 = arith.constant 0 : index
      %c0_147 = arith.constant 0 : index
      %398 = vector.load %arg26[%c0_146, %c0_147] : memref<1x8xf32, #tpu.memory_space<vmem>>, vector<1x8xf32>
      %399 = vector.broadcast %398 : vector<1x8xf32> to vector<2x8xf32>
      %400 = arith.addf %397, %399 : vector<2x8xf32>
      %c0_148 = arith.constant 0 : index
      %c0_149 = arith.constant 0 : index
      %401 = vector.load %arg27[%c0_148, %c0_149] : memref<2x8xf32, #tpu.memory_space<vmem>>, vector<2x8xf32>
      tpu.vector_store %arg27[%c0_148, %c0_149], %400 {strides = array<i32>} : memref<2x8xf32, #tpu.memory_space<vmem>>, vector<2x8xf32>,
    } else {
    }
    return
  }
  func.func @transform_0(%arg0: i32) -> (i32, i32, i32) {
    %c0_i32 = arith.constant 0 : i32
    %c0_i32_0 = arith.constant 0 : i32
    %c0_i32_1 = arith.constant 0 : i32
    return %c0_i32, %arg0, %c0_i32_0 : i32, i32, i32
  }
  func.func @transform_1(%arg0: i32) -> (i32, i32) {
    %c0_i32 = arith.constant 0 : i32
    %c0_i32_0 = arith.constant 0 : i32
    return %arg0, %c0_i32 : i32, i32
  }
  func.func @transform_2(%arg0: i32) -> (i32, i32) {
    %c0_i32 = arith.constant 0 : i32
    %c0_i32_0 = arith.constant 0 : i32
    %c0_i32_1 = arith.constant 0 : i32
    return %c0_i32, %c0_i32_0 : i32, i32
  }
  func.func @transform_3(%arg0: i32) -> (i32, i32) {
    %c0_i32 = arith.constant 0 : i32
    %c0_i32_0 = arith.constant 0 : i32
    %c0_i32_1 = arith.constant 0 : i32
    return %c0_i32, %c0_i32_0 : i32, i32
  }
  func.func @transform_4(%arg0: i32) -> (i32, i32) {
    %c0_i32 = arith.constant 0 : i32
    %c0_i32_0 = arith.constant 0 : i32
    %c0_i32_1 = arith.constant 0 : i32
    return %c0_i32, %c0_i32_0 : i32, i32
  }
  func.func @transform_5(%arg0: i32) -> (i32, i32) {
    %c0_i32 = arith.constant 0 : i32
    %c0_i32_0 = arith.constant 0 : i32
    %c0_i32_1 = arith.constant 0 : i32
    return %c0_i32, %c0_i32_0 : i32, i32
  }
  func.func @transform_6(%arg0: i32) -> (i32, i32) {
    %c0_i32 = arith.constant 0 : i32
    %c0_i32_0 = arith.constant 0 : i32
    %c0_i32_1 = arith.constant 0 : i32
    return %c0_i32, %c0_i32_0 : i32, i32
  }
  func.func @transform_7(%arg0: i32) -> (i32, i32) {
    %c0_i32 = arith.constant 0 : i32
    %c0_i32_0 = arith.constant 0 : i32
    %c0_i32_1 = arith.constant 0 : i32
    return %c0_i32, %c0_i32_0 : i32, i32
  }
  func.func @transform_8(%arg0: i32) -> (i32, i32) {
    %c0_i32 = arith.constant 0 : i32
    %c0_i32_0 = arith.constant 0 : i32
    %c0_i32_1 = arith.constant 0 : i32
    return %c0_i32, %c0_i32_0 : i32, i32
  }
  func.func @transform_9(%arg0: i32) -> (i32, i32) {
    %c0_i32 = arith.constant 0 : i32
    %c0_i32_0 = arith.constant 0 : i32
    %c0_i32_1 = arith.constant 0 : i32
    return %c0_i32, %c0_i32_0 : i32, i32
  }
  func.func @transform_10(%arg0: i32) -> (i32, i32) {
    %c0_i32 = arith.constant 0 : i32
    %c0_i32_0 = arith.constant 0 : i32
    %c0_i32_1 = arith.constant 0 : i32
    return %c0_i32, %c0_i32_0 : i32, i32
  }
  func.func @transform_11(%arg0: i32) -> (i32, i32) {
    %c0_i32 = arith.constant 0 : i32
    %c0_i32_0 = arith.constant 0 : i32
    %c0_i32_1 = arith.constant 0 : i32
    return %c0_i32, %c0_i32_0 : i32, i32
  }
  func.func @transform_12(%arg0: i32) -> (i32, i32) {
    %c0_i32 = arith.constant 0 : i32
    %c0_i32_0 = arith.constant 0 : i32
    %c0_i32_1 = arith.constant 0 : i32
    return %c0_i32, %c0_i32_0 : i32, i32
  }
  func.func @transform_13(%arg0: i32) -> (i32, i32) {
    %c0_i32 = arith.constant 0 : i32
    %c0_i32_0 = arith.constant 0 : i32
    %c0_i32_1 = arith.constant 0 : i32
    return %c0_i32, %c0_i32_0 : i32, i32
  }
  func.func @transform_14(%arg0: i32) -> (i32, i32) {
    %c0_i32 = arith.constant 0 : i32
    %c0_i32_0 = arith.constant 0 : i32
    %c0_i32_1 = arith.constant 0 : i32
    return %c0_i32, %c0_i32_0 : i32, i32
  }
  func.func @transform_15(%arg0: i32) -> (i32, i32) {
    %c0_i32 = arith.constant 0 : i32
    %c0_i32_0 = arith.constant 0 : i32
    %c0_i32_1 = arith.constant 0 : i32
    return %c0_i32, %c0_i32_0 : i32, i32
  }
  func.func @transform_16(%arg0: i32) -> (i32, i32) {
    %c0_i32 = arith.constant 0 : i32
    %c0_i32_0 = arith.constant 0 : i32
    %c0_i32_1 = arith.constant 0 : i32
    return %c0_i32, %c0_i32_0 : i32, i32
  }
  func.func @transform_17(%arg0: i32) -> (i32, i32) {
    %c0_i32 = arith.constant 0 : i32
    %c0_i32_0 = arith.constant 0 : i32
    %c0_i32_1 = arith.constant 0 : i32
    return %c0_i32, %c0_i32_0 : i32, i32
  }
  func.func @transform_18(%arg0: i32) -> (i32, i32) {
    %c0_i32 = arith.constant 0 : i32
    %c0_i32_0 = arith.constant 0 : i32
    %c0_i32_1 = arith.constant 0 : i32
    return %c0_i32, %c0_i32_0 : i32, i32
  }
  func.func @transform_19(%arg0: i32) -> (i32, i32) {
    %c0_i32 = arith.constant 0 : i32
    %c0_i32_0 = arith.constant 0 : i32
    %c0_i32_1 = arith.constant 0 : i32
    return %c0_i32, %c0_i32_0 : i32, i32
  }
  func.func @transform_20(%arg0: i32) -> (i32, i32) {
    %c0_i32 = arith.constant 0 : i32
    %c0_i32_0 = arith.constant 0 : i32
    %c0_i32_1 = arith.constant 0 : i32
    return %c0_i32, %c0_i32_0 : i32, i32
  }
  func.func @transform_21(%arg0: i32) -> (i32, i32) {
    %c0_i32 = arith.constant 0 : i32
    %c0_i32_0 = arith.constant 0 : i32
    %c0_i32_1 = arith.constant 0 : i32
    return %c0_i32, %c0_i32_0 : i32, i32
  }
  func.func @transform_22(%arg0: i32) -> (i32, i32) {
    %c0_i32 = arith.constant 0 : i32
    %c0_i32_0 = arith.constant 0 : i32
    %c0_i32_1 = arith.constant 0 : i32
    return %c0_i32, %c0_i32_0 : i32, i32
  }
  func.func @transform_23(%arg0: i32) -> (i32, i32) {
    %c0_i32 = arith.constant 0 : i32
    %c0_i32_0 = arith.constant 0 : i32
    %c0_i32_1 = arith.constant 0 : i32
    return %c0_i32, %c0_i32_0 : i32, i32
  }
  func.func @transform_24(%arg0: i32) -> (i32, i32) {
    %c0_i32 = arith.constant 0 : i32
    %c0_i32_0 = arith.constant 0 : i32
    %c0_i32_1 = arith.constant 0 : i32
    return %c0_i32, %c0_i32_0 : i32, i32
  }
  func.func @transform_25(%arg0: i32) -> (i32, i32) {
    %c0_i32 = arith.constant 0 : i32
    %c0_i32_0 = arith.constant 0 : i32
    %c0_i32_1 = arith.constant 0 : i32
    return %c0_i32, %c0_i32_0 : i32, i32
  }
  func.func @transform_26(%arg0: i32) -> (i32, i32) {
    %c0_i32 = arith.constant 0 : i32
    %c0_i32_0 = arith.constant 0 : i32
    %c0_i32_1 = arith.constant 0 : i32
    return %c0_i32, %c0_i32_0 : i32, i32
  }
}

</mosaic_0001>

<bundles_post_ra>
// kernel: tpu_custom_call.1
= control target key start
LH: loop header
LB: loop body
LE: loop exit
PB: predicated region body
PF: predicated region fallthrough
CT: control target
= control target key end

     0   :  { %s4489_s0 = inlined_call_operand.vmem [shape: f32[2,40,8], index: 0, kind: input, shape index: {}]   ;;  %s4490_s1 = inlined_call_operand.vmem [shape: f32[40,1], index: 1, kind: input, shape index: {}]   ;;  %s4491_s2 = inlined_call_operand.vmem [shape: f32[32,32], index: 2, kind: input, shape index: {}]   ;;  %s4492_s3 = inlined_call_operand.vmem [shape: f32[2,4], index: 3, kind: input, shape index: {}]   ;;  %s4493_s4 = inlined_call_operand.vmem [shape: f32[8,32], index: 4, kind: input, shape index: {}]   ;;  %s4494_s5 = inlined_call_operand.vmem [shape: f32[1,32], index: 5, kind: input, shape index: {}]   ;;  %s4495_s6 = inlined_call_operand.vmem [shape: f32[1,32], index: 6, kind: input, shape index: {}]   ;;  %s4496_s7 = inlined_call_operand.vmem [shape: f32[1,32], index: 7, kind: input, shape index: {}]   ;;  %s4497_s8 = inlined_call_operand.vmem [shape: f32[32,32], index: 8, kind: input, shape index: {}]   ;;  %s4498_s9 = inlined_call_operand.vmem [shape: f32[1,32], index: 9, kind: input, shape index: {}]   ;;  %s4499_s10 = inlined_call_operand.vmem [shape: f32[32,32], index: 10, kind: input, shape index: {}]   ;;  %s4500_s11 = inlined_call_operand.vmem [shape: f32[1,32], index: 11, kind: input, shape index: {}]   ;;  %s4501_s12 = inlined_call_operand.vmem [shape: f32[4,32], index: 12, kind: input, shape index: {}]   ;;  %s4502_s13 = inlined_call_operand.vmem [shape: f32[1,32], index: 13, kind: input, shape index: {}]   ;;  %s4503_s14 = inlined_call_operand.vmem [shape: f32[32,32], index: 14, kind: input, shape index: {}]   ;;  %s4504_s15 = inlined_call_operand.vmem [shape: f32[1,32], index: 15, kind: input, shape index: {}]   ;;  %s4505_s16 = inlined_call_operand.vmem [shape: f32[32,32], index: 16, kind: input, shape index: {}]   ;;  %s4506_s17 = inlined_call_operand.vmem [shape: f32[1,32], index: 17, kind: input, shape index: {}]   ;;  %s4507_s18 = inlined_call_operand.vmem [shape: f32[1,32], index: 18, kind: input, shape index: {}]   ;;  %s4508_s19 = inlined_call_operand.vmem [shape: f32[1,32], index: 19, kind: input, shape index: {}]   ;;  %s4509_s20 = inlined_call_operand.vmem [shape: f32[32,128], index: 20, kind: input, shape index: {}]   ;;  %s4510_s21 = inlined_call_operand.vmem [shape: f32[1,128], index: 21, kind: input, shape index: {}]   ;;  %s4511_s22 = inlined_call_operand.vmem [shape: f32[128,32], index: 22, kind: input, shape index: {}]   ;;  %s4512_s23 = inlined_call_operand.vmem [shape: f32[1,32], index: 23, kind: input, shape index: {}]   ;;  %s4513_s24 = inlined_call_operand.vmem [shape: f32[32,8], index: 24, kind: input, shape index: {}]   ;;  %s4514_s25 = inlined_call_operand.vmem [shape: f32[1,8], index: 25, kind: input, shape index: {}]   ;;  %s4515_s26 = inlined_call_operand.hbm [shape: f32[2,8], index: 26, kind: output, shape index: {}]  }
   0x1   :  { %4523 = sst [smem:[#allocation6_spill]] %s4489_s0 }
   0x2   :  { %4524 = sst [smem:[#allocation7_spill]] %s4490_s1 }
   0x3   :  { %4525 = sst [smem:[#allocation8_spill]] %s4491_s2 }
   0x4   :  { %4526 = sst [smem:[#allocation9_spill]] %s4492_s3 }
   0x5   :  { %4527 = sst [smem:[#allocation10_spill]] %s4493_s4 }
   0x6   :  { %4528 = sst [smem:[#allocation11_spill]] %s4494_s5 }
   0x7   :  { %4529 = sst [smem:[#allocation12_spill]] %s4495_s6 }
   0x8   :  { %4530 = sst [smem:[#allocation13_spill]] %s4496_s7 }
   0x9   :  { %4531 = sst [smem:[#allocation14_spill]] %s4497_s8 }
   0xa   :  { %4532 = sst [smem:[#allocation15_spill]] %s4498_s9 }
   0xb   :  { %4533 = sst [smem:[#allocation16_spill]] %s4499_s10 }
   0xc   :  { %4534 = sst [smem:[#allocation17_spill]] %s4510_s21 }
   0xd   :  { %s4535_s7 = sld [smem:[#allocation10_spill]]  ;;  %vm121_vm0 = vcmask 64512  }
   0xe   :  { %s4536_s21 = sld [smem:[#allocation6_spill]] }
  0x13   :  { %v113_v0 = vld [vmem:[%s4535_s7] sm:$0xff] }
  0x14   :  { %v103_v1 = vld [vmem:[%s4536_s21] sm:$0xff]  ;;  %v104_v2 = vld [vmem:[%s4536_s21 + $0x8] sm:$0xff]  ;;  %2709 = vmatprep.subr.mxu0 %v113_v0  ;;  %v105_v3 = vld [vmem:[%s4536_s21 + $0x10] sm:$0xff] }
  0x15   :  { %2711 = vmatprep.mubr.msk.f32.mxu0 %vm121_vm0, %v103_v1  ;;  %2710 = vmatpush3.msra.mxu0 %v113_v0 }
  0x16   :  { %2712 = vmatmul.mubr.msk.f32.vlgmr.msra.gmra.mxu0 %vm121_vm0, %v104_v2 }
  0x17   :  { %31 = vsyncpa [#allocation4], 0  ;;  %2714 = vmatprep.mubr.msk.f32.mxu0 %vm121_vm0, %v105_v3  ;;  %v106_v4 = vld [vmem:[%s4536_s21 + $0x18] sm:$0xff]  ;;  %v107_v5 = vld [vmem:[%s4536_s21 + $0x20] sm:$0xff]  ;;  %s4537_s2 = sld [smem:[#allocation11_spill]]  ;;  %vm88_vm1 = vcmask 261120  }
  0x18   :  { %v108_v6 = vld [vmem:[%s4536_s21 + $0x28] sm:$0xff]  ;;  %v109_v7 = vld [vmem:[%s4536_s21 + $0x30] sm:$0xff]  ;;  %v110_v8 = vld [vmem:[%s4536_s21 + $0x38] sm:$0xff]  ;;  %s4538_s10 = sld [smem:[#allocation14_spill]]  ;;  %vm1442_vm14 = vcmask 326656   ;;  %vm1706_vm15 = vcmask 1043456  }
  0x19   :  { %v111_v9 = vld [vmem:[%s4536_s21 + $0x40] sm:$0xff]  ;;  %v112_v10 = vld [vmem:[%s4536_s21 + $0x48] sm:$0xff]  ;;  %s4539_s29 = sld [smem:[#allocation12_spill]] }
  0x1a   :  { %2715 = vmatmul.mubr.msk.f32.gmra.mxu0 %vm121_vm0, %v106_v4  ;;  %s4540_s30 = sld [smem:[#allocation13_spill]] }
  0x1b   :  { %2717 = vmatprep.mubr.msk.f32.mxu0 %vm121_vm0, %v107_v5  ;;  %s4541_s5 = sld [smem:[#allocation16_spill]] }
  0x1c   :  { %s4542_s1 = sld [smem:[#allocation8_spill]] }
  0x1d   :  { %v3239_v12 = vld [vmem:[%s4537_s2] ss:$0 sm:$0xff]  ;;  %s4543_s3 = sld [smem:[#allocation15_spill]] }
  0x1e   :  { %2718 = vmatmul.mubr.msk.f32.gmra.mxu0 %vm121_vm0, %v108_v6  ;;  %s4560_s8 = sld [smem:[#allocation7_spill]] }
  0x1f   :  { %2720 = vmatprep.mubr.msk.f32.mxu0 %vm121_vm0, %v109_v7 }
  0x22   :  { %2721 = vmatmul.mubr.msk.f32.gmra.mxu0 %vm121_vm0, %v110_v8  ;;  %v434_v8 = vld [vmem:[%s4538_s10 + $0x18] sm:$0xff] }
  0x23   :  { %2723 = vmatprep.mubr.msk.f32.mxu0 %vm121_vm0, %v111_v9  ;;  %2726 = vmatprep.subr.mxu0 %v434_v8  ;;  %v433_v9 = vld [vmem:[%s4538_s10 + $0x10] sm:$0xff] }
  0x24   :  { %2922 = vmatprep.subr.mxu1 %v434_v8  ;;  %2727 = vmatpush3.msra.mxu0 %v434_v8 }
  0x25   :  { %2926 = vmatpush3.msra.mxu1 %v434_v8  ;;  %2728 = vmatprep.subr.mxu0 %v433_v9 }
  0x26   :  { %2724 = vmatmul.mubr.msk.f32.gmra.mxu0 %vm121_vm0, %v112_v10  ;;  %2923 = vmatprep.subr.mxu1 %v433_v9  ;;  %v432_v10 = vld [vmem:[%s4538_s10 + $0x8] sm:$0xff]  ;;  %vm3055_vm0 = vmmov 0  }
  0x27   :  { %2729 = vmatpush3.msra.mxu0 %v433_v9  ;;  %2927 = vmatpush3.msra.mxu1 %v433_v9 }
  0x28   :  { %2730 = vmatprep.subr.mxu0 %v432_v10  ;;  %2924 = vmatprep.subr.mxu1 %v432_v10 }
  0x29   :  { %2731 = vmatpush3.msra.mxu0 %v432_v10  ;;  %2928 = vmatpush3.msra.mxu1 %v432_v10 }
  0xd6   :  { %v2713_v11 = vpop.f32.mrf.mxu0 }
  0xd7   :  { %v224_v16 = vadd.f32 %v2713_v11, %v3239_v12  ;;  %v431_v11 = vld [vmem:[%s4538_s10] sm:$0xff] }
  0xd8   :  { %v218_v13 = vpop.f32.mrf.mxu0  ;;  %2732 = vmatprep.subr.mxu0 %v431_v11  ;;  %2925 = vmatprep.subr.mxu1 %v431_v11 }
  0xd9   :  { %v219_v14 = vadd.f32 %v3239_v12, %v218_v13  ;;  %v271_v23 = vsel %vm88_vm1, %v224_v16, 0.0  ;;  %2733 = vmatpush3.msra.mxu0 %v431_v11  ;;  %2929 = vmatpush3.msra.mxu1 %v431_v11 }
  0xda   :  { %v2716_v15 = vpop.f32.mrf.mxu0 }
  0xdb   :  { %v268_v17 = vsel %vm88_vm1, %v219_v14, 0.0  ;;  %v234_v19 = vadd.f32 %v2716_v15, %v3239_v12 }
  0xdc   :  { %v228_v18 = vpop.f32.mrf.mxu0  ;;  %269 = vadd.xlane.f32.xlu0 %v268_v17 }
  0xdd   :  { %v229_v20 = vadd.f32 %v3239_v12, %v228_v18  ;;  %v277_v27 = vsel %vm88_vm1, %v234_v19, 0.0 }
  0xde   :  { %v2719_v21 = vpop.f32.mrf.mxu0 }
  0xdf   :  { %v274_v22 = vsel %vm88_vm1, %v229_v20, 0.0  ;;  %v244_v25 = vadd.f32 %v2719_v21, %v3239_v12 }
  0xe0   :  { %v238_v24 = vpop.f32.mrf.mxu0  ;;  %275 = vadd.xlane.f32.xlu1 %v274_v22  ;;  %272 = vadd.xlane.f32.xlu0 %v271_v23 }
  0xe1   :  { %v239_v26 = vadd.f32 %v3239_v12, %v238_v24  ;;  %v283_v29 = vsel %vm88_vm1, %v244_v25, 0.0 }
  0xe2   :  { %v2722_v32 = vpop.f32.mrf.mxu0 }
  0xe3   :  { %v280_v28 = vsel %vm88_vm1, %v239_v26, 0.0  ;;  %v3284_v63 = vadd.f32 %v2722_v32, %v3239_v12 }
  0xe4   :  { %278 = vadd.xlane.f32.xlu1 %v277_v27  ;;  %281 = vadd.xlane.f32.xlu0 %v280_v28  ;;  %v248_v39 = vpop.f32.mrf.mxu0 }
  0xe5   :  { %v3273_v56 = vadd.f32 %v3239_v12, %v248_v39  ;;  %v289_v5 = vsel %vm88_vm1, %v3284_v63, 0.0 }
  0xe6   :  { %v2725_v49 = vpop.f32.mrf.mxu0 }
  0xe7   :  { %v286_v2 = vsel %vm88_vm1, %v3273_v56, 0.0  ;;  %v3295_v4 = vadd.f32 %v2725_v49, %v3239_v12 }
  0xe8   :  { %284 = vadd.xlane.f32.xlu1 %v283_v29  ;;  %v258_v59 = vpop.f32.mrf.mxu0 }
  0xe9   :  { %v3287_v0 = vadd.f32 %v3239_v12, %v258_v59  ;;  %v295_v7 = vsel %vm88_vm1, %v3295_v4, 0.0 }
  0xeb   :  { %v292_v6 = vsel %vm88_vm1, %v3287_v0, 0.0 }
 0x165   :  { %v270_v30 = vpop.xlane.xlu0 %269 }
 0x166   :  { %v299_v31 = vmul.f32 0.03125, %v270_v30 }
 0x168   :  { %v3253_v33 = vsub.f32 %v219_v14, %v299_v31 }
 0x169   :  { %v276_v34 = vpop.xlane.xlu1 %275  ;;  %v273_v35 = vpop.xlane.xlu0 %272 }
 0x16a   :  { %v301_v36 = vmul.f32 0.03125, %v276_v34  ;;  %v300_v37 = vmul.f32 0.03125, %v273_v35  ;;  %v319_v38 = vmul.f32 %v3253_v33, %v3253_v33 }
 0x16c   :  { %v3257_v40 = vsub.f32 %v229_v20, %v301_v36  ;;  %v3259_v41 = vsub.f32 %v224_v16, %v300_v37  ;;  %v329_v42 = vsel %vm88_vm1, %v319_v38, 0.0 }
 0x16d   :  { %v279_v43 = vpop.xlane.xlu1 %278  ;;  %330 = vadd.xlane.f32.xlu0 %v329_v42  ;;  %v282_v44 = vpop.xlane.xlu0 %281  ;;  %v3323_v42 = vld [vmem:[%s4539_s29] ss:$0 sm:$0xff] }
 0x16e   :  { %v302_v45 = vmul.f32 0.03125, %v279_v43  ;;  %v303_v46 = vmul.f32 0.03125, %v282_v44  ;;  %v321_v47 = vmul.f32 %v3257_v40, %v3257_v40  ;;  %v320_v48 = vmul.f32 %v3259_v41, %v3259_v41 }
 0x170   :  { %v3266_v50 = vsub.f32 %v234_v19, %v302_v45  ;;  %v3268_v51 = vsub.f32 %v239_v26, %v303_v46  ;;  %v335_v52 = vsel %vm88_vm1, %v321_v47, 0.0  ;;  %v332_v53 = vsel %vm88_vm1, %v320_v48, 0.0 }
 0x171   :  { %v285_v54 = vpop.xlane.xlu1 %284  ;;  %336 = vadd.xlane.f32.xlu0 %v335_v52  ;;  %333 = vadd.xlane.f32.xlu1 %v332_v53  ;;  %v3340_v53 = vld [vmem:[%s4540_s30] ss:$0 sm:$0xff] }
 0x172   :  { %v304_v55 = vmul.f32 0.03125, %v285_v54  ;;  %v322_v57 = vmul.f32 %v3266_v50, %v3266_v50  ;;  %v323_v58 = vmul.f32 %v3268_v51, %v3268_v51 }
 0x174   :  { %v3279_v60 = vsub.f32 %v244_v25, %v304_v55  ;;  %v338_v61 = vsel %vm88_vm1, %v322_v57, 0.0  ;;  %v341_v62 = vsel %vm88_vm1, %v323_v58, 0.0 }
 0x175   :  { %339 = vadd.xlane.f32.xlu1 %v338_v61  ;;  %342 = vadd.xlane.f32.xlu0 %v341_v62 }
 0x176   :  { %v324_v1 = vmul.f32 %v3279_v60, %v3279_v60 }
 0x178   :  { %v344_v3 = vsel %vm88_vm1, %v324_v1, 0.0 }
 0x179   :  { %345 = vadd.xlane.f32.xlu1 %v344_v3  ;;  %287 = vadd.xlane.f32.xlu0 %v286_v2 }
 0x17d   :  { %290 = vadd.xlane.f32.xlu1 %v289_v5  ;;  %293 = vadd.xlane.f32.xlu0 %v292_v6 }
 0x181   :  { %296 = vadd.xlane.f32.xlu1 %v295_v7 }
 0x1f6   :  { %v331_v12 = vpop.xlane.xlu0 %330 }
 0x1f7   :  { %v359_v13 = vmul.f32 0.03125, %v331_v12 }
 0x1f9   :  { %v369_v14 = vadd.f32 1e-05, %v359_v13  ;;  %v3397_v13 = vld [vmem:[%s4542_s1 + $0x18] sm:$0xff] }
 0x1fa   :  { %v334_v15 = vpop.xlane.xlu1 %333  ;;  %v337_v16 = vpop.xlane.xlu0 %336  ;;  %2749 = vmatprep.subr.mxu0 %v3397_v13  ;;  %vm923_vm7 = vcmp.gt.f32.partialorder %v3397_v13, 0.5 }
 0x1fb   :  { %2937 = vrsqrt.f32 %v369_v14  ;;  %v360_v17 = vmul.f32 0.03125, %v334_v15  ;;  %v361_v18 = vmul.f32 0.03125, %v337_v16  ;;  %v3053_v14 = vmov 0   ;;  %v3405_v15 = vld [vmem:[%s4542_s1 + $0x10] sm:$0xff]  ;;  %v3412_v16 = vld [vmem:[%s4542_s1 + $0x8] sm:$0xff] }
 0x1fc   :  { %2936 = vset.pattern.permute.xlu1 %v3053_v14  ;;  %2935 = vset.pattern.permute.xlu0 %v3053_v14  ;;  %vm699_vm3 = vcmp.gt.f32.partialorder %v3412_v16, 0.5  ;;  %vm811_vm4 = vcmp.gt.f32.partialorder %v3405_v15, 0.5 }
 0x1fd   :  { %v370_v19 = vadd.f32 1e-05, %v360_v17  ;;  %v371_v20 = vadd.f32 1e-05, %v361_v18  ;;  %v3419_v17 = vld [vmem:[%s4542_s1] sm:$0xff] }
 0x1fe   :  { %v340_v21 = vpop.xlane.xlu1 %339  ;;  %v343_v22 = vpop.xlane.xlu0 %342  ;;  %vm587_vm2 = vcmp.gt.f32.partialorder %v3419_v17, 0.5 }
 0x1ff   :  { %2939 = vrsqrt.f32 %v370_v19  ;;  %v362_v23 = vmul.f32 0.03125, %v340_v21  ;;  %v363_v24 = vmul.f32 0.03125, %v343_v22 }
 0x200   :  { %2941 = vrsqrt.f32 %v371_v20 }
 0x201   :  { %v372_v25 = vadd.f32 1e-05, %v362_v23  ;;  %v373_v26 = vadd.f32 1e-05, %v363_v24 }
 0x202   :  { %v346_v27 = vpop.xlane.xlu1 %345  ;;  %v288_v28 = vpop.xlane.xlu0 %287 }
 0x203   :  { %2943 = vrsqrt.f32 %v372_v25  ;;  %v364_v29 = vmul.f32 0.03125, %v346_v27  ;;  %v305_v30 = vmul.f32 0.03125, %v288_v28 }
 0x204   :  { %2945 = vrsqrt.f32 %v373_v26 }
 0x205   :  { %v374_v31 = vadd.f32 1e-05, %v364_v29  ;;  %v3316_v32 = vsub.f32 %v3273_v56, %v305_v30 }
 0x206   :  { %v291_v34 = vpop.xlane.xlu1 %290  ;;  %v294_v35 = vpop.xlane.xlu0 %293 }
 0x207   :  { %2947 = vrsqrt.f32 %v374_v31  ;;  %v306_v36 = vmul.f32 0.03125, %v291_v34  ;;  %v307_v37 = vmul.f32 0.03125, %v294_v35  ;;  %v325_v38 = vmul.f32 %v3316_v32, %v3316_v32 }
 0x208   :  { %v2938_v39 = vpop.eup %2937 }
 0x209   :  { %v3326_v43 = vsub.f32 %v3284_v63, %v306_v36  ;;  %v3329_v44 = vsub.f32 %v3287_v0, %v307_v37  ;;  %v347_v45 = vsel %vm88_vm1, %v325_v38, 0.0  ;;  %v389_v46 = vmul.f32 %v2938_v39, %v3253_v33 }
 0x20a   :  { %v297_v47 = vpop.xlane.xlu1 %296  ;;  %348 = vadd.xlane.f32.xlu0 %v347_v45 }
 0x20b   :  { %v308_v48 = vmul.f32 0.03125, %v297_v47  ;;  %v326_v49 = vmul.f32 %v3326_v43, %v3326_v43  ;;  %v327_v52 = vmul.f32 %v3329_v44, %v3329_v44  ;;  %v405_v54 = vmul.f32 %v3323_v42, %v389_v46 }
 0x20c   :  { %v2940_v55 = vpop.eup %2939 }
 0x20d   :  { %v2942_v56 = vpop.eup %2941  ;;  %v390_v33 = vmul.f32 %v2940_v55, %v3259_v41  ;;  %v3345_v57 = vsub.f32 %v3295_v4, %v308_v48  ;;  %v350_v58 = vsel %vm88_vm1, %v326_v49, 0.0  ;;  %v353_v59 = vsel %vm88_vm1, %v327_v52, 0.0  ;;  %v1232_v52 = vld [vmem:[%s4541_s5 + $0x10] sm:$0xff]  ;;  %v1230_v55 = vld [vmem:[%s4541_s5] sm:$0xff] }
 0x20e   :  { %351 = vadd.xlane.f32.xlu1 %v350_v58  ;;  %354 = vadd.xlane.f32.xlu0 %v353_v59  ;;  %v3350_v61 = vadd.f32 %v3340_v53, %v405_v54  ;;  %v391_v62 = vmul.f32 %v2942_v56, %v3257_v40  ;;  %v700_v58 = vsel %vm699_vm3, 1, %v3053_v14  ;;  %v812_v59 = vsel %vm811_vm4, 1, %v3053_v14 }
 0x20f   :  { %v406_v63 = vmul.f32 %v3323_v42, %v390_v33  ;;  %v328_v0 = vmul.f32 %v3345_v57, %v3345_v57  ;;  %vm1780_vm3 = vcmask 254976   ;;  %vm2109_vm4 = vcmask 130112  }
 0x210   :  { %v2944_v41 = vpop.eup %2943  ;;  %2734 = vmatprep.mubr.msk.f32.mxu0 %vm88_vm1, %v3350_v61  ;;  %v407_v1 = vmul.f32 %v3323_v42, %v391_v62 }
 0x211   :  { %v2946_v2 = vpop.eup %2945  ;;  %v356_v3 = vsel %vm88_vm1, %v328_v0, 0.0  ;;  %v3361_v4 = vadd.f32 %v3340_v53, %v406_v63  ;;  %v392_v5 = vmul.f32 %v2944_v41, %v3266_v50  ;;  %v3482_v63 = vld [vmem:[%s4543_s3] ss:$0 sm:$0xff] }
 0x212   :  { %357 = vadd.xlane.f32.xlu1 %v356_v3  ;;  %v3365_v40 = vadd.f32 %v3340_v53, %v407_v1  ;;  %v393_v6 = vmul.f32 %v2946_v2, %v3268_v51 }
 0x213   :  { %2735 = vmatmul.mubr.msk.f32.vlgmr.msra.gmra.mxu0 %vm88_vm1, %v3361_v4  ;;  %v408_v7 = vmul.f32 %v3323_v42, %v392_v5 }
 0x214   :  { %v2948_v8 = vpop.eup %2947  ;;  %2737 = vmatprep.mubr.msk.f32.mxu0 %vm88_vm1, %v3365_v40  ;;  %v409_v9 = vmul.f32 %v3323_v42, %v393_v6  ;;  %2750 = vmatpush3.msra.mxu0 %v3397_v13 }
 0x215   :  { %v3375_v10 = vadd.f32 %v3340_v53, %v408_v7  ;;  %v394_v50 = vmul.f32 %v2948_v8, %v3279_v60  ;;  %v1233_v60 = vld [vmem:[%s4541_s5 + $0x18] sm:$0xff]  ;;  %2751 = vmatprep.subr.mxu0 %v3405_v15 }
 0x216   :  { %v3379_v11 = vadd.f32 %v3340_v53, %v409_v9  ;;  %2772 = vmatprep.subr.mxu1 %v1233_v60  ;;  %2752 = vmatpush3.msra.mxu0 %v3405_v15 }
 0x217   :  { %2738 = vmatmul.mubr.msk.f32.gmra.mxu0 %vm88_vm1, %v3375_v10  ;;  %v410_v51 = vmul.f32 %v3323_v42, %v394_v50  ;;  %2753 = vmatprep.subr.mxu0 %v3412_v16 }
 0x218   :  { %2740 = vmatprep.mubr.msk.f32.mxu0 %vm88_vm1, %v3379_v11  ;;  %2754 = vmatpush3.msra.mxu0 %v3412_v16 }
 0x219   :  { %v3387_v12 = vadd.f32 %v3340_v53, %v410_v51  ;;  %2755 = vmatprep.subr.mxu0 %v3419_v17 }
 0x21a   :  { %2756 = vmatpush3.msra.mxu0 %v3419_v17 }
 0x21b   :  { %2741 = vmatmul.mubr.msk.f32.gmra.mxu0 %vm88_vm1, %v3387_v12 }
 0x293   :  { %v349_v18 = vpop.xlane.xlu0 %348 }
 0x294   :  { %v365_v19 = vmul.f32 0.03125, %v349_v18 }
 0x296   :  { %v375_v20 = vadd.f32 1e-05, %v365_v19 }
 0x297   :  { %v352_v21 = vpop.xlane.xlu1 %351  ;;  %v355_v22 = vpop.xlane.xlu0 %354 }
 0x298   :  { %2949 = vrsqrt.f32 %v375_v20  ;;  %v366_v23 = vmul.f32 0.03125, %v352_v21  ;;  %v367_v24 = vmul.f32 0.03125, %v355_v22 }
 0x29a   :  { %v376_v25 = vadd.f32 1e-05, %v366_v23  ;;  %v377_v26 = vadd.f32 1e-05, %v367_v24 }
 0x29b   :  { %v358_v27 = vpop.xlane.xlu1 %357 }
 0x29c   :  { %2951 = vrsqrt.f32 %v376_v25  ;;  %v368_v28 = vmul.f32 0.03125, %v358_v27 }
 0x29d   :  { %2953 = vrsqrt.f32 %v377_v26 }
 0x29e   :  { %v378_v29 = vadd.f32 1e-05, %v368_v28 }
 0x2a0   :  { %2955 = vrsqrt.f32 %v378_v29 }
 0x2a5   :  { %v2950_v30 = vpop.eup %2949 }
 0x2a6   :  { %v395_v31 = vmul.f32 %v2950_v30, %v3316_v32 }
 0x2a8   :  { %v411_v34 = vmul.f32 %v3323_v42, %v395_v31 }
 0x2a9   :  { %v2952_v35 = vpop.eup %2951 }
 0x2aa   :  { %v2954_v36 = vpop.eup %2953  ;;  %v427_v37 = vadd.f32 %v3340_v53, %v411_v34  ;;  %v396_v38 = vmul.f32 %v2952_v35, %v3326_v43 }
 0x2ab   :  { %v397_v39 = vmul.f32 %v2954_v36, %v3329_v44  ;;  %v1231_v44 = vld [vmem:[%s4541_s5 + $0x8] sm:$0xff] }
 0x2ac   :  { %2743 = vmatprep.mubr.msk.f32.mxu1 %vm88_vm1, %v427_v37  ;;  %v412_v45 = vmul.f32 %v3323_v42, %v396_v38 }
 0x2ad   :  { %v2956_v46 = vpop.eup %2955  ;;  %v413_v47 = vmul.f32 %v3323_v42, %v397_v39 }
 0x2ae   :  { %v428_v48 = vadd.f32 %v3340_v53, %v412_v45  ;;  %v398_v32 = vmul.f32 %v2956_v46, %v3345_v57  ;;  %v588_v57 = vsel %vm587_vm2, 1, %v3053_v14  ;;  %vm1702_vm2 = vcmask 31744  }
 0x2af   :  { %v429_v49 = vadd.f32 %v3340_v53, %v413_v47 }
 0x2b0   :  { %2744 = vmatmul.mubr.msk.f32.vlgmr.msra.gmra.mxu1 %vm88_vm1, %v428_v48  ;;  %v414_v43 = vmul.f32 %v3323_v42, %v398_v32  ;;  %v589_v42 = vlaneseq }
 0x2b1   :  { %2746 = vmatprep.mubr.msk.f32.mxu1 %vm88_vm1, %v429_v49  ;;  %2773 = vmatpush3.msra.mxu1 %v1233_v60 }
 0x2b2   :  { %2774 = vmatprep.subr.mxu1 %v1232_v52  ;;  %v430_v54 = vadd.f32 %v3340_v53, %v414_v43  ;;  %v3465_v53 = vshrl.u32 %v589_v42, 7 }
 0x2b3   :  { %2775 = vmatpush3.msra.mxu1 %v1232_v52 }
 0x2b4   :  { %2747 = vmatmul.mubr.msk.f32.gmra.mxu1 %vm88_vm1, %v430_v54  ;;  %2776 = vmatprep.subr.mxu1 %v1231_v44  ;;  %v3471_v56 = vsub.s32 0, %v3465_v53  ;;  %v646_v33 = vsub.s32 4, %v3465_v53 }
 0x2b5   :  { %2777 = vmatpush3.msra.mxu1 %v1231_v44  ;;  %2780 = vmatprep.mubr.msk.f32.mxu1 %vm88_vm1, %v3350_v61 }
 0x2b6   :  { %2778 = vmatprep.subr.mxu1 %v1230_v55  ;;  %v592_v61 = vrot.slane %v588_v57, %v3471_v56  ;;  %v759_v62 = vrot.slane %v700_v58, %v646_v33  ;;  %v647_v0 = vrot.slane %v588_v57, %v646_v33  ;;  %v816_v41 = vrot.slane %v812_v59, %v3471_v56 }
 0x2b7   :  { %2779 = vmatpush3.msra.mxu1 %v1230_v55  ;;  %v704_v6 = vrot.slane %v700_v58, %v3471_v56  ;;  %v871_v7 = vrot.slane %v812_v59, %v646_v33 }
 0x2b8   :  { %2781 = vmatmul.mubr.msk.f32.vlgmr.msra.gmra.mxu1 %vm88_vm1, %v3361_v4  ;;  %vm3485_vm5 = vcmp.eq.s32.totalorder %v592_v61, 1  ;;  %vm3489_vm6 = vcmp.eq.s32.totalorder %v759_v62, 1  ;;  %vm3497_vm8 = vcmp.eq.s32.totalorder %v647_v0, 1  ;;  %vm3501_vm9 = vcmp.eq.s32.totalorder %v816_v41, 1 }
 0x2b9   :  { %2783 = vmatprep.mubr.msk.f32.mxu1 %vm88_vm1, %v3365_v40  ;;  %vm3521_vm10 = vcmp.eq.s32.totalorder %v704_v6, 1  ;;  %vm3525_vm11 = vcmp.eq.s32.totalorder %v871_v7, 1 }
 0x2bc   :  { %2784 = vmatmul.mubr.msk.f32.gmra.mxu1 %vm88_vm1, %v3375_v10  ;;  %v924_v10 = vsel %vm923_vm7, 1, %v3053_v14  ;;  %vm2144_vm7 = vcmask 1041409  }
 0x2bd   :  { %2786 = vmatprep.mubr.msk.f32.mxu1 %vm88_vm1, %v3379_v11  ;;  %v983_v14 = vrot.slane %v924_v10, %v646_v33  ;;  %v928_v15 = vrot.slane %v924_v10, %v3471_v56 }
 0x2bf   :  { %vm3538_vm12 = vcmp.eq.s32.totalorder %v983_v14, 1  ;;  %vm3542_vm13 = vcmp.eq.s32.totalorder %v928_v15, 1 }
 0x2c0   :  { %2787 = vmatmul.mubr.msk.f32.gmra.mxu1 %vm88_vm1, %v3387_v12 }
 0x2c1   :  { %2789 = vmatprep.mubr.msk.f32.mxu1 %vm88_vm1, %v427_v37 }
 0x2c4   :  { %2790 = vmatmul.mubr.msk.f32.gmra.mxu1 %vm88_vm1, %v428_v48 }
 0x2c5   :  { %2792 = vmatprep.mubr.msk.f32.mxu1 %vm88_vm1, %v429_v49 }
 0x2c8   :  { %2793 = vmatmul.mubr.msk.f32.gmra.mxu1 %vm88_vm1, %v430_v54 }
 0x2d3   :  { %v2736_v1 = vpop.f32.mrf.mxu0 }
 0x2d4   :  { %v3495_v4 = vadd.f32 %v2736_v1, %v3482_v63 }
 0x2d5   :  { %v538_v20 = vpop.f32.mrf.mxu0 }
 0x2d6   :  { %v595_v8 = vsel %vm3485_vm5, %v3495_v4, -1e+30  ;;  %v762_v9 = vsel %vm3489_vm6, %v3495_v4, -1e+30  ;;  %v650_v51 = vsel %vm3497_vm8, %v3495_v4, -1e+30  ;;  %v3549_v25 = vadd.f32 %v3482_v63, %v538_v20 }
 0x2d7   :  { %v607_v50 = vsel %vm88_vm1, %v595_v8, -inf  ;;  %v774_v11 = vsel %vm88_vm1, %v762_v9, -inf  ;;  %v819_v12 = vsel %vm3501_vm9, %v3495_v4, -1e+30  ;;  %v662_v16 = vsel %vm88_vm1, %v650_v51, -inf  ;;  %v2739_v47 = vpop.f32.mrf.mxu0 }
 0x2d8   :  { %608 = vmax.xlane.f32.xlu1 %v607_v50  ;;  %775 = vmax.xlane.f32.xlu0 %v774_v11  ;;  %v831_v17 = vsel %vm88_vm1, %v819_v12, -inf  ;;  %v707_v18 = vsel %vm3521_vm10, %v3495_v4, -1e+30  ;;  %v874_v19 = vsel %vm3525_vm11, %v3495_v4, -1e+30  ;;  %v3584_v49 = vadd.f32 %v2739_v47, %v3482_v63 }
 0x2d9   :  { %v719_v23 = vsel %vm88_vm1, %v707_v18, -inf  ;;  %v886_v24 = vsel %vm88_vm1, %v874_v19, -inf  ;;  %v986_v26 = vsel %vm3538_vm12, %v3495_v4, -1e+30  ;;  %v931_v27 = vsel %vm3542_vm13, %v3495_v4, -1e+30  ;;  %v548_v44 = vpop.f32.mrf.mxu0 }
 0x2da   :  { %v998_v28 = vsel %vm88_vm1, %v986_v26, -inf  ;;  %v943_v29 = vsel %vm88_vm1, %v931_v27, -inf  ;;  %v818_v30 = vsel %vm3501_vm9, %v3549_v25, -1e+30  ;;  %v594_v31 = vsel %vm3485_vm5, %v3549_v25, -1e+30 }
 0x2db   :  { %v828_v34 = vsel %vm88_vm1, %v818_v30, -inf  ;;  %v604_v35 = vsel %vm88_vm1, %v594_v31, -inf  ;;  %v873_v36 = vsel %vm3525_vm11, %v3549_v25, -1e+30  ;;  %v649_v37 = vsel %vm3497_vm8, %v3549_v25, -1e+30  ;;  %v2742_v26 = vpop.f32.mrf.mxu0 }
 0x2dc   :  { %663 = vmax.xlane.f32.xlu1 %v662_v16  ;;  %832 = vmax.xlane.f32.xlu0 %v831_v17  ;;  %v883_v38 = vsel %vm88_vm1, %v873_v36, -inf  ;;  %v659_v39 = vsel %vm88_vm1, %v649_v37, -inf  ;;  %v930_v45 = vsel %vm3542_vm13, %v3549_v25, -1e+30  ;;  %v706_v46 = vsel %vm3521_vm10, %v3549_v25, -1e+30 }
 0x2dd   :  { %v940_v48 = vsel %vm88_vm1, %v930_v45, -inf  ;;  %v716_v32 = vsel %vm88_vm1, %v706_v46, -inf  ;;  %v985_v52 = vsel %vm3538_vm12, %v3549_v25, -1e+30  ;;  %v761_v43 = vsel %vm3489_vm6, %v3549_v25, -1e+30  ;;  %v558_v47 = vpop.f32.mrf.mxu0 }
 0x2de   :  { %v995_v54 = vsel %vm88_vm1, %v985_v52, -inf  ;;  %v771_v55 = vsel %vm88_vm1, %v761_v43, -inf  ;;  %v3595_v33 = vadd.f32 %v3482_v63, %v548_v44  ;;  %v764_v57 = vsel %vm3489_vm6, %v3584_v49, -1e+30 }
 0x2df   :  { %v597_v58 = vsel %vm3485_vm5, %v3584_v49, -1e+30  ;;  %v780_v59 = vsel %vm88_vm1, %v764_v57, -inf  ;;  %v652_v0 = vsel %vm3497_vm8, %v3584_v49, -1e+30  ;;  %v3681_v52 = vadd.f32 %v3482_v63, %v558_v47 }
 0x2e0   :  { %720 = vmax.xlane.f32.xlu1 %v719_v23  ;;  %887 = vmax.xlane.f32.xlu0 %v886_v24  ;;  %v613_v61 = vsel %vm88_vm1, %v597_v58, -inf  ;;  %v596_v62 = vsel %vm3485_vm5, %v3595_v33, -1e+30  ;;  %v668_v1 = vsel %vm88_vm1, %v652_v0, -inf  ;;  %v651_v6 = vsel %vm3497_vm8, %v3595_v33, -1e+30 }
 0x2e1   :  { %v610_v41 = vsel %vm88_vm1, %v596_v62, -inf  ;;  %v709_v7 = vsel %vm3521_vm10, %v3584_v49, -1e+30  ;;  %v665_v8 = vsel %vm88_vm1, %v651_v6, -inf  ;;  %v708_v10 = vsel %vm3521_vm10, %v3595_v33, -1e+30 }
 0x2e2   :  { %v725_v9 = vsel %vm88_vm1, %v709_v7, -inf  ;;  %v821_v50 = vsel %vm3501_vm9, %v3584_v49, -1e+30  ;;  %v722_v11 = vsel %vm88_vm1, %v708_v10, -inf  ;;  %v763_v12 = vsel %vm3489_vm6, %v3595_v33, -1e+30 }
 0x2e3   :  { %v837_v51 = vsel %vm88_vm1, %v821_v50, -inf  ;;  %v876_v14 = vsel %vm3525_vm11, %v3584_v49, -1e+30  ;;  %v777_v15 = vsel %vm88_vm1, %v763_v12, -inf  ;;  %v875_v17 = vsel %vm3525_vm11, %v3595_v33, -1e+30 }
 0x2e4   :  { %999 = vmax.xlane.f32.xlu1 %v998_v28  ;;  %944 = vmax.xlane.f32.xlu0 %v943_v29  ;;  %v892_v16 = vsel %vm88_vm1, %v876_v14, -inf  ;;  %v933_v18 = vsel %vm3542_vm13, %v3584_v49, -1e+30  ;;  %v889_v19 = vsel %vm88_vm1, %v875_v17, -inf  ;;  %v932_v23 = vsel %vm3542_vm13, %v3595_v33, -1e+30 }
 0x2e5   :  { %v949_v20 = vsel %vm88_vm1, %v933_v18, -inf  ;;  %v988_v24 = vsel %vm3538_vm12, %v3584_v49, -1e+30  ;;  %v946_v27 = vsel %vm88_vm1, %v932_v23, -inf  ;;  %v3654_v29 = vadd.f32 %v2742_v26, %v3482_v63  ;;  %v1367_v17 = vld [vmem:[%s4560_s8 + $0x8] sm:$0xff]  ;;  %v1368_v18 = vld [vmem:[%s4560_s8 + $0x10] sm:$0xff] }
 0x2e6   :  { %v1004_v28 = vsel %vm88_vm1, %v988_v24, -inf  ;;  %v987_v30 = vsel %vm3538_vm12, %v3595_v33, -1e+30  ;;  %v820_v31 = vsel %vm3501_vm9, %v3595_v33, -1e+30  ;;  %v1369_v23 = vld [vmem:[%s4560_s8 + $0x18] sm:$0xff] }
 0x2e7   :  { %v823_v36 = vsel %vm3501_vm9, %v3654_v29, -1e+30  ;;  %v599_v37 = vsel %vm3485_vm5, %v3654_v29, -1e+30  ;;  %v878_v45 = vsel %vm3525_vm11, %v3654_v29, -1e+30 }
 0x2e8   :  { %829 = vmax.xlane.f32.xlu1 %v828_v34  ;;  %605 = vmax.xlane.f32.xlu0 %v604_v35  ;;  %v1001_v34 = vsel %vm88_vm1, %v987_v30, -inf  ;;  %v834_v35 = vsel %vm88_vm1, %v820_v31, -inf  ;;  %v654_v46 = vsel %vm3497_vm8, %v3654_v29, -1e+30  ;;  %v935_v43 = vsel %vm3542_vm13, %v3654_v29, -1e+30 }
 0x2e9   :  { %v711_v44 = vsel %vm3521_vm10, %v3654_v29, -1e+30  ;;  %v653_v57 = vsel %vm3497_vm8, %v3681_v52, -1e+30  ;;  %v766_v58 = vsel %vm3489_vm6, %v3654_v29, -1e+30 }
 0x2ea   :  { %v710_v62 = vsel %vm3521_vm10, %v3681_v52, -1e+30  ;;  %v598_v0 = vsel %vm3485_vm5, %v3681_v52, -1e+30  ;;  %v765_v6 = vsel %vm3489_vm6, %v3681_v52, -1e+30 }
 0x2eb   :  { %v877_v7 = vsel %vm3525_vm11, %v3681_v52, -1e+30  ;;  %v822_v10 = vsel %vm3501_vm9, %v3681_v52, -1e+30  ;;  %v934_v50 = vsel %vm3542_vm13, %v3681_v52, -1e+30 }
 0x2ec   :  { %884 = vmax.xlane.f32.xlu1 %v883_v38  ;;  %660 = vmax.xlane.f32.xlu0 %v659_v39  ;;  %v843_v38 = vsel %vm88_vm1, %v823_v36, -inf  ;;  %v619_v39 = vsel %vm88_vm1, %v599_v37, -inf  ;;  %v990_v12 = vsel %vm3538_vm12, %v3654_v29, -1e+30  ;;  %v989_v14 = vsel %vm3538_vm12, %v3681_v52, -1e+30 }
 0x2f0   :  { %941 = vmax.xlane.f32.xlu1 %v940_v48  ;;  %717 = vmax.xlane.f32.xlu0 %v716_v32  ;;  %v898_v48 = vsel %vm88_vm1, %v878_v45, -inf  ;;  %v674_v32 = vsel %vm88_vm1, %v654_v46, -inf }
 0x2f4   :  { %996 = vmax.xlane.f32.xlu1 %v995_v54  ;;  %772 = vmax.xlane.f32.xlu0 %v771_v55  ;;  %v955_v54 = vsel %vm88_vm1, %v935_v43, -inf  ;;  %v731_v55 = vsel %vm88_vm1, %v711_v44, -inf }
 0x2f8   :  { %781 = vmax.xlane.f32.xlu1 %v780_v59  ;;  %614 = vmax.xlane.f32.xlu0 %v613_v61  ;;  %v671_v59 = vsel %vm88_vm1, %v653_v57, -inf  ;;  %v786_v61 = vsel %vm88_vm1, %v766_v58, -inf }
 0x2fc   :  { %611 = vmax.xlane.f32.xlu1 %v610_v41  ;;  %669 = vmax.xlane.f32.xlu0 %v668_v1  ;;  %v728_v41 = vsel %vm88_vm1, %v710_v62, -inf  ;;  %v616_v1 = vsel %vm88_vm1, %v598_v0, -inf }
 0x300   :  { %666 = vmax.xlane.f32.xlu1 %v665_v8  ;;  %726 = vmax.xlane.f32.xlu0 %v725_v9  ;;  %v783_v8 = vsel %vm88_vm1, %v765_v6, -inf  ;;  %v895_v9 = vsel %vm88_vm1, %v877_v7, -inf }
 0x304   :  { %723 = vmax.xlane.f32.xlu1 %v722_v11  ;;  %838 = vmax.xlane.f32.xlu0 %v837_v51  ;;  %v840_v11 = vsel %vm88_vm1, %v822_v10, -inf  ;;  %v952_v51 = vsel %vm88_vm1, %v934_v50, -inf }
 0x308   :  { %778 = vmax.xlane.f32.xlu1 %v777_v15  ;;  %893 = vmax.xlane.f32.xlu0 %v892_v16  ;;  %v1010_v15 = vsel %vm88_vm1, %v990_v12, -inf  ;;  %v1007_v16 = vsel %vm88_vm1, %v989_v14, -inf }
 0x30c   :  { %890 = vmax.xlane.f32.xlu1 %v889_v19  ;;  %950 = vmax.xlane.f32.xlu0 %v949_v20  ;;  %v1366_v19 = vld [vmem:[%s4560_s8] sm:$0xff] }
 0x30d   :  { %v1370_v20 = vld [vmem:[%s4560_s8 + $0x20] sm:$0xff]  ;;  %s4561_s8 = sld [smem:[#allocation9_spill]] }
 0x310   :  { %947 = vmax.xlane.f32.xlu1 %v946_v27  ;;  %1005 = vmax.xlane.f32.xlu0 %v1004_v28 }
 0x314   :  { %1002 = vmax.xlane.f32.xlu1 %v1001_v34  ;;  %835 = vmax.xlane.f32.xlu0 %v834_v35 }
 0x318   :  { %844 = vmax.xlane.f32.xlu1 %v843_v38  ;;  %620 = vmax.xlane.f32.xlu0 %v619_v39 }
 0x31c   :  { %899 = vmax.xlane.f32.xlu1 %v898_v48  ;;  %675 = vmax.xlane.f32.xlu0 %v674_v32 }
 0x320   :  { %956 = vmax.xlane.f32.xlu1 %v955_v54  ;;  %732 = vmax.xlane.f32.xlu0 %v731_v55 }
 0x324   :  { %672 = vmax.xlane.f32.xlu1 %v671_v59  ;;  %787 = vmax.xlane.f32.xlu0 %v786_v61 }
 0x328   :  { %729 = vmax.xlane.f32.xlu1 %v728_v41  ;;  %617 = vmax.xlane.f32.xlu0 %v616_v1 }
 0x32c   :  { %784 = vmax.xlane.f32.xlu1 %v783_v8  ;;  %896 = vmax.xlane.f32.xlu0 %v895_v9 }
 0x330   :  { %841 = vmax.xlane.f32.xlu1 %v840_v11  ;;  %953 = vmax.xlane.f32.xlu0 %v952_v51 }
 0x334   :  { %1011 = vmax.xlane.f32.xlu1 %v1010_v15  ;;  %1008 = vmax.xlane.f32.xlu0 %v1007_v16 }
 0x345   :  { %1378 = vperm.xlu1 %2936, %v1367_v17  }
 0x349   :  { %1383 = vperm.xlu1 %2936, %v1368_v18  }
 0x34a   :  { %1373 = vperm.xlu0 %2935, %v1366_v19  }
 0x34d   :  { %1393 = vperm.xlu1 %2936, %v1370_v20  }
 0x34e   :  { %1388 = vperm.xlu0 %2935, %v1369_v23  }
 0x361   :  { %v609_v24 = vpop.xlane.xlu1 %608  ;;  %v776_v26 = vpop.xlane.xlu0 %775 }
 0x362   :  { %v635_v34 = vsel %vm3485_vm5, %v609_v24, 0.0 }
 0x365   :  { %v664_v27 = vpop.xlane.xlu1 %663  ;;  %v833_v28 = vpop.xlane.xlu0 %832 }
 0x366   :  { %v690_v35 = vsel %vm3497_vm8, %v664_v27, %v635_v34 }
 0x369   :  { %v721_v30 = vpop.xlane.xlu1 %720  ;;  %v888_v31 = vpop.xlane.xlu0 %887 }
 0x36a   :  { %v747_v38 = vsel %vm3521_vm10, %v721_v30, %v690_v35 }
 0x36b   :  { %v802_v45 = vsel %vm3489_vm6, %v776_v26, %v747_v38 }
 0x36c   :  { %v859_v54 = vsel %vm3501_vm9, %v833_v28, %v802_v45 }
 0x36d   :  { %v1000_v36 = vpop.xlane.xlu1 %999  ;;  %v945_v37 = vpop.xlane.xlu0 %944  ;;  %v914_v1 = vsel %vm3525_vm11, %v888_v31, %v859_v54 }
 0x36e   :  { %v971_v12 = vsel %vm3542_vm13, %v945_v37, %v914_v1 }
 0x36f   :  { %v1026_v20 = vsel %vm3538_vm12, %v1000_v36, %v971_v12  ;;  %v3824_v36 = vld [vmem:[%s4500_s11] ss:$0 sm:$0xff] }
 0x370   :  { %v2745_v39 = vpop.f32.mrf.mxu1  ;;  %v1036_v35 = vsub.f32 %v3495_v4, %v1026_v20 }
 0x371   :  { %v3755_v46 = vadd.f32 %v2745_v39, %v3482_v63  ;;  %v830_v47 = vpop.xlane.xlu1 %829  ;;  %v606_v48 = vpop.xlane.xlu0 %605 }
 0x372   :  { %v568_v32 = vpop.f32.mrf.mxu1  ;;  %v634_v15 = vsel %vm3485_vm5, %v606_v48, 0.0 }
 0x373   :  { %v656_v43 = vsel %vm3497_vm8, %v3755_v46, -1e+30  ;;  %v601_v44 = vsel %vm3485_vm5, %v3755_v46, -1e+30  ;;  %v768_v62 = vsel %vm3489_vm6, %v3755_v46, -1e+30  ;;  %v3784_v9 = vadd.f32 %v3482_v63, %v568_v32 }
 0x374   :  { %v3765_v55 = vpop.f32.mrf.mxu1  ;;  %v680_v57 = vsel %vm88_vm1, %v656_v43, -inf  ;;  %v625_v58 = vsel %vm88_vm1, %v601_v44, -inf  ;;  %v713_v0 = vsel %vm3521_vm10, %v3755_v46, -1e+30  ;;  %v792_v7 = vsel %vm88_vm1, %v768_v62, -inf }
 0x375   :  { %v885_v59 = vpop.xlane.xlu1 %884  ;;  %681 = vmax.xlane.f32.xlu1 %v680_v57  ;;  %626 = vmax.xlane.f32.xlu0 %v625_v58  ;;  %v661_v61 = vpop.xlane.xlu0 %660  ;;  %v737_v8 = vsel %vm88_vm1, %v713_v0, -inf  ;;  %v825_v11 = vsel %vm3501_vm9, %v3755_v46, -1e+30  ;;  %v880_v51 = vsel %vm3525_vm11, %v3755_v46, -1e+30 }
 0x376   :  { %v3775_v41 = vpop.f32.mrf.mxu1  ;;  %v689_v16 = vsel %vm3497_vm8, %v661_v61, %v634_v15  ;;  %v849_v18 = vsel %vm88_vm1, %v825_v11, -inf  ;;  %v904_v19 = vsel %vm88_vm1, %v880_v51, -inf  ;;  %v937_v27 = vsel %vm3542_vm13, %v3755_v46, -1e+30 }
 0x377   :  { %v600_v28 = vsel %vm3485_vm5, %v3784_v9, -1e+30  ;;  %v961_v39 = vsel %vm88_vm1, %v937_v27, -inf  ;;  %v992_v43 = vsel %vm3538_vm12, %v3755_v46, -1e+30 }
 0x378   :  { %v3779_v6 = vpop.f32.mrf.mxu1  ;;  %v622_v45 = vsel %vm88_vm1, %v600_v28, -inf  ;;  %v655_v44 = vsel %vm3497_vm8, %v3784_v9, -1e+30  ;;  %v1047_v58 = vmul.f32 1.442695, %v1036_v35 }
 0x379   :  { %v942_v10 = vpop.xlane.xlu1 %941  ;;  %793 = vmax.xlane.f32.xlu1 %v792_v7  ;;  %738 = vmax.xlane.f32.xlu0 %v737_v8  ;;  %v718_v50 = vpop.xlane.xlu0 %717  ;;  %v677_v61 = vsel %vm88_vm1, %v655_v44, -inf  ;;  %v712_v7 = vsel %vm3521_vm10, %v3784_v9, -1e+30  ;;  %v824_v8 = vsel %vm3501_vm9, %v3784_v9, -1e+30 }
 0x37a   :  { %v3794_v14 = vpop.f32.mrf.mxu1  ;;  %v746_v23 = vsel %vm3521_vm10, %v718_v50, %v689_v16  ;;  %v767_v51 = vsel %vm3489_vm6, %v3784_v9, -1e+30  ;;  %v879_v12 = vsel %vm3525_vm11, %v3784_v9, -1e+30 }
 0x37b   :  { %v789_v15 = vsel %vm88_vm1, %v767_v51, -inf  ;;  %v901_v16 = vsel %vm88_vm1, %v879_v12, -inf }
 0x37c   :  { %v3800_v17 = vpop.f32.mrf.mxu1 }
 0x37d   :  { %v997_v24 = vpop.xlane.xlu1 %996  ;;  %850 = vmax.xlane.f32.xlu1 %v849_v18  ;;  %905 = vmax.xlane.f32.xlu0 %v904_v19  ;;  %v773_v26 = vpop.xlane.xlu0 %772  ;;  %v3866_v18 = vadd.f32 %v3765_v55, %v3482_v63 }
 0x37e   :  { %v801_v30 = vsel %vm3489_vm6, %v773_v26, %v746_v23  ;;  %v3816_v31 = vpop.f32.mrf.mxu1  ;;  %v991_v23 = vsel %vm3538_vm12, %v3784_v9, -1e+30 }
 0x37f   :  { %v858_v34 = vsel %vm3501_vm9, %v830_v47, %v801_v30  ;;  %v1013_v26 = vsel %vm88_vm1, %v991_v23, -inf  ;;  %v658_v30 = vsel %vm3497_vm8, %v3866_v18, -1e+30  ;;  %v827_v23 = vsel %vm3501_vm9, %v3866_v18, -1e+30 }
 0x380   :  { %v913_v37 = vsel %vm3525_vm11, %v885_v59, %v858_v34  ;;  %v2788_v38 = vpop.f32.mrf.mxu1  ;;  %v1016_v59 = vsel %vm88_vm1, %v992_v43, -inf  ;;  %v603_v34 = vsel %vm3485_vm5, %v3866_v18, -1e+30 }
 0x381   :  { %v970_v48 = vsel %vm3542_vm13, %v942_v10, %v913_v37  ;;  %v3833_v47 = vadd.f32 %v2788_v38, %v3824_v36  ;;  %v782_v4 = vpop.xlane.xlu1 %781  ;;  %962 = vmax.xlane.f32.xlu0 %v961_v39  ;;  %623 = vmax.xlane.f32.xlu1 %v622_v45  ;;  %v615_v32 = vpop.xlane.xlu0 %614  ;;  %v846_v10 = vsel %vm88_vm1, %v824_v8, -inf  ;;  %v686_v39 = vsel %vm88_vm1, %v658_v30, -inf }
 0x382   :  { %v1025_v54 = vsel %vm3538_vm12, %v997_v24, %v970_v48  ;;  %v936_v24 = vsel %vm3542_vm13, %v3784_v9, -1e+30  ;;  %v637_v35 = vsel %vm3485_vm5, %v615_v32, 0.0  ;;  %v631_v45 = vsel %vm88_vm1, %v603_v34, -inf }
 0x383   :  { %v1035_v57 = vsub.f32 %v3549_v25, %v1025_v54  ;;  %v734_v25 = vsel %vm88_vm1, %v712_v7, -inf  ;;  %v958_v27 = vsel %vm88_vm1, %v936_v24, -inf  ;;  %v3892_v48 = vadd.f32 %v3482_v63, %v3775_v41 }
 0x384   :  { %v715_v54 = vsel %vm3521_vm10, %v3866_v18, -1e+30  ;;  %v770_v7 = vsel %vm3489_vm6, %v3866_v18, -1e+30 }
 0x385   :  { %v1045_v62 = vmul.f32 1.442695, %v1035_v57  ;;  %v3846_v0 = vpop.xlane.xlu1 %611  ;;  %1017 = vmax.xlane.f32.xlu0 %v1016_v59  ;;  %678 = vmax.xlane.f32.xlu1 %v677_v61  ;;  %v670_v1 = vpop.xlane.xlu0 %669  ;;  %v882_v57 = vsel %vm3525_vm11, %v3866_v18, -1e+30  ;;  %v743_v41 = vsel %vm88_vm1, %v715_v54, -inf }
 0x386   :  { %v692_v38 = vsel %vm3497_vm8, %v670_v1, %v637_v35  ;;  %v910_v59 = vsel %vm88_vm1, %v882_v57, -inf  ;;  %v657_v8 = vsel %vm3497_vm8, %v3892_v48, -1e+30 }
 0x387   :  { %2957 = vpow2.f32 %v1045_v62 }
 0x388   :  { %2959 = vpow2.f32 %v1047_v58 }
 0x389   :  { %v667_v50 = vpop.xlane.xlu1 %666  ;;  %735 = vmax.xlane.f32.xlu0 %v734_v25  ;;  %847 = vmax.xlane.f32.xlu1 %v846_v10  ;;  %v727_v11 = vpop.xlane.xlu0 %726 }
 0x38a   :  { %v749_v43 = vsel %vm3521_vm10, %v727_v11, %v692_v38 }
 0x38b   :  { %v804_v63 = vsel %vm3489_vm6, %v782_v4, %v749_v43  ;;  %v636_v4 = vsel %vm3485_vm5, %v3846_v0, 0.0 }
 0x38c   :  { %v691_v10 = vsel %vm3497_vm8, %v667_v50, %v636_v4 }
 0x38d   :  { %v724_v19 = vpop.xlane.xlu1 %723  ;;  %790 = vmax.xlane.f32.xlu0 %v789_v15  ;;  %902 = vmax.xlane.f32.xlu1 %v901_v16  ;;  %v839_v20 = vpop.xlane.xlu0 %838  ;;  %v798_v15 = vsel %vm88_vm1, %v770_v7, -inf  ;;  %v683_v16 = vsel %vm88_vm1, %v657_v8, -inf  ;;  %v769_v7 = vsel %vm3489_vm6, %v3892_v48, -1e+30 }
 0x38e   :  { %v861_v61 = vsel %vm3501_vm9, %v839_v20, %v804_v63  ;;  %v748_v51 = vsel %vm3521_vm10, %v724_v19, %v691_v10  ;;  %v939_v19 = vsel %vm3542_vm13, %v3866_v18, -1e+30  ;;  %v795_v4 = vsel %vm88_vm1, %v769_v7, -inf }
 0x38f   :  { %v967_v30 = vsel %vm88_vm1, %v939_v19, -inf }
 0x391   :  { %v779_v28 = vpop.xlane.xlu1 %778  ;;  %1014 = vmax.xlane.f32.xlu0 %v1013_v26  ;;  %959 = vmax.xlane.f32.xlu1 %v958_v27  ;;  %v894_v55 = vpop.xlane.xlu0 %893 }
 0x392   :  { %v916_v25 = vsel %vm3525_vm11, %v894_v55, %v861_v61  ;;  %v803_v0 = vsel %vm3489_vm6, %v779_v28, %v748_v51  ;;  %v855_v55 = vsel %vm88_vm1, %v827_v23, -inf }
 0x394   :  { %v3884_v37 = vpop.eup %2957 }
 0x395   :  { %v891_v44 = vpop.xlane.xlu1 %890  ;;  %687 = vmax.xlane.f32.xlu0 %v686_v39  ;;  %632 = vmax.xlane.f32.xlu1 %v631_v45  ;;  %v951_v32 = vpop.xlane.xlu0 %950  ;;  %v602_v39 = vsel %vm3485_vm5, %v3892_v48, -1e+30 }
 0x396   :  { %v3902_v58 = vpop.eup %2959  ;;  %2757 = vmatprep.mubr.msk.f32.mxu0 %vm88_vm1, %v3884_v37  ;;  %v973_v11 = vsel %vm3542_vm13, %v951_v32, %v916_v25  ;;  %v628_v57 = vsel %vm88_vm1, %v602_v39, -inf }
 0x397   :  { %2758 = vmatmul.mubr.msk.f32.vlgmr.msra.gmra.mxu0 %vm88_vm1, %v3902_v58 }
 0x399   :  { %v948_v62 = vpop.xlane.xlu1 %947  ;;  %744 = vmax.xlane.f32.xlu0 %v743_v41  ;;  %911 = vmax.xlane.f32.xlu1 %v910_v59  ;;  %v1006_v1 = vpop.xlane.xlu0 %1005  ;;  %v714_v59 = vsel %vm3521_vm10, %v3892_v48, -1e+30 }
 0x39a   :  { %v1028_v12 = vsel %vm3538_vm12, %v1006_v1, %v973_v11  ;;  %v826_v11 = vsel %vm3501_vm9, %v3892_v48, -1e+30 }
 0x39b   :  { %v1038_v26 = vsub.f32 %v3584_v49, %v1028_v12  ;;  %v994_v49 = vsel %vm3538_vm12, %v3866_v18, -1e+30 }
 0x39c   :  { %v1022_v54 = vsel %vm88_vm1, %v994_v49, -inf }
 0x39d   :  { %v1003_v20 = vpop.xlane.xlu1 %1002  ;;  %799 = vmax.xlane.f32.xlu0 %v798_v15  ;;  %684 = vmax.xlane.f32.xlu1 %v683_v16  ;;  %v836_v50 = vpop.xlane.xlu0 %835  ;;  %v1051_v43 = vmul.f32 1.442695, %v1038_v26  ;;  %v852_v15 = vsel %vm88_vm1, %v826_v11, -inf }
 0x39e   :  { %v860_v24 = vsel %vm3501_vm9, %v836_v50, %v803_v0  ;;  %v881_v50 = vsel %vm3525_vm11, %v3892_v48, -1e+30 }
 0x39f   :  { %v915_v27 = vsel %vm3525_vm11, %v891_v44, %v860_v24  ;;  %v3963_v44 = vpop.f32.mrf.mxu1 }
 0x3a0   :  { %v972_v28 = vsel %vm3542_vm13, %v948_v62, %v915_v27 }
 0x3a1   :  { %v1027_v34 = vsel %vm3538_vm12, %v1003_v20, %v972_v28  ;;  %v3954_v35 = vpop.xlane.xlu1 %844  ;;  %856 = vmax.xlane.f32.xlu0 %v855_v55  ;;  %968 = vmax.xlane.f32.xlu1 %v967_v30  ;;  %v621_v38 = vpop.xlane.xlu0 %620 }
 0x3a2   :  { %v1037_v45 = vsub.f32 %v3595_v33, %v1027_v34  ;;  %v2791_v61 = vpop.f32.mrf.mxu1  ;;  %v740_v33 = vsel %vm88_vm1, %v714_v59, -inf  ;;  %v639_v16 = vsel %vm3485_vm5, %v621_v38, 0.0  ;;  %v907_v38 = vsel %vm88_vm1, %v881_v50, -inf }
 0x3a3   :  { %v1343_v55 = vadd.f32 %v2791_v61, %v3824_v36 }
 0x3a4   :  { %v1049_v32 = vmul.f32 1.442695, %v1037_v45  ;;  %v1337_v8 = vpop.f32.mrf.mxu1  ;;  %v938_v45 = vsel %vm3542_vm13, %v3892_v48, -1e+30 }
 0x3a5   :  { %v900_v63 = vpop.xlane.xlu1 %899  ;;  %1023 = vmax.xlane.f32.xlu1 %v1022_v54  ;;  %629 = vmax.xlane.f32.xlu0 %v628_v57  ;;  %v676_v41 = vpop.xlane.xlu0 %675  ;;  %v1338_v51 = vadd.f32 %v3824_v36, %v1337_v8 }
 0x3a6   :  { %2961 = vpow2.f32 %v1049_v32  ;;  %v2794_v12 = vpop.f32.mrf.mxu1  ;;  %v694_v23 = vsel %vm3497_vm8, %v676_v41, %v639_v16  ;;  %v964_v41 = vsel %vm88_vm1, %v938_v45, -inf }
 0x3a7   :  { %2963 = vpow2.f32 %v1051_v43  ;;  %v1353_v32 = vadd.f32 %v2794_v12, %v3824_v36 }
 0x3a8   :  { %2965 = vtanh.f32 %v1338_v51  ;;  %v1347_v30 = vpop.f32.mrf.mxu1 }
 0x3a9   :  { %v957_v62 = vpop.xlane.xlu1 %956  ;;  %741 = vmax.xlane.f32.xlu0 %v740_v33  ;;  %v733_v1 = vpop.xlane.xlu0 %732  ;;  %2967 = vtanh.f32 %v3833_v47  ;;  %v1348_v57 = vadd.f32 %v3824_v36, %v1347_v30  ;;  %v993_v47 = vsel %vm3538_vm12, %v3892_v48, -1e+30 }
 0x3aa   :  { %v751_v26 = vsel %vm3521_vm10, %v733_v1, %v694_v23  ;;  %2969 = vtanh.f32 %v1343_v55 }
 0x3ab   :  { %2971 = vtanh.f32 %v1353_v32  ;;  %v1308_v32 = vadd.f32 %v3824_v36, %v3794_v14 }
 0x3ac   :  { %2973 = vtanh.f32 %v1348_v57  ;;  %v1318_v57 = vadd.f32 %v3824_v36, %v3816_v31 }
 0x3ad   :  { %v673_v25 = vpop.xlane.xlu1 %672  ;;  %796 = vmax.xlane.f32.xlu0 %v795_v4  ;;  %v788_v10 = vpop.xlane.xlu0 %787  ;;  %v1019_v4 = vsel %vm88_vm1, %v993_v47, -inf }
 0x3ae   :  { %v806_v34 = vsel %vm3489_vm6, %v788_v10, %v751_v26 }
 0x3af   :  { %v863_v54 = vsel %vm3501_vm9, %v3954_v35, %v806_v34 }
 0x3b0   :  { %v918_v35 = vsel %vm3525_vm11, %v900_v63, %v863_v54  ;;  %v1313_v54 = vadd.f32 %v3779_v6, %v3824_v36 }
 0x3b1   :  { %v730_v0 = vpop.xlane.xlu1 %729  ;;  %853 = vmax.xlane.f32.xlu0 %v852_v15  ;;  %v618_v20 = vpop.xlane.xlu0 %617  ;;  %v975_v10 = vsel %vm3542_vm13, %v957_v62, %v918_v35 }
 0x3b2   :  { %v638_v19 = vsel %vm3485_vm5, %v618_v20, 0.0 }
 0x3b3   :  { %v3989_v24 = vpop.eup %2961  ;;  %v693_v27 = vsel %vm3497_vm8, %v673_v25, %v638_v19 }
 0x3b4   :  { %v3995_v28 = vpop.eup %2963  ;;  %2760 = vmatprep.mubr.msk.f32.mxu0 %vm88_vm1, %v3989_v24  ;;  %v750_v43 = vsel %vm3521_vm10, %v730_v0, %v693_v27 }
 0x3b5   :  { %v785_v49 = vpop.xlane.xlu1 %784  ;;  %908 = vmax.xlane.f32.xlu0 %v907_v38  ;;  %2761 = vmatmul.mubr.msk.f32.gmra.mxu0 %vm88_vm1, %v3995_v28  ;;  %v897_v39 = vpop.xlane.xlu0 %896 }
 0x3b6   :  { %v805_v59 = vsel %vm3489_vm6, %v785_v49, %v750_v43  ;;  %v2966_v16 = vpop.eup %2965 }
 0x3b7   :  { %v2968_v62 = vpop.eup %2967 }
 0x3b8   :  { %v2970_v19 = vpop.eup %2969 }
 0x3b9   :  { %v842_v61 = vpop.xlane.xlu1 %841  ;;  %965 = vmax.xlane.f32.xlu0 %v964_v41  ;;  %v954_v33 = vpop.xlane.xlu0 %953  ;;  %v1323_v41 = vadd.f32 %v3800_v17, %v3824_v36 }
 0x3ba   :  { %v862_v1 = vsel %vm3501_vm9, %v842_v61, %v805_v59  ;;  %v2972_v34 = vpop.eup %2971  ;;  %v1328_v59 = vadd.f32 %v3824_v36, %v3963_v44 }
 0x3bb   :  { %v917_v7 = vsel %vm3525_vm11, %v897_v39, %v862_v1 }
 0x3bc   :  { %v974_v8 = vsel %vm3542_vm13, %v954_v33, %v917_v7 }
 0x3bd   :  { %v1012_v25 = vpop.xlane.xlu1 %1011  ;;  %1020 = vmax.xlane.f32.xlu0 %v1019_v4  ;;  %v1009_v11 = vpop.xlane.xlu0 %1008 }
 0x3be   :  { %v1030_v51 = vsel %vm3538_vm12, %v1012_v25, %v975_v10  ;;  %v1029_v63 = vsel %vm3538_vm12, %v1009_v11, %v974_v8 }
 0x3bf   :  { %v1040_v12 = vsub.f32 %v3654_v29, %v1030_v51  ;;  %v1039_v15 = vsub.f32 %v3681_v52, %v1029_v63  ;;  %v2974_v29 = vpop.eup %2973 }
 0x3c1   :  { %v1055_v0 = vmul.f32 1.442695, %v1040_v12  ;;  %v1053_v20 = vmul.f32 1.442695, %v1039_v15  ;;  %v1379_v50 = vpop.permute.xlu1 %1378 }
 0x3c2   :  { %v4039_v23 = vmul.f32 %v2966_v16, %v1379_v50 }
 0x3c3   :  { %2975 = vpow2.f32 %v1055_v0 }
 0x3c4   :  { %2977 = vpow2.f32 %v1053_v20 }
 0x3c5   :  { %v1384_v26 = vpop.permute.xlu1 %1383  ;;  %v1374_v27 = vpop.permute.xlu0 %1373  ;;  %2979 = vtanh.f32 %v1308_v32 }
 0x3c6   :  { %v4041_v55 = vmul.f32 %v2970_v19, %v1384_v26  ;;  %v4043_v30 = vmul.f32 %v2968_v62, %v1374_v27  ;;  %2981 = vtanh.f32 %v1313_v54 }
 0x3c7   :  { %2983 = vtanh.f32 %v1318_v57 }
 0x3c8   :  { %2985 = vtanh.f32 %v1323_v41 }
 0x3c9   :  { %v1394_v38 = vpop.permute.xlu1 %1393  ;;  %v1389_v52 = vpop.permute.xlu0 %1388  ;;  %2987 = vtanh.f32 %v1328_v59 }
 0x3ca   :  { %v4045_v49 = vmul.f32 %v2972_v34, %v1394_v38  ;;  %v4047_v39 = vmul.f32 %v2974_v29, %v1389_v52 }
 0x3d0   :  { %v4049_v45 = vpop.eup %2975 }
 0x3d1   :  { %v4051_v43 = vpop.eup %2977 }
 0x3d2   :  { %2763 = vmatprep.mubr.msk.f32.mxu0 %vm88_vm1, %v4051_v43  ;;  %v2980_v61 = vpop.eup %2979 }
 0x3d3   :  { %2764 = vmatmul.mubr.msk.f32.gmra.mxu0 %vm88_vm1, %v4049_v45  ;;  %v1396_v33 = vmul.f32 %v2980_v61, %v1374_v27  ;;  %v2982_v14 = vpop.eup %2981 }
 0x3d4   :  { %v1397_v47 = vmul.f32 %v2982_v14, %v1379_v50  ;;  %v2984_v6 = vpop.eup %2983 }
 0x3d5   :  { %v1398_v1 = vmul.f32 %v2984_v6, %v1384_v26  ;;  %v2986_v35 = vpop.eup %2985 }
 0x3d6   :  { %v1399_v31 = vmul.f32 %v2986_v35, %v1389_v52  ;;  %v2988_v7 = vpop.eup %2987 }
 0x3d7   :  { %v1400_v17 = vmul.f32 %v2988_v7, %v1394_v38 }
 0x3ea   :  { %1410 = vxpose.xlu0.b32.start [1/5] (short) (narrow) %v1396_v33, 32 }
 0x3ee   :  { %1411 = vxpose.xlu0.b32.cont [2/5] (short) (narrow) %v1397_v47, 32 }
 0x3f2   :  { %1412 = vxpose.xlu0.b32.cont [3/5] (short) (narrow) %v1398_v1, 32 }
 0x3f6   :  { %1413 = vxpose.xlu0.b32.cont [4/5] (short) (narrow) %v1399_v31, 32 }
 0x3fa   :  { %1414 = vxpose.xlu0.b32.end [5/5] (short) (narrow) %v1400_v17, 32 }
 0x3fe   :  { %v682_v8 = vpop.xlane.xlu1 %681  ;;  %v627_v4 = vpop.xlane.xlu0 %626 }
 0x3ff   :  { %v641_v11 = vsel %vm3485_vm5, %v627_v4, 0.0 }
 0x400   :  { %v696_v12 = vsel %vm3497_vm8, %v682_v8, %v641_v11 }
 0x402   :  { %v794_v25 = vpop.xlane.xlu1 %793  ;;  %v739_v36 = vpop.xlane.xlu0 %738 }
 0x403   :  { %v753_v15 = vsel %vm3521_vm10, %v739_v36, %v696_v12 }
 0x404   :  { %v808_v20 = vsel %vm3489_vm6, %v794_v25, %v753_v15 }
 0x406   :  { %v851_v44 = vpop.xlane.xlu1 %850  ;;  %v906_v10 = vpop.xlane.xlu0 %905 }
 0x407   :  { %v865_v50 = vsel %vm3501_vm9, %v851_v44, %v808_v20 }
 0x408   :  { %v920_v27 = vsel %vm3525_vm11, %v906_v10, %v865_v50 }
 0x40a   :  { %v624_v51 = vpop.xlane.xlu1 %623  ;;  %v963_v63 = vpop.xlane.xlu0 %962 }
 0x40b   :  { %v640_v26 = vsel %vm3485_vm5, %v624_v51, 0.0  ;;  %v977_v29 = vsel %vm3542_vm13, %v963_v63, %v920_v27  ;;  %v3054_v63 = vmov 0.0  }
 0x40c   :  { %89 = vst.msk [vmem:[#allocation2] sm:$0xff] %vm88_vm1, %v3054_v63  ;;  %90 = vst.msk [vmem:[#allocation2 + $0x8] sm:$0xff] %vm88_vm1, %v3054_v63 }
 0x40d   :  { %91 = vst.msk [vmem:[#allocation2 + $0x10] sm:$0xff] %vm88_vm1, %v3054_v63  ;;  %92 = vst.msk [vmem:[#allocation2 + $0x18] sm:$0xff] %vm88_vm1, %v3054_v63 }
 0x40e   :  { %v679_v16 = vpop.xlane.xlu1 %678  ;;  %v1018_v0 = vpop.xlane.xlu0 %1017  ;;  %93 = vst.msk [vmem:[#allocation2 + $0x20] sm:$0xff] %vm88_vm1, %v3054_v63  ;;  %94 = vst.msk [vmem:[#allocation2 + $0x28] sm:$0xff] %vm88_vm1, %v3054_v63 }
 0x40f   :  { %v695_v34 = vsel %vm3497_vm8, %v679_v16, %v640_v26  ;;  %v1032_v54 = vsel %vm3538_vm12, %v1018_v0, %v977_v29  ;;  %95 = vst.msk [vmem:[#allocation2 + $0x30] sm:$0xff] %vm88_vm1, %v3054_v63  ;;  %96 = vst.msk [vmem:[#allocation2 + $0x38] sm:$0xff] %vm88_vm1, %v3054_v63 }
 0x410   :  { %v1042_v61 = vsub.f32 %v3755_v46, %v1032_v54 }
 0x412   :  { %v848_v62 = vpop.xlane.xlu1 %847  ;;  %v736_v19 = vpop.xlane.xlu0 %735  ;;  %v1059_v35 = vmul.f32 1.442695, %v1042_v61 }
 0x413   :  { %v752_v38 = vsel %vm3521_vm10, %v736_v19, %v695_v34 }
 0x416   :  { %v903_v52 = vpop.xlane.xlu1 %902  ;;  %v791_v32 = vpop.xlane.xlu0 %790 }
 0x417   :  { %v807_v57 = vsel %vm3489_vm6, %v791_v32, %v752_v38 }
 0x418   :  { %v864_v41 = vsel %vm3501_vm9, %v848_v62, %v807_v57 }
 0x419   :  { %v919_v59 = vsel %vm3525_vm11, %v903_v52, %v864_v41 }
 0x41a   :  { %v960_v33 = vpop.xlane.xlu1 %959  ;;  %v1015_v14 = vpop.xlane.xlu0 %1014 }
 0x41b   :  { %v976_v47 = vsel %vm3542_vm13, %v960_v33, %v919_v59 }
 0x41c   :  { %v1031_v6 = vsel %vm3538_vm12, %v1015_v14, %v976_v47 }
 0x41d   :  { %v1041_v1 = vsub.f32 %v3784_v9, %v1031_v6 }
 0x41e   :  { %v688_v31 = vpop.xlane.xlu0 %687  ;;  %v633_v4 = vpop.xlane.xlu1 %632 }
 0x41f   :  { %v1057_v7 = vmul.f32 1.442695, %v1041_v1  ;;  %v643_v11 = vsel %vm3485_vm5, %v633_v4, 0.0 }
 0x420   :  { %v698_v12 = vsel %vm3497_vm8, %v688_v31, %v643_v11 }
 0x421   :  { %2989 = vpow2.f32 %v1057_v7 }
 0x422   :  { %2991 = vpow2.f32 %v1059_v35  ;;  %v745_v17 = vpop.xlane.xlu0 %744  ;;  %v912_v46 = vpop.xlane.xlu1 %911 }
 0x423   :  { %v755_v16 = vsel %vm3521_vm10, %v745_v17, %v698_v12 }
 0x426   :  { %v800_v8 = vpop.xlane.xlu0 %799  ;;  %v685_v51 = vpop.xlane.xlu1 %684 }
 0x427   :  { %v810_v0 = vsel %vm3489_vm6, %v800_v8, %v755_v16 }
 0x42a   :  { %v857_v25 = vpop.xlane.xlu0 %856  ;;  %v969_v20 = vpop.xlane.xlu1 %968 }
 0x42b   :  { %v867_v50 = vsel %vm3501_vm9, %v857_v25, %v810_v0 }
 0x42c   :  { %v922_v19 = vsel %vm3525_vm11, %v912_v46, %v867_v50 }
 0x42d   :  { %v979_v29 = vsel %vm3542_vm13, %v969_v20, %v922_v19  ;;  %v4200_v19 = vld [vmem:[%s4542_s1 + $0x10] sm:$0xff] }
 0x42e   :  { %v4101_v36 = vpop.eup %2989  ;;  %v630_v44 = vpop.xlane.xlu0 %629 }
 0x42f   :  { %v4103_v10 = vpop.eup %2991  ;;  %2766 = vmatprep.mubr.msk.f32.mxu0 %vm88_vm1, %v4101_v36  ;;  %v642_v26 = vsel %vm3485_vm5, %v630_v44, 0.0  ;;  %v1024_v34 = vpop.xlane.xlu1 %1023 }
 0x430   :  { %2767 = vmatmul.mubr.msk.f32.gmra.mxu0 %vm88_vm1, %v4103_v10  ;;  %v697_v38 = vsel %vm3497_vm8, %v685_v51, %v642_v26  ;;  %v1034_v52 = vsel %vm3538_vm12, %v1024_v34, %v979_v29  ;;  %v4207_v26 = vld [vmem:[%s4542_s1 + $0x8] sm:$0xff] }
 0x431   :  { %v1044_v59 = vsub.f32 %v3866_v18, %v1034_v52 }
 0x432   :  { %v742_v9 = vpop.xlane.xlu0 %741 }
 0x433   :  { %v754_v32 = vsel %vm3521_vm10, %v742_v9, %v697_v38  ;;  %v1063_v1 = vmul.f32 1.442695, %v1044_v59 }
 0x436   :  { %v797_v15 = vpop.xlane.xlu0 %796 }
 0x437   :  { %v809_v57 = vsel %vm3489_vm6, %v797_v15, %v754_v32 }
 0x43a   :  { %v854_v62 = vpop.xlane.xlu0 %853 }
 0x43b   :  { %v866_v41 = vsel %vm3501_vm9, %v854_v62, %v809_v57 }
 0x43e   :  { %v909_v27 = vpop.xlane.xlu0 %908 }
 0x43f   :  { %v921_v61 = vsel %vm3525_vm11, %v909_v27, %v866_v41  ;;  %v4214_v27 = vld [vmem:[%s4542_s1] sm:$0xff] }
 0x442   :  { %v966_v54 = vpop.xlane.xlu0 %965 }
 0x443   :  { %v978_v33 = vsel %vm3542_vm13, %v966_v54, %v921_v61 }
 0x446   :  { %v1021_v14 = vpop.xlane.xlu0 %1020 }
 0x447   :  { %v1033_v47 = vsel %vm3538_vm12, %v1021_v14, %v978_v33 }
 0x448   :  { %v1043_v6 = vsub.f32 %v3892_v48, %v1033_v47 }
 0x44a   :  { %v1061_v35 = vmul.f32 1.442695, %v1043_v6 }
 0x44c   :  { %2993 = vpow2.f32 %v1061_v35 }
 0x44d   :  { %2995 = vpow2.f32 %v1063_v1  ;;  %v1407_v1 = vld [vmem:[#allocation2 + $0x8] sm:$0xff] }
 0x457   :  { %v2759_v17 = vpop.f32.mrf.mxu0 }
 0x459   :  { %v4159_v31 = vpop.eup %2993  ;;  %v1161_v48 = vpop.f32.mrf.mxu0 }
 0x45a   :  { %v4161_v7 = vpop.eup %2995  ;;  %2769 = vmatprep.mubr.msk.f32.mxu0 %vm88_vm1, %v4159_v31 }
 0x45b   :  { %2770 = vmatmul.mubr.msk.f32.gmra.mxu0 %vm88_vm1, %v4161_v7 }
 0x466   :  { %v1426_v18 = vpop.trf.xlu0 }
 0x467   :  { %2805 = vmatprep.mubr.msk.f32.mxu0 %vm1442_vm14, %v1426_v18 }
 0x46a   :  { %v1427_v12 = vpop.trf.xlu0 }
 0x46e   :  { %v1428_v62 = vpop.trf.xlu0 }
 0x475   :  { %v2762_v8 = vpop.f32.mrf.mxu0 }
 0x476   :  { %2997 = vrcp.f32 %v2762_v8 }
 0x477   :  { %v1171_v4 = vpop.f32.mrf.mxu0 }
 0x483   :  { %v2998_v44 = vpop.eup %2997 }
 0x484   :  { %v1223_v15 = vmul.f32 %v2998_v44, %v3995_v28  ;;  %v1694_v28 = vld [vmem:[%s4501_s12] sm:$0xf] }
 0x493   :  { %v4168_v25 = vpop.f32.mrf.mxu0 }
 0x495   :  { %v1181_v46 = vpop.f32.mrf.mxu0 }
 0x496   :  { %2999 = vrcp.f32 %v1181_v46 }
 0x497   :  { %3001 = vrcp.f32 %v1171_v4  ;;  %v2579_v4 = vld [vmem:[%s4502_s13] ss:$0 sm:$0xff] }
 0x498   :  { %3003 = vrcp.f32 %v2759_v17 }
 0x499   :  { %3005 = vrcp.f32 %v1161_v48 }
 0x4a3   :  { %v3000_v9 = vpop.eup %2999 }
 0x4a4   :  { %v1224_v11 = vmul.f32 %v3000_v9, %v4051_v43  ;;  %v3002_v51 = vpop.eup %3001 }
 0x4a5   :  { %v3004_v16 = vpop.eup %3003  ;;  %v1222_v0 = vmul.f32 %v3002_v51, %v3989_v24  ;;  %v4191_v24 = vld [vmem:[%s4542_s1 + $0x18] sm:$0xff] }
 0x4a6   :  { %2795 = vmatprep.subr.mxu0 %v1224_v11  ;;  %v3006_v20 = vpop.eup %3005  ;;  %v1221_v50 = vmul.f32 %v3004_v16, %v3902_v58  ;;  %v1429_v58 = vpop.trf.xlu0 }
 0x4a7   :  { %2796 = vmatpush3.msra.mxu0 %v1224_v11  ;;  %v1220_v43 = vmul.f32 %v3006_v20, %v3884_v37  ;;  %v1693_v37 = vld [vmem:[%s4561_s8] sm:$0x3] }
 0x4a8   :  { %2797 = vmatprep.subr.mxu0 %v1223_v15 }
 0x4a9   :  { %2798 = vmatpush3.msra.mxu0 %v1223_v15 }
 0x4aa   :  { %2799 = vmatprep.subr.mxu0 %v1222_v0 }
 0x4ab   :  { %2800 = vmatpush3.msra.mxu0 %v1222_v0 }
 0x4ac   :  { %2801 = vmatprep.subr.mxu0 %v1221_v50 }
 0x4ad   :  { %2802 = vmatpush3.msra.mxu0 %v1221_v50 }
 0x4ae   :  { %2803 = vmatprep.subr.mxu0 %v1220_v43 }
 0x4af   :  { %2804 = vmatpush3.msra.mxu0 %v1220_v43 }
 0x4b0   :  { %2806 = vmatmul.mubr.msk.f32.vlgmr.msra.gmra.mxu0 %vm1442_vm14, %v1427_v12  ;;  %2827 = vmatprep.subr.mxu0 %v3054_v63 }
 0x4b1   :  { %2808 = vmatprep.mubr.msk.f32.mxu0 %vm1442_vm14, %v1428_v62  ;;  %2828 = vmatpush3.msk.msra.mxu0 %vm1706_vm15, %v1694_v28  ;;  %v1799_v28 = vld [vmem:[%s4503_s14 + $0x18] sm:$0xff] }
 0x4b2   :  { %2843 = vmatprep.subr.mxu0 %v3054_v63 }
 0x4b4   :  { %2809 = vmatmul.mubr.msk.f32.gmra.mxu0 %vm1442_vm14, %v1429_v58 }
 0x4b5   :  { %2829 = vmatprep.mubr.msk.f32.mxu0 %vm3055_vm0, %v3054_v63 }
 0x4b8   :  { %2830 = vmatmul.mubr.msk.f32.vlgmr.msra.gmra.mxu0 %vm1702_vm2, %v1693_v37  ;;  %v1796_v37 = vld [vmem:[%s4503_s14] sm:$0xff] }
 0x4b9   :  { %2844 = vmatpush3.msra.mxu0 %v4191_v24  ;;  %2851 = vmatprep.mubr.msk.f32.mxu0 %vm3055_vm0, %v3054_v63 }
 0x4ba   :  { %2845 = vmatprep.subr.mxu0 %v3054_v63 }
 0x4bb   :  { %2846 = vmatpush3.msra.mxu0 %v4200_v19 }
 0x4bc   :  { %2847 = vmatprep.subr.mxu0 %v3054_v63 }
 0x4bd   :  { %2848 = vmatpush3.msra.mxu0 %v4207_v26 }
 0x4be   :  { %2849 = vmatprep.subr.mxu0 %v3054_v63 }
 0x4bf   :  { %2850 = vmatpush3.msra.mxu0 %v4214_v27 }
 0x4c0   :  { %2865 = vmatprep.subr.mxu0 %v3054_v63 }
 0x4f0   :  { %v2768_v34 = vpop.f32.mrf.mxu0 }
 0x4f2   :  { %v1191_v29 = vpop.f32.mrf.mxu0 }
 0x51b   :  { %v2771_v38 = vpop.f32.mrf.mxu0 }
 0x51c   :  { %3007 = vrcp.f32 %v2771_v38 }
 0x51d   :  { %3009 = vrcp.f32 %v2768_v34  ;;  %v1201_v52 = vpop.f32.mrf.mxu0  ;;  %v3029_v34 = vld [vmem:[%s4539_s29] ss:$0 sm:$0xff] }
 0x51e   :  { %3011 = vrcp.f32 %v1201_v52  ;;  %v3030_v52 = vld [vmem:[%s4540_s30] ss:$0 sm:$0xff] }
 0x51f   :  { %3013 = vrcp.f32 %v1191_v29 }
 0x520   :  { %3015 = vrcp.f32 %v4168_v25 }
 0x529   :  { %v3008_v32 = vpop.eup %3007 }
 0x52a   :  { %v3010_v54 = vpop.eup %3009  ;;  %v1229_v57 = vmul.f32 %v3008_v32, %v4161_v7 }
 0x52b   :  { %v3012_v41 = vpop.eup %3011  ;;  %v1227_v33 = vmul.f32 %v3010_v54, %v4103_v10  ;;  %v1409_v10 = vld [vmem:[#allocation2 + $0x18] sm:$0xff]  ;;  %v1550_v54 = vld [vmem:[#allocation2 + $0x28] sm:$0xff] }
 0x52c   :  { %2811 = vmatprep.subr.mxu1 %v1229_v57  ;;  %v1228_v59 = vmul.f32 %v3012_v41, %v4159_v31  ;;  %v3014_v61 = vpop.eup %3013  ;;  %v1406_v31 = vld [vmem:[#allocation2] sm:$0xff] }
 0x52d   :  { %2812 = vmatpush3.msra.mxu1 %v1229_v57  ;;  %v3016_v14 = vpop.eup %3015  ;;  %v1226_v47 = vmul.f32 %v3014_v61, %v4101_v36  ;;  %v1408_v36 = vld [vmem:[#allocation2 + $0x10] sm:$0xff]  ;;  %v1549_v41 = vld [vmem:[#allocation2 + $0x20] sm:$0xff] }
 0x52e   :  { %2813 = vmatprep.subr.mxu1 %v1228_v59  ;;  %v1225_v6 = vmul.f32 %v3016_v14, %v4049_v45  ;;  %v1552_v14 = vld [vmem:[#allocation2 + $0x38] sm:$0xff] }
 0x52f   :  { %2814 = vmatpush3.msra.mxu1 %v1228_v59 }
 0x530   :  { %2815 = vmatprep.subr.mxu1 %v1227_v33 }
 0x531   :  { %2816 = vmatpush3.msra.mxu1 %v1227_v33 }
 0x532   :  { %2817 = vmatprep.subr.mxu1 %v1226_v47 }
 0x533   :  { %2818 = vmatpush3.msra.mxu1 %v1226_v47 }
 0x534   :  { %2819 = vmatprep.subr.mxu1 %v1225_v6 }
 0x535   :  { %2820 = vmatpush3.msra.mxu1 %v1225_v6  ;;  %v1551_v6 = vld [vmem:[#allocation2 + $0x30] sm:$0xff] }
 0x536   :  { %2832 = vmatprep.subr.mxu1 %v3054_v63 }
 0x570   :  { %v2807_v35 = vpop.f32.mrf.mxu0 }
 0x571   :  { %v1541_v7 = vadd.f32 %v2807_v35, %v1407_v1 }
 0x572   :  { %v1521_v18 = vpop.f32.mrf.mxu0 }
 0x573   :  { %1545 = vst.msk [vmem:[#allocation2 + $0x8] sm:$0xff] %vm88_vm1, %v1541_v7  ;;  %v1540_v17 = vadd.f32 %v1521_v18, %v1406_v31  ;;  %v2582_v31 = vld [vmem:[%s4504_s15] ss:$0 sm:$0xff] }
 0x574   :  { %v2810_v48 = vpop.f32.mrf.mxu0 }
 0x575   :  { %1544 = vst.msk [vmem:[#allocation2] sm:$0xff] %vm88_vm1, %v1540_v17  ;;  %v1543_v8 = vadd.f32 %v2810_v48, %v1409_v10 }
 0x576   :  { %v1531_v45 = vpop.f32.mrf.mxu0 }
 0x577   :  { %1547 = vst.msk [vmem:[#allocation2 + $0x18] sm:$0xff] %vm88_vm1, %v1543_v8  ;;  %v1542_v25 = vadd.f32 %v1531_v45, %v1408_v36 }
 0x578   :  { %v1776_v46 = vpop.f32.mrf.mxu0 }
 0x579   :  { %1546 = vst.msk [vmem:[#allocation2 + $0x10] sm:$0xff] %vm88_vm1, %v1542_v25  ;;  %v1777_v44 = vadd.f32 %v2579_v4, %v1776_v46 }
 0x57a   :  { %v2831_v9 = vpop.f32.mrf.mxu0 }
 0x57b   :  { %v1781_v11 = vsel %vm1780_vm3, %v1777_v44, 0.0 }
 0x57c   :  { %1782 = vadd.xlane.f32.xlu1 %v1781_v11 }
 0x605   :  { %v1783_v51 = vpop.xlane.xlu1 %1782 }
 0x606   :  { %v1784_v12 = vmul.f32 0.03125, %v1783_v51 }
 0x608   :  { %v1785_v15 = vsub.f32 %v1777_v44, %v1784_v12 }
 0x60a   :  { %v1786_v16 = vmul.f32 %v1785_v15, %v1785_v15 }
 0x60c   :  { %v1787_v0 = vsel %vm1780_vm3, %v1786_v16, 0.0 }
 0x60d   :  { %1788 = vadd.xlane.f32.xlu1 %v1787_v0 }
 0x640   :  { %1553 = vxpose.xlu1.b32.start [1/5] (short) (narrow) %v4043_v30, 32 }
 0x644   :  { %1554 = vxpose.xlu1.b32.cont [2/5] (short) (narrow) %v4039_v23, 32  ;;  %v1798_v23 = vld [vmem:[%s4503_s14 + $0x10] sm:$0xff] }
 0x648   :  { %1555 = vxpose.xlu1.b32.cont [3/5] (short) (narrow) %v4041_v55, 32 }
 0x64c   :  { %1556 = vxpose.xlu1.b32.cont [4/5] (short) (narrow) %v4047_v39, 32 }
 0x650   :  { %1557 = vxpose.xlu1.b32.end [5/5] (short) (narrow) %v4045_v49, 32  ;;  %v1797_v49 = vld [vmem:[%s4503_s14 + $0x8] sm:$0xff] }
 0x696   :  { %v1789_v20 = vpop.xlane.xlu1 %1788 }
 0x697   :  { %v1790_v50 = vmul.f32 0.03125, %v1789_v20 }
 0x699   :  { %v1791_v62 = vadd.f32 1e-05, %v1790_v50 }
 0x69b   :  { %3017 = vrsqrt.f32 %v1791_v62 }
 0x6a8   :  { %v3018_v30 = vpop.eup %3017 }
 0x6a9   :  { %v1793_v55 = vmul.f32 %v3018_v30, %v1785_v15 }
 0x6ab   :  { %v1794_v29 = vmul.f32 %v3029_v34, %v1793_v55 }
 0x6ad   :  { %v1795_v32 = vadd.f32 %v3030_v52, %v1794_v29 }
 0x6bc   :  { %v1569_v43 = vpop.trf.xlu1 }
 0x6bd   :  { %2821 = vmatprep.mubr.msk.f32.mxu1 %vm1442_vm14, %v1569_v43 }
 0x6c0   :  { %v1570_v58 = vpop.trf.xlu1 }
 0x6c1   :  { %2822 = vmatmul.mubr.msk.f32.vlgmr.msra.gmra.mxu1 %vm1442_vm14, %v1570_v58 }
 0x6c2   :  { %2833 = vmatpush3.msra.mxu1 %v1799_v28 }
 0x6c3   :  { %2834 = vmatprep.subr.mxu1 %v3054_v63 }
 0x6c4   :  { %v1571_v39 = vpop.trf.xlu1  ;;  %2835 = vmatpush3.msra.mxu1 %v1798_v23 }
 0x6c5   :  { %2824 = vmatprep.mubr.msk.f32.mxu1 %vm1442_vm14, %v1571_v39  ;;  %2836 = vmatprep.subr.mxu1 %v3054_v63 }
 0x6c6   :  { %2837 = vmatpush3.msra.mxu1 %v1797_v49 }
 0x6c7   :  { %2838 = vmatprep.subr.mxu1 %v3054_v63 }
 0x6c8   :  { %v1572_v38 = vpop.trf.xlu1  ;;  %2839 = vmatpush3.msra.mxu1 %v1796_v37 }
 0x6c9   :  { %2825 = vmatmul.mubr.msk.f32.gmra.mxu1 %vm1442_vm14, %v1572_v38  ;;  %2854 = vmatprep.subr.mxu1 %v3054_v63 }
 0x6ca   :  { %2840 = vmatprep.mubr.msk.f32.mxu1 %vm3055_vm0, %v3054_v63 }
 0x6cd   :  { %2841 = vmatmul.mubr.msk.f32.vlgmr.msra.gmra.mxu1 %vm88_vm1, %v1795_v32  ;;  %v3056_v32 = vmov 1966171168  }
 0x6ce   :  { %2862 = vmatprep.mubr.msk.f32.mxu1 %vm3055_vm0, %v3054_v63 }
 0x781   :  { %v2823_v57 = vpop.f32.mrf.mxu1 }
 0x782   :  { %v1683_v59 = vadd.f32 %v2823_v57, %v1550_v54  ;;  %v2016_v54 = vunpack.c.l.s4 %v3056_v32 }
 0x783   :  { %v1663_v61 = vpop.f32.mrf.mxu1 }
 0x784   :  { %1687 = vst.msk [vmem:[#allocation2 + $0x28] sm:$0xff] %vm88_vm1, %v1683_v59  ;;  %v1682_v33 = vadd.f32 %v1663_v61, %v1549_v41  ;;  %v2017_v57 = vunpack.c.0.s8 %v2016_v54  ;;  %v1999_v61 = vld [vmem:[#allocation2 + $0x8] sm:$0xff] }
 0x786   :  { %1686 = vst.msk [vmem:[#allocation2 + $0x20] sm:$0xff] %vm88_vm1, %v1682_v33  ;;  %v2020_v22 = vsub.s32 %v2017_v57, %v3465_v53  ;;  %v1998_v33 = vld [vmem:[#allocation2] sm:$0xff] }
 0x789   :  { %v2826_v47 = vpop.f32.mrf.mxu1 }
 0x78a   :  { %v1685_v1 = vadd.f32 %v2826_v47, %v1552_v14 }
 0x78b   :  { %v1673_v35 = vpop.f32.mrf.mxu1 }
 0x78c   :  { %1689 = vst.msk [vmem:[#allocation2 + $0x38] sm:$0xff] %vm88_vm1, %v1685_v1  ;;  %v1684_v7 = vadd.f32 %v1673_v35, %v1551_v6  ;;  %v2000_v6 = vld [vmem:[#allocation2 + $0x10] sm:$0xff]  ;;  %v2003_v1 = vld [vmem:[#allocation2 + $0x28] sm:$0xff]  ;;  %v2007_v35 = vmul.f32 %v4207_v26, %v1999_v61 }
 0x78d   :  { %v1876_v18 = vpop.f32.mrf.mxu1 }
 0x78e   :  { %1688 = vst.msk [vmem:[#allocation2 + $0x30] sm:$0xff] %vm88_vm1, %v1684_v7  ;;  %v1877_v10 = vadd.f32 %v2582_v31, %v1876_v18  ;;  %v2006_v7 = vmul.f32 %v4214_v27, %v1998_v33 }
 0x78f   :  { %v2842_v17 = vpop.f32.mrf.mxu1 }
 0x790   :  { %v1885_v48 = vsel %vm3497_vm8, %v1877_v10, -1e+30  ;;  %v1880_v36 = vsel %vm3485_vm5, %v1877_v10, -1e+30  ;;  %v1905_v4 = vsel %vm3525_vm11, %v1877_v10, -1e+30 }
 0x791   :  { %v1886_v8 = vsel %vm1780_vm3, %v1885_v48, -inf  ;;  %v1881_v45 = vsel %vm1780_vm3, %v1880_v36, -inf  ;;  %v1890_v25 = vsel %vm3521_vm10, %v1877_v10, -1e+30  ;;  %v1906_v46 = vsel %vm1780_vm3, %v1905_v4, -inf  ;;  %v2002_v4 = vld [vmem:[#allocation2 + $0x20] sm:$0xff] }
 0x792   :  { %1887 = vmax.xlane.f32.xlu1 %v1886_v8  ;;  %1882 = vmax.xlane.f32.xlu0 %v1881_v45  ;;  %v1891_v44 = vsel %vm1780_vm3, %v1890_v25, -inf  ;;  %v1915_v9 = vsel %vm3538_vm12, %v1877_v10, -1e+30  ;;  %v1895_v11 = vsel %vm3489_vm6, %v1877_v10, -1e+30  ;;  %v2011_v36 = vmul.f32 %v4207_v26, %v2003_v1 }
 0x793   :  { %v1916_v51 = vsel %vm1780_vm3, %v1915_v9, -inf  ;;  %v1896_v12 = vsel %vm1780_vm3, %v1895_v11, -inf  ;;  %v1900_v15 = vsel %vm3501_vm9, %v1877_v10, -1e+30  ;;  %v1910_v0 = vsel %vm3542_vm13, %v1877_v10, -1e+30 }
 0x794   :  { %v1901_v16 = vsel %vm1780_vm3, %v1900_v15, -inf  ;;  %v1911_v20 = vsel %vm1780_vm3, %v1910_v0, -inf  ;;  %v2001_v15 = vld [vmem:[#allocation2 + $0x18] sm:$0xff] }
 0x795   :  { %v2004_v45 = vld [vmem:[#allocation2 + $0x30] sm:$0xff] }
 0x796   :  { %1907 = vmax.xlane.f32.xlu1 %v1906_v46  ;;  %1892 = vmax.xlane.f32.xlu0 %v1891_v44  ;;  %v2012_v11 = vmul.f32 %v4200_v19, %v2004_v45 }
 0x79a   :  { %1917 = vmax.xlane.f32.xlu1 %v1916_v51  ;;  %1897 = vmax.xlane.f32.xlu0 %v1896_v12  ;;  %v2010_v51 = vmul.f32 %v4214_v27, %v2002_v4  ;;  %v2005_v12 = vld [vmem:[#allocation2 + $0x38] sm:$0xff] }
 0x79e   :  { %1902 = vmax.xlane.f32.xlu0 %v1901_v16 }
 0x7a2   :  { %1912 = vmax.xlane.f32.xlu0 %v1911_v20  ;;  %v2013_v20 = vmul.f32 %v4191_v24, %v2005_v12  ;;  %v2347_v12 = vld [vmem:[%s4511_s22 + $0x78] sm:$0xff] }
 0x81b   :  { %v1883_v50 = vpop.xlane.xlu0 %1882  ;;  %v1888_v43 = vpop.xlane.xlu1 %1887 }
 0x81c   :  { %v1884_v28 = vsel %vm3485_vm5, %v1883_v50, 0.0  ;;  %v2009_v50 = vmul.f32 %v4191_v24, %v2001_v15  ;;  %v2081_v24 = vld [vmem:[%s4505_s16 + $0x10] sm:$0xff]  ;;  %vm2116_vm5 = vcmask 195712  }
 0x81d   :  { %v1889_v58 = vsel %vm3497_vm8, %v1888_v43, %v1884_v28  ;;  %v2346_v15 = vld [vmem:[%s4511_s22 + $0x70] sm:$0xff]  ;;  %vm2510_vm8 = vcmask 58368  }
 0x81f   :  { %v1893_v62 = vpop.xlane.xlu0 %1892  ;;  %v1908_v23 = vpop.xlane.xlu1 %1907 }
 0x820   :  { %v1894_v55 = vsel %vm3521_vm10, %v1893_v62, %v1889_v58  ;;  %v2082_v58 = vld [vmem:[%s4505_s16 + $0x18] sm:$0xff] }
 0x821   :  { %2855 = vmatpush3.msra.mxu1 %v2082_v58 }
 0x822   :  { %2856 = vmatprep.subr.mxu1 %v3054_v63 }
 0x823   :  { %v1898_v30 = vpop.xlane.xlu0 %1897  ;;  %v1918_v29 = vpop.xlane.xlu1 %1917  ;;  %2857 = vmatpush3.msra.mxu1 %v2081_v24 }
 0x824   :  { %v1899_v49 = vsel %vm3489_vm6, %v1898_v30, %v1894_v55  ;;  %2858 = vmatprep.subr.mxu1 %v3054_v63  ;;  %v2079_v55 = vld [vmem:[%s4505_s16] sm:$0xff]  ;;  %vm2123_vm6 = vcmask 261312  }
 0x827   :  { %v1903_v39 = vpop.xlane.xlu0 %1902 }
 0x828   :  { %v1904_v37 = vsel %vm3501_vm9, %v1903_v39, %v1899_v49  ;;  %v2099_v49 = vand.u32 127, %v589_v42 }
 0x829   :  { %v1909_v34 = vsel %vm3525_vm11, %v1908_v23, %v1904_v37  ;;  %v2080_v23 = vld [vmem:[%s4505_s16 + $0x8] sm:$0xff]  ;;  %s4562_s16 = sld [smem:[#allocation17_spill]] }
 0x82a   :  { %2859 = vmatpush3.msra.mxu1 %v2080_v23 }
 0x82b   :  { %v1913_v2 = vpop.xlane.xlu0 %1912  ;;  %2860 = vmatprep.subr.mxu1 %v3054_v63 }
 0x82c   :  { %v1914_v5 = vsel %vm3542_vm13, %v1913_v2, %v1909_v34  ;;  %2861 = vmatpush3.msra.mxu1 %v2079_v55  ;;  %v2104_v34 = vadd.s32 4294967288, %v2099_v49  ;;  %v2111_v2 = vadd.s32 4294967280, %v2099_v49  ;;  %v2587_v55 = vld [vmem:[%s4507_s18] ss:$0 sm:$0xff] }
 0x82d   :  { %v1919_v38 = vsel %vm3538_vm12, %v1918_v29, %v1914_v5  ;;  %2876 = vmatprep.subr.mxu1 %v3054_v63 }
 0x82e   :  { %v1920_v60 = vsub.f32 %v1877_v10, %v1919_v38  ;;  %v2008_v10 = vmul.f32 %v4200_v19, %v2000_v6  ;;  %v2118_v38 = vadd.s32 4294967272, %v2099_v49 }
 0x830   :  { %v1921_v52 = vmul.f32 1.442695, %v1920_v60  ;;  %v2107_v60 = vsub.s32 %v2104_v34, %v3465_v53  ;;  %v2121_v32 = vsub.s32 %v2118_v38, %v3465_v53  ;;  %v2429_v38 = vld [vmem:[%s4513_s24 + $0x18] sm:$0xff] }
 0x832   :  { %3019 = vpow2.f32 %v1921_v52  ;;  %v2102_v52 = vsub.s32 %v2099_v49, %v3465_v53 }
 0x83f   :  { %v3020_v3 = vpop.eup %3019 }
 0x840   :  { %2852 = vmatmul.mubr.msk.f32.vlgmr.msra.gmra.mxu0 %vm88_vm1, %v3020_v3 }
 0x841   :  { %2873 = vmatprep.mubr.msk.f32.mxu0 %vm3055_vm0, %v3054_v63 }
 0x900   :  { %v1992_v40 = vpop.f32.mrf.mxu0 }
 0x901   :  { %3021 = vrcp.f32 %v1992_v40 }
 0x902   :  { %v2853_v13 = vpop.f32.mrf.mxu0 }
 0x90e   :  { %v3022_v41 = vpop.eup %3021 }
 0x90f   :  { %v1997_v21 = vmul.f32 %v3022_v41, %v3020_v3  ;;  %v2114_v3 = vsub.s32 %v2111_v2, %v3465_v53  ;;  %v2334_v2 = vld [vmem:[%s4511_s22 + $0x10] sm:$0xff] }
 0x911   :  { %v2021_v59 = vrot.slane %v1997_v21, %v2020_v22 }
 0x913   :  { %v2029_v14 = vrot.slane %v2021_v59, %v2020_v22  ;;  %v2022_v47 = vcombine.high %v2021_v59, %v2021_v59 }
 0x915   :  { %v2040_v31 = vrot.slane %v2029_v14, %v3471_v56  ;;  %v2036_v18 = vrot.slane %v2022_v47, %v2020_v22 }
 0x917   :  { %v2048_v17 = vmul.f32 %v2040_v31, %v2007_v35  ;;  %v2047_v48 = vmul.f32 %v2040_v31, %v2006_v7  ;;  %v2044_v8 = vrot.slane %v2036_v18, %v3471_v56  ;;  %v2049_v9 = vmul.f32 %v2040_v31, %v2008_v10  ;;  %v2585_v18 = vld [vmem:[%s4506_s17] ss:$0 sm:$0xff] }
 0x918   :  { %v2050_v27 = vmul.f32 %v2040_v31, %v2009_v50  ;;  %v2340_v50 = vld [vmem:[%s4511_s22 + $0x40] sm:$0xff] }
 0x919   :  { %v2058_v25 = vsel %vm88_vm1, %v2048_v17, 0.0  ;;  %v2055_v46 = vsel %vm88_vm1, %v2047_v48, 0.0  ;;  %v2052_v44 = vmul.f32 %v2044_v8, %v2011_v36  ;;  %v2061_v56 = vsel %vm88_vm1, %v2049_v9, 0.0  ;;  %v2249_v9 = vld [vmem:[%s4509_s20 + $0x10] sm:$0xff] }
 0x91a   :  { %2059 = vadd.xlane.f32.xlu1 %v2058_v25  ;;  %2056 = vadd.xlane.f32.xlu0 %v2055_v46  ;;  %v2053_v16 = vmul.f32 %v2044_v8, %v2012_v11  ;;  %v2051_v0 = vmul.f32 %v2044_v8, %v2010_v51  ;;  %v2054_v43 = vmul.f32 %v2044_v8, %v2013_v20  ;;  %v2064_v30 = vsel %vm88_vm1, %v2050_v27, 0.0  ;;  %v2248_v11 = vld [vmem:[%s4509_s20 + $0x8] sm:$0xff]  ;;  %v2247_v51 = vld [vmem:[%s4509_s20] sm:$0xff] }
 0x91b   :  { %v2070_v26 = vsel %vm88_vm1, %v2052_v44, 0.0  ;;  %v2250_v44 = vld [vmem:[%s4509_s20 + $0x18] sm:$0xff]  ;;  %v2341_v20 = vld [vmem:[%s4511_s22 + $0x48] sm:$0xff]  ;;  %v2336_v27 = vld [vmem:[%s4511_s22 + $0x20] sm:$0xff] }
 0x91c   :  { %v2073_v62 = vsel %vm88_vm1, %v2053_v16, 0.0  ;;  %v2067_v19 = vsel %vm88_vm1, %v2051_v0, 0.0  ;;  %v2076_v28 = vsel %vm88_vm1, %v2054_v43, 0.0  ;;  %2866 = vmatpush3.msra.mxu0 %v2250_v44  ;;  %v2343_v16 = vld [vmem:[%s4511_s22 + $0x58] sm:$0xff]  ;;  %v2342_v0 = vld [vmem:[%s4511_s22 + $0x50] sm:$0xff]  ;;  %v2337_v43 = vld [vmem:[%s4511_s22 + $0x28] sm:$0xff] }
 0x91d   :  { %2867 = vmatprep.subr.mxu0 %v3054_v63 }
 0x91e   :  { %2071 = vadd.xlane.f32.xlu1 %v2070_v26  ;;  %2062 = vadd.xlane.f32.xlu0 %v2061_v56  ;;  %v2345_v26 = vld [vmem:[%s4511_s22 + $0x68] sm:$0xff]  ;;  %v2344_v56 = vld [vmem:[%s4511_s22 + $0x60] sm:$0xff] }
 0x91f   :  { %2868 = vmatpush3.msra.mxu0 %v2249_v9 }
 0x920   :  { %2869 = vmatprep.subr.mxu0 %v3054_v63 }
 0x921   :  { %2870 = vmatpush3.msra.mxu0 %v2248_v11 }
 0x922   :  { %2074 = vadd.xlane.f32.xlu1 %v2073_v62  ;;  %2068 = vadd.xlane.f32.xlu0 %v2067_v19  ;;  %v2339_v62 = vld [vmem:[%s4511_s22 + $0x38] sm:$0xff]  ;;  %v2338_v19 = vld [vmem:[%s4511_s22 + $0x30] sm:$0xff] }
 0x923   :  { %2871 = vmatprep.subr.mxu0 %v3054_v63 }
 0x924   :  { %2872 = vmatpush3.msra.mxu0 %v2247_v51 }
 0x925   :  { %2911 = vmatprep.subr.mxu0 %v3054_v63 }
 0x926   :  { %2077 = vadd.xlane.f32.xlu1 %v2076_v28  ;;  %2065 = vadd.xlane.f32.xlu0 %v2064_v30  ;;  %v2335_v28 = vld [vmem:[%s4511_s22 + $0x18] sm:$0xff] }
 0x9a3   :  { %v2060_v39 = vpop.xlane.xlu1 %2059  ;;  %v2057_v37 = vpop.xlane.xlu0 %2056 }
 0x9a4   :  { %v2108_v54 = vrot.slane %v2060_v39, %v2107_v60  ;;  %v2103_v57 = vrot.slane %v2057_v37, %v2102_v52  ;;  %v2588_v39 = vld [vmem:[%s4508_s19] ss:$0 sm:$0xff] }
 0x9a6   :  { %v2110_v14 = vsel %vm2109_vm4, %v2108_v54, %v2103_v57  ;;  %v2427_v54 = vld [vmem:[%s4513_s24 + $0x8] sm:$0xff]  ;;  %v2426_v57 = vld [vmem:[%s4513_s24] sm:$0xff] }
 0x9a7   :  { %v2072_v29 = vpop.xlane.xlu1 %2071  ;;  %v2063_v5 = vpop.xlane.xlu0 %2062 }
 0x9a8   :  { %v2132_v42 = vrot.slane %v2072_v29, %v2107_v60  ;;  %v2115_v41 = vrot.slane %v2063_v5, %v2114_v3  ;;  %v2333_v29 = vld [vmem:[%s4511_s22 + $0x8] sm:$0xff]  ;;  %v2332_v5 = vld [vmem:[%s4511_s22] sm:$0xff] }
 0x9a9   :  { %v2589_v60 = vld [vmem:[%s4562_s16] ss:$0 sm:$0xff] }
 0x9aa   :  { %v2117_v1 = vsel %vm2116_vm5, %v2115_v41, %v2110_v14 }
 0x9ab   :  { %v2075_v40 = vpop.xlane.xlu1 %2074  ;;  %v2069_v13 = vpop.xlane.xlu0 %2068 }
 0x9ac   :  { %v2128_v22 = vrot.slane %v2069_v13, %v2102_v52  ;;  %v2137_v21 = vrot.slane %v2075_v40, %v2114_v3 }
 0x9ae   :  { %v2133_v59 = vsel %vm2109_vm4, %v2132_v42, %v2128_v22  ;;  %v2591_v42 = vld [vmem:[%s4512_s23] ss:$0 sm:$0xff] }
 0x9af   :  { %v2078_v61 = vpop.xlane.xlu1 %2077  ;;  %v2066_v33 = vpop.xlane.xlu0 %2065  ;;  %v2138_v35 = vsel %vm2116_vm5, %v2137_v21, %v2133_v59 }
 0x9b0   :  { %v2142_v47 = vrot.slane %v2078_v61, %v2121_v32  ;;  %v2122_v6 = vrot.slane %v2066_v33, %v2121_v32  ;;  %v2428_v32 = vld [vmem:[%s4513_s24 + $0x10] sm:$0xff]  ;;  %v2592_v61 = vld [vmem:[%s4514_s25] ss:$0 sm:$0xff]  ;;  %s3057_s24 = smov [#allocation3]  }
 0x9b1   :  { %s2518_s9 = sshll.u32 %s3057_s24, 4  ;;  %s2519_s9 = int_to_ptr.vmem [resolvable:$true] %s2518_s9 }
 0x9b2   :  { %v2143_v31 = vsel %vm2123_vm6, %v2142_v47, %v2138_v35  ;;  %v2124_v53 = vsel %vm2123_vm6, %v2122_v6, %v2117_v1  ;;  %s3031_s23 = scalar_lea.vmem %s2519_s9, 32  ;;  %p3036_p1 = scmp.lt.s32.totalorder %s2519_s9, %s2519_s9 }
 0x9b3   :  { %v2145_v7 = vsel %vm2144_vm7, %v2143_v31, %v2124_v53  ;;  %p3032_p0 = scmp.ne.s32.totalorder %s2519_s9, %s3031_s23  ;;  %p3037_p2 = scmp.lt.s32.totalorder %s3031_s23, %s3031_s23 }
 0x9b4   :  { %2863 = vmatmul.mubr.msk.f32.vlgmr.msra.gmra.mxu1 %vm88_vm1, %v2145_v7 }
 0x9b5   :  { %2908 = vmatprep.mubr.msk.f32.mxu1 %vm3055_vm0, %v3054_v63  ;;  %2877 = vmatpush3.msra.mxu1 %v2347_v12  ;;  %p3038_p3 = por %p3037_p2, %p3036_p1 }
 0x9b6   :  { %2878 = vmatprep.subr.mxu1 %v3054_v63 }
 0x9b7   :  { %2879 = vmatpush3.msra.mxu1 %v2346_v15  ;;  %p3039_p4 = pnand %p3038_p3, %p3032_p0 }
 0x9b8   :  { %2880 = vmatprep.subr.mxu1 %v3054_v63 }
 0x9b9   :  { %2881 = vmatpush3.msra.mxu1 %v2345_v26 }
 0x9ba   :  { %2882 = vmatprep.subr.mxu1 %v3054_v63 }
 0x9bb   :  { %2883 = vmatpush3.msra.mxu1 %v2344_v56 }
 0x9bc   :  { %2884 = vmatprep.subr.mxu1 %v3054_v63 }
 0x9bd   :  { %2885 = vmatpush3.msra.mxu1 %v2343_v16 }
 0x9be   :  { %2886 = vmatprep.subr.mxu1 %v3054_v63 }
 0x9bf   :  { %2887 = vmatpush3.msra.mxu1 %v2342_v0 }
 0x9c0   :  { %2888 = vmatprep.subr.mxu1 %v3054_v63 }
 0x9c1   :  { %2889 = vmatpush3.msra.mxu1 %v2341_v20 }
 0x9c2   :  { %2890 = vmatprep.subr.mxu1 %v3054_v63 }
 0x9c3   :  { %2891 = vmatpush3.msra.mxu1 %v2340_v50 }
 0x9c4   :  { %2892 = vmatprep.subr.mxu1 %v3054_v63 }
 0x9c5   :  { %2893 = vmatpush3.msra.mxu1 %v2339_v62 }
 0x9c6   :  { %2894 = vmatprep.subr.mxu1 %v3054_v63 }
 0x9c7   :  { %2895 = vmatpush3.msra.mxu1 %v2338_v19 }
 0x9c8   :  { %2896 = vmatprep.subr.mxu1 %v3054_v63 }
 0x9c9   :  { %2897 = vmatpush3.msra.mxu1 %v2337_v43 }
 0x9ca   :  { %2898 = vmatprep.subr.mxu1 %v3054_v63 }
 0x9cb   :  { %2899 = vmatpush3.msra.mxu1 %v2336_v27 }
 0x9cc   :  { %2900 = vmatprep.subr.mxu1 %v3054_v63 }
 0x9cd   :  { %2901 = vmatpush3.msra.mxu1 %v2335_v28 }
 0x9ce   :  { %2902 = vmatprep.subr.mxu1 %v3054_v63 }
 0x9cf   :  { %2903 = vmatpush3.msra.mxu1 %v2334_v2 }
 0x9d0   :  { %2904 = vmatprep.subr.mxu1 %v3054_v63 }
 0x9d1   :  { %2905 = vmatpush3.msra.mxu1 %v2333_v29 }
 0x9d2   :  { %2906 = vmatprep.subr.mxu1 %v3054_v63 }
 0x9d3   :  { %2907 = vmatpush3.msra.mxu1 %v2332_v5 }
 0xa74   :  { %v2214_v10 = vpop.f32.mrf.mxu1 }
 0xa75   :  { %v4366_v17 = vadd.f32 %v2585_v18, %v2214_v10 }
 0xa76   :  { %v2864_v48 = vpop.f32.mrf.mxu1 }
 0xa77   :  { %v2220_v36 = vsel %vm1780_vm3, %v4366_v17, 0.0 }
 0xa78   :  { %2221 = vadd.xlane.f32.xlu0 %v2220_v36 }
 0xb01   :  { %v2222_v8 = vpop.xlane.xlu0 %2221 }
 0xb02   :  { %v2223_v45 = vmul.f32 0.03125, %v2222_v8 }
 0xb04   :  { %v2224_v4 = vsub.f32 %v4366_v17, %v2223_v45 }
 0xb06   :  { %v2225_v25 = vmul.f32 %v2224_v4, %v2224_v4 }
 0xb08   :  { %v2226_v46 = vsel %vm1780_vm3, %v2225_v25, 0.0 }
 0xb09   :  { %2227 = vadd.xlane.f32.xlu1 %v2226_v46 }
 0xb92   :  { %v2228_v30 = vpop.xlane.xlu1 %2227 }
 0xb93   :  { %v2229_v58 = vmul.f32 0.03125, %v2228_v30 }
 0xb95   :  { %v2230_v24 = vadd.f32 1e-05, %v2229_v58 }
 0xb97   :  { %3023 = vrsqrt.f32 %v2230_v24 }
 0xba4   :  { %v3024_v23 = vpop.eup %3023 }
 0xba5   :  { %v2232_v49 = vmul.f32 %v3024_v23, %v2224_v4 }
 0xba7   :  { %v2239_v37 = vmul.f32 %v2587_v55, %v2232_v49 }
 0xba9   :  { %v2246_v34 = vadd.f32 %v2588_v39, %v2239_v37 }
 0xbab   :  { %2874 = vmatmul.mubr.msk.f32.vlgmr.msra.gmra.mxu0 %vm88_vm1, %v2246_v34 }
 0xbac   :  { %2919 = vmatprep.mubr.msk.f32.mxu0 %vm3055_vm0, %v3054_v63  ;;  %2912 = vmatpush3.msra.mxu0 %v2429_v38 }
 0xbad   :  { %2913 = vmatprep.subr.mxu0 %v3054_v63 }
 0xbae   :  { %2914 = vmatpush3.msra.mxu0 %v2428_v32 }
 0xbaf   :  { %2915 = vmatprep.subr.mxu0 %v3054_v63 }
 0xbb0   :  { %2916 = vmatpush3.msra.mxu0 %v2427_v54 }
 0xbb1   :  { %2917 = vmatprep.subr.mxu0 %v3054_v63 }
 0xbb2   :  { %2918 = vmatpush3.msra.mxu0 %v2426_v57 }
 0xc6b   :  { %v2327_v52 = vpop.f32.mrf.mxu0 }
 0xc6c   :  { %v2328_v3 = vadd.f32 %v2589_v60, %v2327_v52 }
 0xc6d   :  { %v2875_v40 = vpop.f32.mrf.mxu0 }
 0xc6e   :  { %v2331_v13 = vmax.f32 %v2328_v3, 0.0 }
 0xc70   :  { %2909 = vmatmul.mubr.f32.vlgmr.msra.gmra.mxu1 %v2331_v13 }
 0xd30   :  { %v2421_v22 = vpop.f32.mrf.mxu1 }
 0xd31   :  { %v2422_v41 = vadd.f32 %v2591_v42, %v2421_v22 }
 0xd32   :  { %v2910_v21 = vpop.f32.mrf.mxu1 }
 0xd33   :  { %v2425_v59 = vadd.f32 %v2422_v41, %v4366_v17 }
 0xd35   :  { %2920 = vmatmul.mubr.msk.f32.vlgmr.msra.gmra.mxu0 %vm88_vm1, %v2425_v59 }
 0xdf5   :  { %v2506_v33 = vpop.f32.mrf.mxu0 }
 0xdf6   :  { %v2507_v63 = vadd.f32 %v2592_v61, %v2506_v33 }
 0xdf7   :  { %v2921_v14 = vpop.f32.mrf.mxu0 }
 0xdf8   :  { %2511 = vst.msk [vmem:[#allocation3] sm:$0x3] %vm2510_vm8, %v2507_v63 }
 0xdf9   :  { %3042 = shalt.err (!%p3039_p4)
}
 0xdfa   :  { %2521 = dma.vmem_to_hbm [thread:$0]  %s2519_s9, 32, %s4515_s26, [#allocation4]  }
 0xdfb   :  { %3051 = dma.done.wait [#allocation4], 32  }
 0xdfc   :  { %3052 = vsyncadd [#allocation4], 4294967264 }
 0xdfd   :  { %2525 = vsyncpa [#allocation4], 1 }

</bundles_post_ra>
